<compile_context>
chip_gen: v5e
topology: v5e:2x2
jax: 0.10.0
libtpu: 0.0.40
codegen_flags: <defaults>
</compile_context>

<pallas_src>
import functools
import math

import jax
import jax.numpy as jnp
from jax.experimental import pallas as pl
from jax.experimental.pallas import tpu as pltpu


def _elu(v):
    # ELU(alpha=1.0); clamp exp's argument so the unselected branch never produces inf.
    return jnp.where(v > 0.0, v, jnp.exp(jnp.minimum(v, 0.0)) - 1.0)


# -----------------------------------------------------------------------------
# Fused residual-block kernel.  One grid step == one batch image.
# Input slab is padded NHWC (Hp, Wp, C); all compute/stores are channels-on-sublanes,
# spatial-on-lanes: (channels, H*W).
# -----------------------------------------------------------------------------
def _resblock_kernel(*refs, H, W, Kh, Kw, dh, dw, ct, cl, true_skip):
    if true_skip:
        xp_ref, w1_ref, b1_ref, w2_ref, b2_ref, o_ref = refs
        ws_ref = bs_ref = None
    else:
        xp_ref, w1_ref, b1_ref, w2_ref, b2_ref, ws_ref, bs_ref, o_ref = refs

    cin = xp_ref.shape[-1]
    mm_dtype = w1_ref.dtype                 # bf16 MXU inputs, f32 accumulation

    xp = xp_ref[0]                          # (Hp, Wp, cin) f32 padded slab
    a = _elu(xp)                            # ELU hoisted: one transcendental pass

    # In-VMEM im2col (never touches HBM): each tap is sliced + reshaped exactly once.
    # Reshape (H, W, cin) -> (H*W, cin) only collapses leading dims (lane dim preserved).
    taps = []
    for ih in range(Kh):
        for iw in range(Kw):
            taps.append(a[ih * dh: ih * dh + H, iw * dw: iw * dw + W, :]
                        .reshape(H * W, cin))
    xcol = jnp.concatenate(taps, axis=1)                 # (H*W, Kh*Kw*cin) f32
    xcol_t = jnp.transpose(xcol).astype(mm_dtype)        # (Kh*Kw*cin, H*W): spatial -> lanes

    # conv1 as a single MXU matmul: M=hidden, K=Kh*Kw*cin, N=H*W (lane-dense).
    y1 = jnp.dot(w1_ref[...], xcol_t,
                 preferred_element_type=jnp.float32)     # (hidden, H*W) f32
    h1 = _elu(y1 + b1_ref[...])                          # bias (hidden, 1) broadcasts on lanes

    # conv2 (1x1) fused as one matmul.
    y = jnp.dot(w2_ref[...], h1.astype(mm_dtype),
                preferred_element_type=jnp.float32) + b2_ref[...]   # (cout, H*W)

    # Residual on the raw (un-activated, f32) centre crop.
    xc = jnp.transpose(xp[ct: ct + H, cl: cl + W, :].reshape(H * W, cin))   # (cin, H*W)
    if true_skip:
        y = y + xc
    else:
        y = y + jnp.dot(ws_ref[...], xc.astype(mm_dtype),
                        preferred_element_type=jnp.float32) + bs_ref[...]

    o_ref[0] = y.astype(o_ref.dtype)        # (cout, H*W): unmasked lane-dense store


def _run_fused_block(xp, params, *, H, W, Kh, Kw, dh, dw, ct, cl, true_skip):
    B, Hp, Wp, cin = xp.shape
    hidden, ktot = params["w1"].shape
    cout = params["w2"].shape[0]

    kern = functools.partial(_resblock_kernel, H=H, W=W, Kh=Kh, Kw=Kw,
                             dh=dh, dw=dw, ct=ct, cl=cl, true_skip=true_skip)

    in_specs = [
        pl.BlockSpec((1, Hp, Wp, cin), lambda b: (b, 0, 0, 0)),   # padded NHWC image
        pl.BlockSpec((hidden, ktot), lambda b: (0, 0)),           # conv1 weights (hidden, Kh*Kw*cin)
        pl.BlockSpec((hidden, 1), lambda b: (0, 0)),              # conv1 bias
        pl.BlockSpec((cout, hidden), lambda b: (0, 0)),           # conv2 (1x1) weights
        pl.BlockSpec((cout, 1), lambda b: (0, 0)),                # conv2 bias
    ]
    args = [xp, params["w1"], params["b1"], params["w2"], params["b2"]]
    if not true_skip:
        in_specs += [
            pl.BlockSpec((cout, cin), lambda b: (0, 0)),          # shortcut 1x1 weights
            pl.BlockSpec((cout, 1), lambda b: (0, 0)),            # shortcut bias
        ]
        args += [params["ws"], params["bs"]]

    return pl.pallas_call(
        kern,
        out_shape=jax.ShapeDtypeStruct((B, cout, H * W), jnp.float32),
        grid=(B,),
        in_specs=in_specs,
        out_specs=pl.BlockSpec((1, cout, H * W), lambda b: (b, 0, 0)),
        compiler_params=pltpu.CompilerParams(
            dimension_semantics=("parallel",),   # v7x: shard batch over 2 TCs
        ),
    )(*args)


# -----------------------------------------------------------------------------
# Public forward (PyTorch-compatible NCHW interface) and parameter construction.
# -----------------------------------------------------------------------------
def seanet_resnet_block_2d(x, params, *, kernel_sizes=((3, 3), (1, 1)),
                           dilations=((1, 1), (1, 1)), causal=False,
                           true_skip=True):
    """SEANetResnetBlock2d.forward.  x: (B, C, H, W) float32."""
    B, C, H, W = x.shape
    (k1h, k1w), (k2h, k2w) = kernel_sizes
    (d1h, d1w), _ = dilations
    assert (k2h, k2w) == (1, 1), "fused kernel supports the default 1x1 second conv"

    # SConv2d "same-ish" padding (stride 1 -> extra_padding == 0), reflect mode.
    pt_h = (k1h - 1) * d1h
    pt_w = (k1w - 1) * d1w
    pr_h = pt_h // 2
    pad_top = pt_h - pr_h
    if causal:                       # causal padding only on the last (time) axis
        pad_left, pr_w = pt_w, 0
    else:
        pr_w = pt_w // 2
        pad_left = pt_w - pr_w
    # PyTorch ReflectionPad requires pad width < spatial extent.
    assert max(pad_top, pr_h) < H and max(pad_left, pr_w) < W, \
        "reflect padding must be smaller than the spatial extent"

    # Single input-boundary pass (XLA fuses transpose+pad into one copy); the kernel
    # emits (B, C, H*W) directly so no output transpose is needed (reshape is free).
    x_nhwc = jnp.transpose(x, (0, 2, 3, 1))
    xp = jnp.pad(x_nhwc, ((0, 0), (pad_top, pr_h), (pad_left, pr_w), (0, 0)),
                 mode="reflect")

    out = _run_fused_block(xp, params, H=H, W=W, Kh=k1h, Kw=k1w,
                           dh=d1h, dw=d1w, ct=pad_top, cl=pad_left,
                           true_skip=true_skip)          # (B, C, H*W)
    return out.reshape(B, C, H, W)


def init_params(key, dim, *, kernel_sizes=((3, 3), (1, 1)), compress=2,
                true_skip=True, mm_dtype=jnp.bfloat16):
    """Effective (weight_norm-folded) parameters, pre-laid-out for the kernel."""
    hidden = dim // compress
    (k1h, k1w), (k2h, k2w) = kernel_sizes
    ks = jax.random.split(key, 6)

    def conv(kw_, kb_, cin, cout, kh, kwid):
        fan_in = cin * kh * kwid
        bound = 1.0 / math.sqrt(fan_in)
        w = jax.random.uniform(kw_, (cout, cin, kh, kwid), jnp.float32, -bound, bound)
        b = jax.random.uniform(kb_, (cout,), jnp.float32, -bound, bound)
        return w, b

    w1, b1 = conv(ks[0], ks[1], dim, hidden, k1h, k1w)
    w2, b2 = conv(ks[2], ks[3], hidden, dim, k2h, k2w)
    params = {
        # (Cout,Cin,Kh,Kw) -> (Cout, Kh, Kw, Cin) -> (Cout, Kh*Kw*Cin): K index ordered
        # (tap-major, cin-minor) to match the in-kernel tap concatenation. bf16 for MXU.
        "w1": jnp.transpose(w1, (0, 2, 3, 1)).reshape(hidden, k1h * k1w * dim).astype(mm_dtype),
        "b1": b1.reshape(hidden, 1).astype(jnp.float32),
        "w2": w2.reshape(dim, hidden).astype(mm_dtype),     # (Cout, Cin) for (C, HW) operands
        "b2": b2.reshape(dim, 1).astype(jnp.float32),
    }
    if not true_skip:
        ws, bs = conv(ks[4], ks[5], dim, dim, 1, 1)
        params["ws"] = ws.reshape(dim, dim).astype(mm_dtype)
        params["bs"] = bs.reshape(dim, 1).astype(jnp.float32)
    return params


# -----------------------------------------------------------------------------
# Pure-JAX reference (f32 math on the bf16-stored weights) for a numerical check.
# Note: bf16 MXU activations vs the f32 reference give ~1e-2 relative error by design.
# -----------------------------------------------------------------------------
def _reference_block(x, params, *, kernel_sizes=((3, 3), (1, 1)),
                     dilations=((1, 1), (1, 1)), causal=False, true_skip=True):
    B, C, H, W = x.shape
    (k1h, k1w), _ = kernel_sizes
    (d1h, d1w), _ = dilations
    pt_h = (k1h - 1) * d1h
    pt_w = (k1w - 1) * d1w
    pr_h = pt_h // 2
    pad_top = pt_h - pr_h
    if causal:
        pad_left, pr_w = pt_w, 0
    else:
        pr_w = pt_w // 2
        pad_left = pt_w - pr_w
    xp = jnp.pad(x, ((0, 0), (0, 0), (pad_top, pr_h), (pad_left, pr_w)), mode="reflect")

    hidden = params["w1"].shape[0]
    w1 = params["w1"].astype(jnp.float32).reshape(hidden, k1h, k1w, C)
    a = _elu(xp)
    acc = jnp.zeros((B, hidden, H, W), jnp.float32)
    for ih in range(k1h):
        for iw in range(k1w):
            tap = a[:, :, ih * d1h: ih * d1h + H, iw * d1w: iw * d1w + W]
            acc = acc + jnp.einsum("bchw,dc->bdhw", tap, w1[:, ih, iw, :])
    h1 = _elu(acc + params["b1"].reshape(1, hidden, 1, 1))
    w2 = params["w2"].astype(jnp.float32)
    y = jnp.einsum("bchw,dc->bdhw", h1, w2) + params["b2"].reshape(1, C, 1, 1)
    xc = xp[:, :, pad_top: pad_top + H, pad_left: pad_left + W]
    if true_skip:
        y = y + xc
    else:
        y = y + jnp.einsum("bchw,dc->bdhw", xc, params["ws"].astype(jnp.float32)) \
              + params["bs"].reshape(1, C, 1, 1)
    return y


# -----------------------------------------------------------------------------
if __name__ == "__main__":
    key = jax.random.PRNGKey(0)
    kp, kx = jax.random.split(key)

    B, C, H, W = 2, 32, 16, 16          # dim=32, compress=2 -> hidden=16
    x = jax.random.normal(kx, (B, C, H, W), jnp.float32)

    # Module defaults: kernel_sizes=[(3,3),(1,1)], dilations=[(1,1),(1,1)], true_skip=True.
    p_id = init_params(kp, dim=C, true_skip=True)
    y_id = jax.block_until_ready(seanet_resnet_block_2d(x, p_id, true_skip=True))
    assert y_id.shape == (B, C, H, W), y_id.shape
    assert bool(jnp.all(jnp.isfinite(y_id)))
    ref_id = _reference_block(x, p_id, true_skip=True)
    assert bool(jnp.allclose(y_id, ref_id, atol=0.1, rtol=0.1)), \
        float(jnp.max(jnp.abs(y_id - ref_id)))

    # Also exercise the fused learned 1x1 shortcut path (true_skip=False).
    p_sc = init_params(kp, dim=C, true_skip=False)
    y_sc = jax.block_until_ready(seanet_resnet_block_2d(x, p_sc, true_skip=False))
    assert y_sc.shape == (B, C, H, W), y_sc.shape
    assert bool(jnp.all(jnp.isfinite(y_sc)))
    ref_sc = _reference_block(x, p_sc, true_skip=False)
    assert bool(jnp.allclose(y_sc, ref_sc, atol=0.1, rtol=0.1)), \
        float(jnp.max(jnp.abs(y_sc - ref_sc)))

    print("KERNEL_OK")
</pallas_src>

<mosaic_0001>
module attributes {stable_mosaic.version = 11 : i64} {
  func.func @_resblock_kernel(%arg0: i32, %arg1: memref<1x18x18x32xf32, #tpu.memory_space<vmem>>, %arg2: memref<16x288xbf16, #tpu.memory_space<vmem>>, %arg3: memref<16x1xf32, #tpu.memory_space<vmem>>, %arg4: memref<32x16xbf16, #tpu.memory_space<vmem>>, %arg5: memref<32x1xf32, #tpu.memory_space<vmem>>, %arg6: memref<1x32x256xf32, #tpu.memory_space<vmem>>) attributes {dimension_semantics = [#tpu.dimension_semantics<parallel>], iteration_bounds = array<i64: 2>, scalar_prefetch = 0 : i64, scratch_operands = 0 : i64, tpu.core_type = #tpu.core_type<tc>, window_params = [{transform_indices = @transform_0, window_bounds = array<i64: 1, 18, 18, 32>}, {pipeline_mode = #tpu.pipeline_mode<synchronous>, transform_indices = @transform_1, window_bounds = array<i64: 16, 288>}, {pipeline_mode = #tpu.pipeline_mode<synchronous>, transform_indices = @transform_2, window_bounds = array<i64: 16, 1>}, {pipeline_mode = #tpu.pipeline_mode<synchronous>, transform_indices = @transform_3, window_bounds = array<i64: 32, 16>}, {pipeline_mode = #tpu.pipeline_mode<synchronous>, transform_indices = @transform_4, window_bounds = array<i64: 32, 1>}, {transform_indices = @transform_5, window_bounds = array<i64: 1, 32, 256>}]} {
    %c0 = arith.constant 0 : index
    %c0_0 = arith.constant 0 : index
    %c0_1 = arith.constant 0 : index
    %c0_2 = arith.constant 0 : index
    %0 = vector.load %arg1[%c0, %c0_0, %c0_1, %c0_2] : memref<1x18x18x32xf32, #tpu.memory_space<vmem>>, vector<1x18x18x32xf32>
    %1 = vector.shape_cast %0 : vector<1x18x18x32xf32> to vector<18x18x32xf32>
    %cst = arith.constant 0.000000e+00 : f32
    %2 = vector.broadcast %cst : f32 to vector<18x18x32xf32>
    %3 = arith.cmpf ogt, %1, %2 : vector<18x18x32xf32>
    %cst_3 = arith.constant 0.000000e+00 : f32
    %4 = vector.broadcast %cst_3 : f32 to vector<18x18x32xf32>
    %5 = arith.minimumf %1, %4 : vector<18x18x32xf32>
    %6 = math.exp %5 : vector<18x18x32xf32>
    %cst_4 = arith.constant 1.000000e+00 : f32
    %7 = vector.broadcast %cst_4 : f32 to vector<18x18x32xf32>
    %8 = arith.subf %6, %7 : vector<18x18x32xf32>
    %9 = arith.select %3, %1, %8 : vector<18x18x32xi1>, vector<18x18x32xf32>
    %10 = vector.extract_strided_slice %9 {offsets = [0, 0, 0], sizes = [16, 16, 32], strides = [1, 1, 1]} : vector<18x18x32xf32> to vector<16x16x32xf32>
    %11 = vector.shape_cast %10 : vector<16x16x32xf32> to vector<256x32xf32>
    %12 = vector.extract_strided_slice %9 {offsets = [0, 1, 0], sizes = [16, 16, 32], strides = [1, 1, 1]} : vector<18x18x32xf32> to vector<16x16x32xf32>
    %13 = vector.shape_cast %12 : vector<16x16x32xf32> to vector<256x32xf32>
    %14 = vector.extract_strided_slice %9 {offsets = [0, 2, 0], sizes = [16, 16, 32], strides = [1, 1, 1]} : vector<18x18x32xf32> to vector<16x16x32xf32>
    %15 = vector.shape_cast %14 : vector<16x16x32xf32> to vector<256x32xf32>
    %16 = vector.extract_strided_slice %9 {offsets = [1, 0, 0], sizes = [16, 16, 32], strides = [1, 1, 1]} : vector<18x18x32xf32> to vector<16x16x32xf32>
    %17 = vector.shape_cast %16 : vector<16x16x32xf32> to vector<256x32xf32>
    %18 = vector.extract_strided_slice %9 {offsets = [1, 1, 0], sizes = [16, 16, 32], strides = [1, 1, 1]} : vector<18x18x32xf32> to vector<16x16x32xf32>
    %19 = vector.shape_cast %18 : vector<16x16x32xf32> to vector<256x32xf32>
    %20 = vector.extract_strided_slice %9 {offsets = [1, 2, 0], sizes = [16, 16, 32], strides = [1, 1, 1]} : vector<18x18x32xf32> to vector<16x16x32xf32>
    %21 = vector.shape_cast %20 : vector<16x16x32xf32> to vector<256x32xf32>
    %22 = vector.extract_strided_slice %9 {offsets = [2, 0, 0], sizes = [16, 16, 32], strides = [1, 1, 1]} : vector<18x18x32xf32> to vector<16x16x32xf32>
    %23 = vector.shape_cast %22 : vector<16x16x32xf32> to vector<256x32xf32>
    %24 = vector.extract_strided_slice %9 {offsets = [2, 1, 0], sizes = [16, 16, 32], strides = [1, 1, 1]} : vector<18x18x32xf32> to vector<16x16x32xf32>
    %25 = vector.shape_cast %24 : vector<16x16x32xf32> to vector<256x32xf32>
    %26 = vector.extract_strided_slice %9 {offsets = [2, 2, 0], sizes = [16, 16, 32], strides = [1, 1, 1]} : vector<18x18x32xf32> to vector<16x16x32xf32>
    %27 = vector.shape_cast %26 : vector<16x16x32xf32> to vector<256x32xf32>
    %28 = tpu.concatenate %11, %13, %15, %17, %19, %21, %23, %25, %27 in 1 : vector<256x32xf32>, vector<256x32xf32>, vector<256x32xf32>, vector<256x32xf32>, vector<256x32xf32>, vector<256x32xf32>, vector<256x32xf32>, vector<256x32xf32>, vector<256x32xf32> -> vector<256x288xf32>
    %29 = tpu.transpose %28, [1, 0] : vector<256x288xf32> -> vector<288x256xf32>
    %30 = arith.truncf %29 : vector<288x256xf32> to vector<288x256xbf16>
    %c0_5 = arith.constant 0 : index
    %c0_6 = arith.constant 0 : index
    %31 = vector.load %arg2[%c0_5, %c0_6] : memref<16x288xbf16, #tpu.memory_space<vmem>>, vector<16x288xbf16>
    %cst_7 = arith.constant dense<0.000000e+00> : vector<16x256xf32>
    %32 = tpu.matmul %31, %30, %cst_7 {dimension_numbers = #tpu.dot_dimension_numbers<[1], [0], [0], [1], [0, 0, 1, 1], [], []>} : vector<16x288xbf16>, vector<288x256xbf16>, vector<16x256xf32> -> vector<16x256xf32>
    %c0_8 = arith.constant 0 : index
    %c0_9 = arith.constant 0 : index
    %33 = vector.load %arg3[%c0_8, %c0_9] : memref<16x1xf32, #tpu.memory_space<vmem>>, vector<16x1xf32>
    %34 = vector.broadcast %33 : vector<16x1xf32> to vector<16x256xf32>
    %35 = arith.addf %32, %34 : vector<16x256xf32>
    %cst_10 = arith.constant 0.000000e+00 : f32
    %36 = vector.broadcast %cst_10 : f32 to vector<16x256xf32>
    %37 = arith.cmpf ogt, %35, %36 : vector<16x256xf32>
    %cst_11 = arith.constant 0.000000e+00 : f32
    %38 = vector.broadcast %cst_11 : f32 to vector<16x256xf32>
    %39 = arith.minimumf %35, %38 : vector<16x256xf32>
    %40 = math.exp %39 : vector<16x256xf32>
    %cst_12 = arith.constant 1.000000e+00 : f32
    %41 = vector.broadcast %cst_12 : f32 to vector<16x256xf32>
    %42 = arith.subf %40, %41 : vector<16x256xf32>
    %43 = arith.select %37, %35, %42 : vector<16x256xi1>, vector<16x256xf32>
    %c0_13 = arith.constant 0 : index
    %c0_14 = arith.constant 0 : index
    %44 = vector.load %arg4[%c0_13, %c0_14] : memref<32x16xbf16, #tpu.memory_space<vmem>>, vector<32x16xbf16>
    %45 = arith.truncf %43 : vector<16x256xf32> to vector<16x256xbf16>
    %cst_15 = arith.constant dense<0.000000e+00> : vector<32x256xf32>
    %46 = tpu.matmul %44, %45, %cst_15 {dimension_numbers = #tpu.dot_dimension_numbers<[1], [0], [0], [1], [0, 0, 1, 1], [], []>} : vector<32x16xbf16>, vector<16x256xbf16>, vector<32x256xf32> -> vector<32x256xf32>
    %c0_16 = arith.constant 0 : index
    %c0_17 = arith.constant 0 : index
    %47 = vector.load %arg5[%c0_16, %c0_17] : memref<32x1xf32, #tpu.memory_space<vmem>>, vector<32x1xf32>
    %48 = vector.broadcast %47 : vector<32x1xf32> to vector<32x256xf32>
    %49 = arith.addf %46, %48 : vector<32x256xf32>
    %50 = vector.extract_strided_slice %1 {offsets = [1, 1, 0], sizes = [16, 16, 32], strides = [1, 1, 1]} : vector<18x18x32xf32> to vector<16x16x32xf32>
    %51 = vector.shape_cast %50 : vector<16x16x32xf32> to vector<256x32xf32>
    %52 = tpu.transpose %51, [1, 0] : vector<256x32xf32> -> vector<32x256xf32>
    %53 = arith.addf %49, %52 : vector<32x256xf32>
    %c0_18 = arith.constant 0 : index
    %c0_19 = arith.constant 0 : index
    %c0_20 = arith.constant 0 : index
    %54 = vector.load %arg6[%c0_18, %c0_19, %c0_20] : memref<1x32x256xf32, #tpu.memory_space<vmem>>, vector<1x32x256xf32>
    %55 = vector.shape_cast %54 : vector<1x32x256xf32> to vector<32x256xf32>
    %56 = vector.shape_cast %53 : vector<32x256xf32> to vector<1x32x256xf32>
    tpu.vector_store %arg6[%c0_18, %c0_19, %c0_20], %56 {strides = array<i32>} : memref<1x32x256xf32, #tpu.memory_space<vmem>>, vector<1x32x256xf32>,
    return
  }
  func.func @transform_0(%arg0: i32) -> (i32, i32, i32, i32) {
    %c0_i32 = arith.constant 0 : i32
    %c0_i32_0 = arith.constant 0 : i32
    %c0_i32_1 = arith.constant 0 : i32
    %c0_i32_2 = arith.constant 0 : i32
    return %arg0, %c0_i32, %c0_i32_0, %c0_i32_1 : i32, i32, i32, i32
  }
  func.func @transform_1(%arg0: i32) -> (i32, i32) {
    %c0_i32 = arith.constant 0 : i32
    %c0_i32_0 = arith.constant 0 : i32
    %c0_i32_1 = arith.constant 0 : i32
    return %c0_i32, %c0_i32_0 : i32, i32
  }
  func.func @transform_2(%arg0: i32) -> (i32, i32) {
    %c0_i32 = arith.constant 0 : i32
    %c0_i32_0 = arith.constant 0 : i32
    %c0_i32_1 = arith.constant 0 : i32
    return %c0_i32, %c0_i32_0 : i32, i32
  }
  func.func @transform_3(%arg0: i32) -> (i32, i32) {
    %c0_i32 = arith.constant 0 : i32
    %c0_i32_0 = arith.constant 0 : i32
    %c0_i32_1 = arith.constant 0 : i32
    return %c0_i32, %c0_i32_0 : i32, i32
  }
  func.func @transform_4(%arg0: i32) -> (i32, i32) {
    %c0_i32 = arith.constant 0 : i32
    %c0_i32_0 = arith.constant 0 : i32
    %c0_i32_1 = arith.constant 0 : i32
    return %c0_i32, %c0_i32_0 : i32, i32
  }
  func.func @transform_5(%arg0: i32) -> (i32, i32, i32) {
    %c0_i32 = arith.constant 0 : i32
    %c0_i32_0 = arith.constant 0 : i32
    %c0_i32_1 = arith.constant 0 : i32
    return %arg0, %c0_i32, %c0_i32_0 : i32, i32, i32
  }
}

</mosaic_0001>

<bundles_post_ra>
// kernel: tpu_custom_call.1
= control target key start
LH: loop header
LB: loop body
LE: loop exit
PB: predicated region body
PF: predicated region fallthrough
CT: control target
= control target key end

     0   :  { %10 = vsyncpa [#allocation3], 0  ;;  %s5864_s0 = inlined_call_operand.vmem [shape: f32[2,18,18,32], index: 0, kind: input, shape index: {}]   ;;  %s5865_s1 = inlined_call_operand.vmem [shape: bf16[16,288], index: 1, kind: input, shape index: {}]   ;;  %s5866_s2 = inlined_call_operand.vmem [shape: f32[16,1], index: 2, kind: input, shape index: {}]   ;;  %s5867_s3 = inlined_call_operand.vmem [shape: bf16[32,16], index: 3, kind: input, shape index: {}]   ;;  %s5868_s4 = inlined_call_operand.vmem [shape: f32[32,1], index: 4, kind: input, shape index: {}]   ;;  %s5869_s5 = inlined_call_operand.hbm [shape: f32[2,32,256], index: 5, kind: output, shape index: {}]  }
   0x1   :  { %12 = vsyncpa [#allocation3 + $0x1], 0  ;;  %s3617_s18 = smov 0   ;;  %s3619_s19 = smov 0  }
   0x2   :  { %s3621_s20 = smov 0   ;;  %s3623_s21 = smov 0  }
   0x3 LB: > { %s3638_s22 = sadd.s32 4294967295, %s3579_s21   ;;  %s2446_s23 = sadd.s32 4294967294, %s3579_s21   ;;  %s3579_s21 = sphi %s3623_s21, %s6211_s21   ;;  %s3575_s20 = sphi %s3621_s20, %s6210_s20   ;;  %s3571_s19 = sphi %s3619_s19, %s6209_s19   ;;  %s3567_s18 = sphi %s3617_s18, %s6208_s18  }
   0x4   : > { %s3642_s24 = sadd.s32 1, %s3579_s21   ;;  %s135_s25 = sadd.s32 1, %s3575_s20 }
   0x5   : > { %s132_s26 = ssub.s32 %s3579_s21, %s3642_s24  ;;  %p145_p0 = scmp.ne.s32.totalorder %s3575_s20, %s3571_s19 }
   0x6   : > { %p133_p1 = scmp.eq.s32.totalorder %s132_s26, 0  ;;  %p146_p2 = scmp.eq.s32.totalorder %s3638_s22, 1 }
   0x7   : > { %p151_p3 = scmp.ne.s32.totalorder %s3571_s19, %s3567_s18  ;;  %p152_p4 = scmp.eq.s32.totalorder %s2446_s23, 1 }
   0x8   : > { %s3653_s27 = scalar_select %p133_p1, %s3575_s20, %s135_s25  }
   0x9   : > { %p3655_p5 = por %p146_p2, %p145_p0  ;;  %p3659_p6 = por %p152_p4, %p151_p3 }
   0xa   : > { %p2449_p7 = scmp.ge.s32.totalorder %s3579_s21, 1  ;;  %p190_p8 = scmp.lt.s32.totalorder %s3579_s21, 3 }
   0xc   : > { %p191_p9 = pnand %p2449_p7, %p190_p8 }
   0xe   : > { %194 = sbr.rel (%p191_p9) target bundleno = 1089 (0x441), region = 40 }
  0x13   : > { %p218_p10 = scmp.lt.s32.totalorder %s3638_s22, 1  ;;  %vm650_vm3 = vcmask 1046528   ;;  %s3581_s10 = smov 32  }
  0x14   : > { %s3582_s11 = smov 64   ;;  %s3583_s12 = smov 96  }
  0x15   : > { %s219_s30 = scalar_select %p218_p10, %s3638_s22, 1 }
  0x16   : > { %s3537_s7 = scalar_lea.hbm %s5869_s5, 128 }
  0x17   : > { %s2548_s6 = smul.u32 432, %s219_s30 }
  0x19   : > { %s3670_s9 = scalar_lea.vmem %s5864_s0, %s2548_s6 }
  0x1a   : > { %v3673_v0 = vld [vmem:[%s3670_s9 + $0x60] sm:$0xff]  ;;  %v3676_v1 = vld [vmem:[%s3670_s9 + $0x68] sm:$0xff]  ;;  %v3679_v2 = vld [vmem:[%s3670_s9 + $0x70] sm:$0x3] }
  0x1b   : > { %v344_v3 = vmin.f32 %v3673_v0, 0.0  ;;  %v3683_v4 = vld [vmem:[%s3670_s9 + $0x30] sm:$0xff]  ;;  %v3686_v5 = vld [vmem:[%s3670_s9 + $0x38] sm:$0xff]  ;;  %v345_v6 = vmin.f32 %v3676_v1, 0.0  ;;  %v346_v7 = vmin.f32 %v3679_v2, 0.0  ;;  %v3696_v12 = vld [vmem:[%s3670_s9] sm:$0xff] }
  0x1c   : > { %v3691_v8 = vld [vmem:[%s3670_s9 + $0x40] sm:$0x3]  ;;  %v338_v10 = vmin.f32 %v3683_v4, 0.0  ;;  %v339_v11 = vmin.f32 %v3686_v5, 0.0  ;;  %v3700_v16 = vld [vmem:[%s3670_s9 + $0x8] sm:$0xff]  ;;  %vm290_vm0 = vcmp.gt.f32.partialorder %v3673_v0, 0.0 }
  0x1d   : > { %v410_v9 = vmul.f32 1.442695, %v344_v3  ;;  %v412_v13 = vmul.f32 1.442695, %v345_v6  ;;  %v414_v14 = vmul.f32 1.442695, %v346_v7 }
  0x1e   : > { %v340_v15 = vmin.f32 %v3691_v8, 0.0  ;;  %v398_v17 = vmul.f32 1.442695, %v338_v10  ;;  %v400_v18 = vmul.f32 1.442695, %v339_v11  ;;  %vm291_vm1 = vcmp.gt.f32.partialorder %v3676_v1, 0.0 }
  0x1f   : > { %3353 = vpow2.f32 %v410_v9  ;;  %v3703_v19 = vld [vmem:[%s3670_s9 + $0x10] sm:$0x3]  ;;  %vm292_vm2 = vcmp.gt.f32.partialorder %v3679_v2, 0.0  ;;  %v332_v21 = vmin.f32 %v3696_v12, 0.0  ;;  %v333_v22 = vmin.f32 %v3700_v16, 0.0  ;;  %v3711_v23 = vld [vmem:[%s3670_s9 + $0x78] sm:$0xff] }
  0x20   : > { %3355 = vpow2.f32 %v412_v13  ;;  %v402_v20 = vmul.f32 1.442695, %v340_v15  ;;  %v3714_v24 = vld [vmem:[%s3670_s9 + $0x80] sm:$0xff]  ;;  %vm284_vm4 = vcmp.gt.f32.partialorder %v3683_v4, 0.0  ;;  %vm285_vm5 = vcmp.gt.f32.partialorder %v3686_v5, 0.0  ;;  %v3755_v56 = vld [vmem:[%s3670_s9 + $0x48] sm:$0xff] }
  0x21   : > { %3357 = vpow2.f32 %v414_v14  ;;  %v334_v25 = vmin.f32 %v3703_v19, 0.0  ;;  %v3720_v26 = vld [vmem:[%s3670_s9 + $0x88] sm:$0x3]  ;;  %vm286_vm6 = vcmp.gt.f32.partialorder %v3691_v8, 0.0  ;;  %v386_v27 = vmul.f32 1.442695, %v332_v21 }
  0x22   : > { %3359 = vpow2.f32 %v398_v17  ;;  %v388_v28 = vmul.f32 1.442695, %v333_v22  ;;  %v347_v30 = vmin.f32 %v3711_v23, 0.0  ;;  %v348_v31 = vmin.f32 %v3714_v24, 0.0  ;;  %v3795_v14 = vld [vmem:[%s3670_s9 + $0x50] sm:$0xff] }
  0x23   : > { %3361 = vpow2.f32 %v400_v18  ;;  %v390_v29 = vmul.f32 1.442695, %v334_v25  ;;  %vm278_vm7 = vcmp.gt.f32.partialorder %v3696_v12, 0.0  ;;  %vm279_vm8 = vcmp.gt.f32.partialorder %v3700_v16, 0.0 }
  0x24   : > { %3363 = vpow2.f32 %v402_v20  ;;  %v349_v33 = vmin.f32 %v3720_v26, 0.0  ;;  %v416_v36 = vmul.f32 1.442695, %v347_v30  ;;  %v418_v37 = vmul.f32 1.442695, %v348_v31 }
  0x25   : > { %v3354_v32 = vpop.eup %3353  ;;  %3365 = vpow2.f32 %v386_v27  ;;  %vm280_vm9 = vcmp.gt.f32.partialorder %v3703_v19, 0.0  ;;  %vm293_vm10 = vcmp.gt.f32.partialorder %v3711_v23, 0.0  ;;  %vm294_vm11 = vcmp.gt.f32.partialorder %v3714_v24, 0.0  ;;  %v3810_v20 = vld [vmem:[%s3670_s9 + $0x58] sm:$0x3] }
  0x26   : > { %v3356_v34 = vpop.eup %3355  ;;  %v2464_v35 = vadd.f32 -1.0, %v3354_v32  ;;  %3367 = vpow2.f32 %v388_v28  ;;  %v420_v40 = vmul.f32 1.442695, %v349_v33  ;;  %v341_v7 = vmin.f32 %v3755_v56, 0.0 }
  0x27   : > { %v3358_v38 = vpop.eup %3357  ;;  %v2465_v39 = vadd.f32 -1.0, %v3356_v34  ;;  %3369 = vpow2.f32 %v390_v29  ;;  %vm295_vm12 = vcmp.gt.f32.partialorder %v3720_v26, 0.0  ;;  %v342_v29 = vmin.f32 %v3795_v14, 0.0  ;;  %v3836_v34 = vld [vmem:[%s3670_s9 + $0x18] sm:$0xff] }
  0x28   : > { %v3360_v41 = vpop.eup %3359  ;;  %v2466_v42 = vadd.f32 -1.0, %v3358_v38  ;;  %v3732_v43 = vsel %vm290_vm0, %v3673_v0, %v2464_v35  ;;  %3371 = vpow2.f32 %v416_v36  ;;  %v343_v33 = vmin.f32 %v3810_v20, 0.0  ;;  %v3843_v38 = vld [vmem:[%s3670_s9 + $0x20] sm:$0xff] }
  0x29   : > { %v3362_v44 = vpop.eup %3361  ;;  %v3738_v45 = vsel %vm291_vm1, %v3676_v1, %v2465_v39  ;;  %v671_v46 = vrot.slane %v3732_v43, 1  ;;  %v2458_v47 = vadd.f32 -1.0, %v3360_v41  ;;  %3373 = vpow2.f32 %v418_v37 }
  0x2a   : > { %v3364_v48 = vpop.eup %3363  ;;  %v3744_v49 = vsel %vm292_vm2, %v3679_v2, %v2466_v42  ;;  %v672_v50 = vrot.slane %v3738_v45, 1  ;;  %v2459_v51 = vadd.f32 -1.0, %v3362_v44  ;;  %3375 = vpow2.f32 %v420_v40 }
  0x2b   : > { %v3366_v52 = vpop.eup %3365  ;;  %v674_v53 = vrot.slane %v3744_v49, 1  ;;  %v2460_v54 = vadd.f32 -1.0, %v3364_v48  ;;  %v3751_v55 = vsel %vm284_vm4, %v3683_v4, %v2458_v47  ;;  %v404_v37 = vmul.f32 1.442695, %v341_v7  ;;  %v3860_v47 = vld [vmem:[%s3670_s9 + $0xc0] sm:$0xff]  ;;  %v3863_v48 = vld [vmem:[%s3670_s9 + $0xc8] sm:$0xff] }
  0x2c   : > { %5976 = vst [vmem:[#allocation5_spill] sm:$0xff] %v3751_v55  ;;  %v3368_v57 = vpop.eup %3367  ;;  %v3758_v58 = vsel %vm650_vm3, %v671_v46, %v672_v50  ;;  %v3763_v59 = vsel %vm285_vm5, %v3686_v5, %v2459_v51  ;;  %v661_v60 = vrot.slane %v3751_v55, 1  ;;  %v2452_v61 = vadd.f32 -1.0, %v3366_v52 }
  0x2d   : > { %5977 = vst [vmem:[#allocation6_spill] sm:$0xff] %v3758_v58  ;;  %v3370_v62 = vpop.eup %3369  ;;  %v3767_v63 = vsel %vm650_vm3, %v672_v50, %v674_v53  ;;  %v3772_v0 = vsel %vm286_vm6, %v3691_v8, %v2460_v54  ;;  %v662_v1 = vrot.slane %v3763_v59, 1  ;;  %v2453_v2 = vadd.f32 -1.0, %v3368_v57  ;;  %v3866_v50 = vld [vmem:[%s3670_s9 + $0xd0] sm:$0x3]  ;;  %v3876_v57 = vld [vmem:[%s3670_s9 + $0xa8] sm:$0xff] }
  0x2e   : > { %5978 = vst [vmem:[#allocation7_spill] sm:$0xff] %v3763_v59  ;;  %v3372_v3 = vpop.eup %3371  ;;  %v3777_v4 = vpack.i.bf16 %v3767_v63, %v3758_v58  ;;  %v664_v5 = vrot.slane %v3772_v0, 1  ;;  %v2454_v6 = vadd.f32 -1.0, %v3370_v62  ;;  %v3787_v8 = vsel %vm278_vm7, %v3696_v12, %v2452_v61 }
  0x2f   : > { %5979 = vst [vmem:[#allocation8_spill] sm:$0xff] %v3767_v63  ;;  %v3374_v9 = vpop.eup %3373  ;;  %v3782_v10 = vsel %vm650_vm3, %v661_v60, %v662_v1  ;;  %v3792_v11 = vsel %vm279_vm8, %v3700_v16, %v2453_v2  ;;  %v2467_v13 = vadd.f32 -1.0, %v3372_v3  ;;  %v651_v18 = vrot.slane %v3787_v8, 1  ;;  %v3884_v2 = vld [vmem:[%s3670_s9 + $0xb0] sm:$0xff]  ;;  %v3890_v3 = vld [vmem:[%s3670_s9 + $0xb8] sm:$0x3] }
  0x30   : > { %5980 = vst [vmem:[#allocation9_spill] sm:$0xff] %v3777_v4  ;;  %v3376_v15 = vpop.eup %3375  ;;  %2615 = vrot.lane.b32.xlu2 %v3777_v4, %s3581_s10  ;;  %v3800_v17 = vsel %vm650_vm3, %v662_v1, %v664_v5  ;;  %v3805_v12 = vsel %vm280_vm9, %v3703_v19, %v2454_v6  ;;  %v652_v16 = vrot.slane %v3792_v11, 1  ;;  %v2468_v25 = vadd.f32 -1.0, %v3374_v9 }
  0x31   : > { %5981 = vst [vmem:[#allocation10_spill] sm:$0xff] %v3782_v10  ;;  %v3814_v21 = vpack.i.bf16 %v3800_v17, %v3782_v10  ;;  %v654_v22 = vrot.slane %v3805_v12, 1  ;;  %v2469_v27 = vadd.f32 -1.0, %v3376_v15  ;;  %v3822_v28 = vsel %vm293_vm10, %v3711_v23, %v2467_v13 }
  0x32   : > { %5982 = vst [vmem:[#allocation11_spill] sm:$0xff] %v3787_v8  ;;  %v653_v19 = vsel %vm650_vm3, %v651_v18, %v652_v16  ;;  %v3831_v31 = vsel %vm294_vm11, %v3714_v24, %v2468_v25  ;;  %v676_v32 = vrot.slane %v3822_v28, 1  ;;  %v3846_v24 = vld [vmem:[%s3670_s9 + $0x28] sm:$0x3]  ;;  %v406_v40 = vmul.f32 1.442695, %v342_v29 }
  0x33   : > { %5983 = vst [vmem:[#allocation12_spill] sm:$0xff] %v3792_v11  ;;  %2605 = vrot.lane.b32.xlu1 %v3814_v21, %s3581_s10  ;;  %v655_v30 = vsel %vm650_vm3, %v652_v16, %v654_v22  ;;  %v3839_v35 = vsel %vm295_vm12, %v3720_v26, %v2469_v27  ;;  %v677_v36 = vrot.slane %v3831_v31, 1  ;;  %v408_v41 = vmul.f32 1.442695, %v343_v33 }
  0x34   : > { %5984 = vst [vmem:[#allocation13_spill] sm:$0xff] %v3800_v17  ;;  %v2594_v23 = vpack.i.bf16 %v655_v30, %v653_v19  ;;  %v679_v39 = vrot.slane %v3839_v35, 1  ;;  %vm287_vm13 = vcmp.gt.f32.partialorder %v3755_v56, 0.0  ;;  %3377 = vpow2.f32 %v404_v37 }
  0x35   : > { %5985 = vst [vmem:[#allocation14_spill] sm:$0xff] %v3814_v21  ;;  %v3851_v42 = vsel %vm650_vm3, %v676_v32, %v677_v36  ;;  %3379 = vpow2.f32 %v406_v40  ;;  %v335_v44 = vmin.f32 %v3836_v34, 0.0  ;;  %v336_v46 = vmin.f32 %v3843_v38, 0.0  ;;  %v3917_v40 = vld [vmem:[%s3670_s9 + $0x90] sm:$0xff] }
  0x36   : > { %2595 = vrot.lane.b32.xlu0 %v2594_v23, %s3581_s10  ;;  %5986 = vst [vmem:[#allocation15_spill] sm:$0xff] %v3851_v42  ;;  %v3855_v26 = vsel %vm650_vm3, %v677_v36, %v679_v39  ;;  %vm288_vm14 = vcmp.gt.f32.partialorder %v3795_v14, 0.0  ;;  %3381 = vpow2.f32 %v408_v41  ;;  %v337_v52 = vmin.f32 %v3846_v24, 0.0 }
  0x37   : > { %5987 = vst [vmem:[#allocation16_spill] sm:$0xff] %v3855_v26  ;;  %v3870_v51 = vpack.i.bf16 %v3855_v26, %v3851_v42  ;;  %vm289_vm15 = vcmp.gt.f32.partialorder %v3810_v20, 0.0  ;;  %v392_v53 = vmul.f32 1.442695, %v335_v44  ;;  %v394_v54 = vmul.f32 1.442695, %v336_v46 }
  0x38   : > { %v396_v60 = vmul.f32 1.442695, %v337_v52  ;;  %v356_v61 = vmin.f32 %v3860_v47, 0.0  ;;  %v357_v62 = vmin.f32 %v3863_v48, 0.0  ;;  %v358_v1 = vmin.f32 %v3866_v50, 0.0 }
  0x39   : > { %5988 = vst [vmem:[#allocation17_spill] sm:$0xff] %v3870_v51  ;;  %2620 = vrot.lane.b32.xlu2 %v3870_v51, %s3581_s10  ;;  %vm281_vm0 = vcmp.gt.f32.partialorder %v3836_v34, 0.0  ;;  %vm282_vm1 = vcmp.gt.f32.partialorder %v3843_v38, 0.0  ;;  %vm283_vm2 = vcmp.gt.f32.partialorder %v3846_v24, 0.0  ;;  %3383 = vpow2.f32 %v392_v53  ;;  %v3926_v53 = vld [vmem:[%s3670_s9 + $0x98] sm:$0xff] }
  0x3a   : > { %v3378_v5 = vpop.eup %3377  ;;  %3385 = vpow2.f32 %v394_v54  ;;  %vm302_vm4 = vcmp.gt.f32.partialorder %v3860_v47, 0.0  ;;  %v434_v6 = vmul.f32 1.442695, %v356_v61  ;;  %v436_v7 = vmul.f32 1.442695, %v357_v62 }
  0x3b   : > { %v438_v9 = vmul.f32 1.442695, %v358_v1  ;;  %v3380_v13 = vpop.eup %3379  ;;  %v2461_v15 = vadd.f32 -1.0, %v3378_v5  ;;  %3387 = vpow2.f32 %v396_v60  ;;  %vm303_vm5 = vcmp.gt.f32.partialorder %v3863_v48, 0.0  ;;  %v3937_v1 = vld [vmem:[%s3670_s9 + $0xa0] sm:$0x3] }
  0x3c   : > { %v353_v18 = vmin.f32 %v3876_v57, 0.0  ;;  %v354_v16 = vmin.f32 %v3884_v2, 0.0  ;;  %v3382_v22 = vpop.eup %3381  ;;  %v2462_v25 = vadd.f32 -1.0, %v3380_v13  ;;  %vm304_vm6 = vcmp.gt.f32.partialorder %v3866_v50, 0.0 }
  0x3d   : > { %3389 = vpow2.f32 %v434_v6  ;;  %v355_v19 = vmin.f32 %v3890_v3, 0.0  ;;  %v2463_v27 = vadd.f32 -1.0, %v3382_v22  ;;  %v3901_v29 = vsel %vm287_vm13, %v3755_v56, %v2461_v15 }
  0x3e   : > { %3391 = vpow2.f32 %v436_v7  ;;  %vm299_vm7 = vcmp.gt.f32.partialorder %v3876_v57, 0.0  ;;  %v428_v30 = vmul.f32 1.442695, %v353_v18  ;;  %v3907_v32 = vsel %vm288_vm14, %v3795_v14, %v2462_v25 }
  0x3f   : > { %v666_v33 = vrot.slane %v3901_v29, 1  ;;  %3393 = vpow2.f32 %v438_v9  ;;  %v430_v23 = vmul.f32 1.442695, %v354_v16  ;;  %v3384_v36 = vpop.eup %3383  ;;  %v3913_v56 = vsel %vm289_vm15, %v3810_v20, %v2463_v27 }
  0x40   : > { %v667_v37 = vrot.slane %v3907_v32, 1  ;;  %3395 = vpow2.f32 %v428_v30  ;;  %v432_v39 = vmul.f32 1.442695, %v355_v19  ;;  %v3386_v14 = vpop.eup %3385  ;;  %v669_v41 = vrot.slane %v3913_v56, 1 }
  0x41   : > { %v2455_v44 = vadd.f32 -1.0, %v3384_v36  ;;  %vm300_vm8 = vcmp.gt.f32.partialorder %v3884_v2, 0.0  ;;  %3397 = vpow2.f32 %v430_v23  ;;  %v3388_v46 = vpop.eup %3387  ;;  %v2456_v20 = vadd.f32 -1.0, %v3386_v14 }
  0x42   : > { %v3922_v52 = vsel %vm650_vm3, %v666_v33, %v667_v37  ;;  %vm301_vm9 = vcmp.gt.f32.partialorder %v3890_v3, 0.0  ;;  %3399 = vpow2.f32 %v432_v39  ;;  %v3929_v60 = vsel %vm650_vm3, %v667_v37, %v669_v41 }
  0x43   : > { %5989 = vst [vmem:[#allocation18_spill] sm:$0xff] %v3922_v52  ;;  %v3390_v54 = vpop.eup %3389  ;;  %v2457_v61 = vadd.f32 -1.0, %v3388_v46  ;;  %v3934_v62 = vsel %vm281_vm0, %v3836_v34, %v2455_v44  ;;  %v350_v5 = vmin.f32 %v3917_v40, 0.0  ;;  %v3942_v7 = vpack.i.bf16 %v3929_v60, %v3922_v52 }
  0x44   : > { %5990 = vst [vmem:[#allocation19_spill] sm:$0xff] %v3929_v60  ;;  %v3392_v6 = vpop.eup %3391  ;;  %v3947_v9 = vsel %vm282_vm1, %v3843_v38, %v2456_v20  ;;  %v656_v13 = vrot.slane %v3934_v62, 1  ;;  %v2476_v15 = vadd.f32 -1.0, %v3390_v54  ;;  %v351_v25 = vmin.f32 %v3926_v53, 0.0 }
  0x45   : > { %5991 = vst [vmem:[#allocation20_spill] sm:$0xff] %v3942_v7  ;;  %v3394_v18 = vpop.eup %3393  ;;  %v3953_v34 = vsel %vm283_vm2, %v3846_v24, %v2457_v61  ;;  %v657_v16 = vrot.slane %v3947_v9, 1  ;;  %v2477_v22 = vadd.f32 -1.0, %v3392_v6  ;;  %2610 = vrot.lane.b32.xlu1 %v3942_v7, %s3581_s10  ;;  %v352_v24 = vmin.f32 %v3937_v1, 0.0 }
  0x46   : > { %v3396_v19 = vpop.eup %3395  ;;  %v659_v38 = vrot.slane %v3953_v34, 1  ;;  %v2478_v27 = vadd.f32 -1.0, %v3394_v18  ;;  %v3963_v30 = vsel %vm302_vm4, %v3860_v47, %v2476_v15  ;;  %v422_v15 = vmul.f32 1.442695, %v350_v5 }
  0x47   : > { %v3398_v33 = vpop.eup %3397  ;;  %v3967_v23 = vsel %vm650_vm3, %v656_v13, %v657_v16  ;;  %v3972_v36 = vsel %vm303_vm5, %v3863_v48, %v2477_v22  ;;  %v691_v37 = vrot.slane %v3963_v30, 1  ;;  %v2473_v39 = vadd.f32 -1.0, %v3396_v19 }
  0x48   : > { %5992 = vst [vmem:[#allocation21_spill] sm:$0xff] %v3967_v23  ;;  %v3400_v14 = vpop.eup %3399  ;;  %v3976_v41 = vsel %vm650_vm3, %v657_v16, %v659_v38  ;;  %v3981_v47 = vsel %vm304_vm6, %v3866_v50, %v2478_v27  ;;  %v692_v44 = vrot.slane %v3972_v36, 1  ;;  %v2474_v46 = vadd.f32 -1.0, %v3398_v33  ;;  %v4020_v27 = vld [vmem:[%s3670_s9 + $0x110] sm:$0xff] }
  0x49   : > { %5993 = vst [vmem:[#allocation22_spill] sm:$0xff] %v3976_v41  ;;  %v2599_v48 = vpack.i.bf16 %v3976_v41, %v3967_v23  ;;  %v694_v20 = vrot.slane %v3981_v47, 1  ;;  %v2475_v54 = vadd.f32 -1.0, %v3400_v14  ;;  %v3990_v61 = vsel %vm299_vm7, %v3876_v57, %v2473_v39  ;;  %v4039_v39 = vld [vmem:[%s3670_s9 + $0xf8] sm:$0xff]  ;;  %v4042_v14 = vld [vmem:[%s3670_s9 + $0x100] sm:$0x3] }
  0x4a   : > { %v3993_v50 = vsel %vm650_vm3, %v691_v37, %v692_v44  ;;  %v3998_v6 = vsel %vm300_vm8, %v3884_v2, %v2474_v46  ;;  %v686_v13 = vrot.slane %v3990_v61, 1  ;;  %v424_v22 = vmul.f32 1.442695, %v351_v25  ;;  %v4012_v2 = vld [vmem:[%s3670_s9 + $0x108] sm:$0xff]  ;;  %v4029_v25 = vld [vmem:[%s3670_s9 + $0xf0] sm:$0xff] }
  0x4b   : > { %5994 = vst [vmem:[#allocation23_spill] sm:$0xff] %v3993_v50  ;;  %2600 = vrot.lane.b32.xlu0 %v2599_v48, %s3581_s10  ;;  %v4003_v18 = vsel %vm650_vm3, %v692_v44, %v694_v20  ;;  %v4008_v57 = vsel %vm301_vm9, %v3890_v3, %v2475_v54  ;;  %v687_v16 = vrot.slane %v3998_v6, 1  ;;  %3401 = vpow2.f32 %v422_v15  ;;  %v4023_v3 = vld [vmem:[%s3670_s9 + $0x118] sm:$0x3]  ;;  %v4058_v15 = vld [vmem:[%s3670_s9 + $0xe0] sm:$0xff] }
  0x4c   : > { %5995 = vst [vmem:[#allocation24_spill] sm:$0xff] %v4003_v18  ;;  %v4016_v5 = vpack.i.bf16 %v4003_v18, %v3993_v50  ;;  %v689_v19 = vrot.slane %v4008_v57, 1  ;;  %v426_v38 = vmul.f32 1.442695, %v352_v24  ;;  %3403 = vpow2.f32 %v424_v22  ;;  %v4052_v20 = vld [vmem:[%s3670_s9 + $0xd8] sm:$0xff] }
  0x4d   : > { %v4026_v33 = vsel %vm650_vm3, %v686_v13, %v687_v16  ;;  %vm296_vm10 = vcmp.gt.f32.partialorder %v3917_v40, 0.0  ;;  %v365_v24 = vmin.f32 %v4012_v2, 0.0  ;;  %vm297_vm11 = vcmp.gt.f32.partialorder %v3926_v53, 0.0  ;;  %v4067_v23 = vld [vmem:[%s3670_s9 + $0xe8] sm:$0x3] }
  0x4e   : > { %5996 = vst [vmem:[#allocation25_spill] sm:$0xff] %v4016_v5  ;;  %2635 = vrot.lane.b32.xlu2 %v4016_v5, %s3581_s10  ;;  %v4034_v37 = vsel %vm650_vm3, %v687_v16, %v689_v19  ;;  %3405 = vpow2.f32 %v426_v38  ;;  %v366_v46 = vmin.f32 %v4020_v27, 0.0  ;;  %v367_v48 = vmin.f32 %v4023_v3, 0.0 }
  0x4f   : > { %5997 = vst [vmem:[#allocation26_spill] sm:$0xff] %v4026_v33  ;;  %v4046_v44 = vpack.i.bf16 %v4034_v37, %v4026_v33  ;;  %vm298_vm12 = vcmp.gt.f32.partialorder %v3937_v1, 0.0  ;;  %vm311_vm13 = vcmp.gt.f32.partialorder %v4012_v2, 0.0  ;;  %v452_v54 = vmul.f32 1.442695, %v365_v24 }
  0x50   : > { %5998 = vst [vmem:[#allocation27_spill] sm:$0xff] %v4034_v37  ;;  %v362_v13 = vmin.f32 %v4029_v25, 0.0  ;;  %v454_v16 = vmul.f32 1.442695, %v366_v46  ;;  %v456_v22 = vmul.f32 1.442695, %v367_v48 }
  0x51   : > { %5999 = vst [vmem:[#allocation28_spill] sm:$0xff] %v4046_v44  ;;  %2630 = vrot.lane.b32.xlu1 %v4046_v44, %s3581_s10  ;;  %v363_v19 = vmin.f32 %v4039_v39, 0.0  ;;  %v364_v38 = vmin.f32 %v4042_v14, 0.0  ;;  %v3402_v52 = vpop.eup %3401  ;;  %vm312_vm14 = vcmp.gt.f32.partialorder %v4020_v27, 0.0  ;;  %vm313_vm15 = vcmp.gt.f32.partialorder %v4023_v3, 0.0 }
  0x52   : > { %3407 = vpow2.f32 %v452_v54  ;;  %v446_v24 = vmul.f32 1.442695, %v362_v13  ;;  %v3404_v10 = vpop.eup %3403  ;;  %v2470_v33 = vadd.f32 -1.0, %v3402_v52  ;;  %vm308_vm0 = vcmp.gt.f32.partialorder %v4029_v25, 0.0 }
  0x53   : > { %3409 = vpow2.f32 %v454_v16  ;;  %v448_v46 = vmul.f32 1.442695, %v363_v19  ;;  %v450_v48 = vmul.f32 1.442695, %v364_v38  ;;  %v2471_v60 = vadd.f32 -1.0, %v3404_v10 }
  0x54   : > { %v3406_v37 = vpop.eup %3405  ;;  %3411 = vpow2.f32 %v456_v22  ;;  %vm309_vm1 = vcmp.gt.f32.partialorder %v4039_v39, 0.0  ;;  %v359_v58 = vmin.f32 %v4052_v20, 0.0  ;;  %v4075_v54 = vsel %vm296_vm10, %v3917_v40, %v2470_v33 }
  0x55   : > { %v2472_v63 = vadd.f32 -1.0, %v3406_v37  ;;  %vm310_vm2 = vcmp.gt.f32.partialorder %v4042_v14, 0.0  ;;  %3413 = vpow2.f32 %v446_v24  ;;  %v360_v52 = vmin.f32 %v4058_v15, 0.0 }
  0x56   : > { %v4082_v10 = vsel %vm297_vm11, %v3926_v53, %v2471_v60  ;;  %v681_v13 = vrot.slane %v4075_v54, 1  ;;  %3415 = vpow2.f32 %v448_v46  ;;  %v361_v37 = vmin.f32 %v4067_v23, 0.0 }
  0x57   : > { %v4089_v40 = vsel %vm298_vm12, %v3937_v1, %v2472_v63  ;;  %v682_v33 = vrot.slane %v4082_v10, 1  ;;  %3417 = vpow2.f32 %v450_v48  ;;  %v440_v16 = vmul.f32 1.442695, %v359_v58  ;;  %v4099_v63 = vld [vmem:[%s3670_s9 + $0x150] sm:$0xff] }
  0x58   : > { %v3408_v22 = vpop.eup %3407  ;;  %v684_v53 = vrot.slane %v4089_v40, 1  ;;  %vm305_vm4 = vcmp.gt.f32.partialorder %v4052_v20, 0.0  ;;  %v442_v60 = vmul.f32 1.442695, %v360_v52  ;;  %v444_v19 = vmul.f32 1.442695, %v361_v37 }
  0x59   : > { %v3410_v38 = vpop.eup %3409  ;;  %v4095_v24 = vsel %vm650_vm3, %v681_v13, %v682_v33  ;;  %v2485_v46 = vadd.f32 -1.0, %v3408_v22  ;;  %vm306_vm5 = vcmp.gt.f32.partialorder %v4058_v15, 0.0  ;;  %3419 = vpow2.f32 %v440_v16  ;;  %v4106_v52 = vld [vmem:[%s3670_s9 + $0x158] sm:$0xff] }
  0x5a   : > { %6000 = vst [vmem:[#allocation29_spill] sm:$0xff] %v4095_v24  ;;  %v3412_v58 = vpop.eup %3411  ;;  %v4102_v1 = vsel %vm650_vm3, %v682_v33, %v684_v53  ;;  %v2486_v48 = vadd.f32 -1.0, %v3410_v38  ;;  %vm307_vm6 = vcmp.gt.f32.partialorder %v4067_v23, 0.0  ;;  %3421 = vpow2.f32 %v442_v60  ;;  %v4118_v33 = vld [vmem:[%s3670_s9 + $0x160] sm:$0x3] }
  0x5b   : > { %6001 = vst [vmem:[#allocation30_spill] sm:$0xff] %v4102_v1  ;;  %v3414_v37 = vpop.eup %3413  ;;  %v4110_v13 = vpack.i.bf16 %v4102_v1, %v4095_v24  ;;  %v2487_v22 = vadd.f32 -1.0, %v3412_v58  ;;  %v4115_v16 = vsel %vm311_vm13, %v4012_v2, %v2485_v46  ;;  %3423 = vpow2.f32 %v444_v19 }
  0x5c   : > { %6003 = vst [vmem:[#allocation32_spill] sm:$0xff] %v4115_v16  ;;  %v3416_v53 = vpop.eup %3415  ;;  %v4123_v60 = vsel %vm312_vm14, %v4020_v27, %v2486_v48  ;;  %v706_v38 = vrot.slane %v4115_v16, 1  ;;  %v2482_v41 = vadd.f32 -1.0, %v3414_v37  ;;  %v374_v24 = vmin.f32 %v4099_v63, 0.0 }
  0x5d   : > { %6002 = vst [vmem:[#allocation31_spill] sm:$0xff] %v4110_v13  ;;  %v3418_v58 = vpop.eup %3417  ;;  %2625 = vrot.lane.b32.xlu0 %v4110_v13, %s3581_s10  ;;  %v4132_v2 = vsel %vm313_vm15, %v4023_v3, %v2487_v22  ;;  %v707_v19 = vrot.slane %v4123_v60, 1  ;;  %v2483_v46 = vadd.f32 -1.0, %v3416_v53  ;;  %v375_v27 = vmin.f32 %v4106_v52, 0.0 }
  0x5e   : > { %v709_v48 = vrot.slane %v4132_v2, 1  ;;  %v2484_v1 = vadd.f32 -1.0, %v3418_v58  ;;  %v4140_v37 = vsel %vm308_vm0, %v4029_v25, %v2482_v41  ;;  %v376_v50 = vmin.f32 %v4118_v33, 0.0 }
  0x5f   : > { %v3420_v18 = vpop.eup %3419  ;;  %v4144_v42 = vsel %vm650_vm3, %v706_v38, %v707_v19  ;;  %v4149_v3 = vsel %vm309_vm1, %v4039_v39, %v2483_v46  ;;  %v701_v22 = vrot.slane %v4140_v37, 1  ;;  %v470_v53 = vmul.f32 1.442695, %v374_v24 }
  0x60   : > { %6004 = vst [vmem:[#allocation33_spill] sm:$0xff] %v4144_v42  ;;  %v3422_v58 = vpop.eup %3421  ;;  %v4153_v26 = vsel %vm650_vm3, %v707_v19, %v709_v48  ;;  %v4158_v41 = vsel %vm310_vm2, %v4042_v14, %v2484_v1  ;;  %v702_v25 = vrot.slane %v4149_v3, 1  ;;  %v2479_v38 = vadd.f32 -1.0, %v3420_v18 }
  0x61   : > { %6005 = vst [vmem:[#allocation34_spill] sm:$0xff] %v4153_v26  ;;  %v3424_v17 = vpop.eup %3423  ;;  %v4163_v39 = vpack.i.bf16 %v4153_v26, %v4144_v42  ;;  %v704_v24 = vrot.slane %v4158_v41, 1  ;;  %v2480_v46 = vadd.f32 -1.0, %v3422_v58  ;;  %3425 = vpow2.f32 %v470_v53  ;;  %v4186_v58 = vld [vmem:[%s3670_s9 + $0x138] sm:$0xff]  ;;  %v4218_v42 = vld [vmem:[%s3670_s9 + $0x128] sm:$0xff] }
  0x62   : > { %v4167_v19 = vsel %vm650_vm3, %v701_v22, %v702_v25  ;;  %v2481_v14 = vadd.f32 -1.0, %v3424_v17  ;;  %v4172_v1 = vsel %vm305_vm4, %v4052_v20, %v2479_v38  ;;  %v472_v18 = vmul.f32 1.442695, %v375_v27  ;;  %v4189_v20 = vld [vmem:[%s3670_s9 + $0x140] sm:$0xff]  ;;  %v4202_v38 = vld [vmem:[%s3670_s9 + $0x148] sm:$0x3] }
  0x63   : > { %6006 = vst [vmem:[#allocation35_spill] sm:$0xff] %v4163_v39  ;;  %2650 = vrot.lane.b32.xlu2 %v4163_v39, %s3581_s10  ;;  %v4177_v48 = vsel %vm650_vm3, %v702_v25, %v704_v24  ;;  %v4182_v53 = vsel %vm306_vm5, %v4058_v15, %v2480_v46  ;;  %v696_v22 = vrot.slane %v4172_v1, 1  ;;  %v474_v17 = vmul.f32 1.442695, %v376_v50 }
  0x64   : > { %6007 = vst [vmem:[#allocation36_spill] sm:$0xff] %v4167_v19  ;;  %v4193_v27 = vpack.i.bf16 %v4177_v48, %v4167_v19  ;;  %v4198_v25 = vsel %vm307_vm6, %v4067_v23, %v2481_v14  ;;  %v697_v15 = vrot.slane %v4182_v53, 1  ;;  %3427 = vpow2.f32 %v472_v18  ;;  %v4215_v18 = vld [vmem:[%s3670_s9 + $0x120] sm:$0xff] }
  0x65   : > { %6008 = vst [vmem:[#allocation37_spill] sm:$0xff] %v4177_v48  ;;  %v699_v24 = vrot.slane %v4198_v25, 1  ;;  %3429 = vpow2.f32 %v474_v17  ;;  %v371_v23 = vmin.f32 %v4186_v58, 0.0  ;;  %v372_v14 = vmin.f32 %v4189_v20, 0.0 }
  0x66   : > { %6009 = vst [vmem:[#allocation38_spill] sm:$0xff] %v4193_v27  ;;  %2645 = vrot.lane.b32.xlu1 %v4193_v27, %s3581_s10  ;;  %v4210_v26 = vsel %vm650_vm3, %v696_v22, %v697_v15  ;;  %vm320_vm7 = vcmp.gt.f32.partialorder %v4099_v63, 0.0  ;;  %vm321_vm8 = vcmp.gt.f32.partialorder %v4106_v52, 0.0  ;;  %v373_v17 = vmin.f32 %v4202_v38, 0.0  ;;  %v4227_v22 = vld [vmem:[%s3670_s9 + $0x130] sm:$0x3] }
  0x67   : > { %6010 = vst [vmem:[#allocation39_spill] sm:$0xff] %v4210_v26  ;;  %v3426_v50 = vpop.eup %3425  ;;  %v4221_v19 = vsel %vm650_vm3, %v697_v15, %v699_v24  ;;  %v464_v27 = vmul.f32 1.442695, %v371_v23  ;;  %v466_v13 = vmul.f32 1.442695, %v372_v14  ;;  %vm322_vm9 = vcmp.gt.f32.partialorder %v4118_v33, 0.0 }
  0x68   : > { %6011 = vst [vmem:[#allocation40_spill] sm:$0xff] %v4221_v19  ;;  %v4231_v46 = vpack.i.bf16 %v4221_v19, %v4210_v26  ;;  %v2494_v48 = vadd.f32 -1.0, %v3426_v50  ;;  %v468_v39 = vmul.f32 1.442695, %v373_v17  ;;  %v368_v15 = vmin.f32 %v4215_v18, 0.0 }
  0x69   : > { %v369_v24 = vmin.f32 %v4218_v42, 0.0  ;;  %3431 = vpow2.f32 %v464_v27  ;;  %v370_v26 = vmin.f32 %v4227_v22, 0.0  ;;  %vm731_vm10 = vcmask 1045504  }
  0x6a   : > { %6012 = vst [vmem:[#allocation41_spill] sm:$0xff] %v4231_v46  ;;  %v3428_v44 = vpop.eup %3427  ;;  %2640 = vrot.lane.b32.xlu0 %v4231_v46, %s3581_s10  ;;  %v4239_v7 = vsel %vm320_vm7, %v4099_v63, %v2494_v48  ;;  %3433 = vpow2.f32 %v466_v13  ;;  %v458_v17 = vmul.f32 1.442695, %v368_v15  ;;  %v737_v63 = vrot.slane %v3934_v62, 2 }
  0x6b   : > { %v3430_v50 = vpop.eup %3429  ;;  %v2495_v23 = vadd.f32 -1.0, %v3428_v44  ;;  %v721_v14 = vrot.slane %v4239_v7, 1  ;;  %3435 = vpow2.f32 %v468_v39  ;;  %v460_v5 = vmul.f32 1.442695, %v369_v24 }
  0x6c   : > { %v2496_v19 = vadd.f32 -1.0, %v3430_v50  ;;  %v462_v4 = vmul.f32 1.442695, %v370_v26  ;;  %3437 = vpow2.f32 %v458_v17  ;;  %v738_v48 = vrot.slane %v3947_v9, 2  ;;  %v4281_v17 = vld [vmem:[%s3670_s9 + $0x170] sm:$0xff] }
  0x6d   : > { %v4246_v46 = vsel %vm321_vm8, %v4106_v52, %v2495_v23  ;;  %3439 = vpow2.f32 %v460_v5  ;;  %v740_v26 = vrot.slane %v3953_v34, 2  ;;  %vm317_vm11 = vcmp.gt.f32.partialorder %v4186_v58, 0.0 }
  0x6e   : > { %v4253_v44 = vsel %vm322_vm9, %v4118_v33, %v2496_v19  ;;  %v722_v13 = vrot.slane %v4246_v46, 1  ;;  %vm318_vm12 = vcmp.gt.f32.partialorder %v4189_v20, 0.0  ;;  %3441 = vpow2.f32 %v462_v4  ;;  %v4272_v4 = vld [vmem:[%s3670_s9 + $0x168] sm:$0xff] }
  0x6f   : > { %v724_v39 = vrot.slane %v4253_v44, 1  ;;  %v3432_v52 = vpop.eup %3431  ;;  %vm319_vm13 = vcmp.gt.f32.partialorder %v4202_v38, 0.0  ;;  %v739_v33 = vsel %vm731_vm10, %v737_v63, %v738_v48  ;;  %v741_v5 = vsel %vm731_vm10, %v738_v48, %v740_v26 }
  0x70   : > { %v4261_v27 = vsel %vm650_vm3, %v721_v14, %v722_v13  ;;  %v3434_v19 = vpop.eup %3433  ;;  %v2491_v15 = vadd.f32 -1.0, %v3432_v52  ;;  %vm314_vm14 = vcmp.gt.f32.partialorder %v4215_v18, 0.0  ;;  %vm315_vm15 = vcmp.gt.f32.partialorder %v4218_v42, 0.0  ;;  %v4292_v52 = vld [vmem:[%s3670_s9 + $0x178] sm:$0x3] }
  0x71   : > { %6013 = vst [vmem:[#allocation42_spill] sm:$0xff] %v4261_v27  ;;  %v4267_v34 = vsel %vm650_vm3, %v722_v13, %v724_v39  ;;  %v3436_v24 = vpop.eup %3435  ;;  %v2492_v23 = vadd.f32 -1.0, %v3434_v19  ;;  %vm316_vm0 = vcmp.gt.f32.partialorder %v4227_v22, 0.0  ;;  %v732_v14 = vrot.slane %v3787_v8, 2 }
  0x72   : > { %6014 = vst [vmem:[#allocation43_spill] sm:$0xff] %v4267_v34  ;;  %v4276_v50 = vpack.i.bf16 %v4267_v34, %v4261_v27  ;;  %v3438_v63 = vpop.eup %3437  ;;  %v2493_v48 = vadd.f32 -1.0, %v3436_v24  ;;  %v4286_v13 = vsel %vm317_vm11, %v4186_v58, %v2491_v15  ;;  %v4288_v26 = vpack.i.bf16 %v741_v5, %v739_v33 }
  0x73   : > { %6016 = vst [vmem:[#allocation45_spill] sm:$0xff] %v4286_v13  ;;  %v733_v39 = vrot.slane %v3792_v11, 2  ;;  %v3440_v19 = vpop.eup %3439  ;;  %v4299_v27 = vsel %vm318_vm12, %v4189_v20, %v2492_v23  ;;  %v716_v24 = vrot.slane %v4286_v13, 1  ;;  %v2488_v34 = vadd.f32 -1.0, %v3438_v63 }
  0x74   : > { %6015 = vst [vmem:[#allocation44_spill] sm:$0xff] %v4276_v50  ;;  %2665 = vrot.lane.b32.xlu2 %v4276_v50, %s3581_s10  ;;  %v377_v58 = vmin.f32 %v4272_v4, 0.0  ;;  %v3442_v33 = vpop.eup %3441  ;;  %v4306_v5 = vsel %vm319_vm13, %v4202_v38, %v2493_v48  ;;  %v717_v15 = vrot.slane %v4299_v27, 1  ;;  %v2489_v51 = vadd.f32 -1.0, %v3440_v19 }
  0x75   : > { %6017 = vst [vmem:[#allocation46_spill] sm:$0xff] %v4299_v27  ;;  %v378_v50 = vmin.f32 %v4281_v17, 0.0  ;;  %v719_v21 = vrot.slane %v4306_v5, 1  ;;  %v2490_v20 = vadd.f32 -1.0, %v3442_v33  ;;  %v4314_v23 = vsel %vm314_vm14, %v4215_v18, %v2488_v34 }
  0x76   : > { %v379_v63 = vmin.f32 %v4292_v52, 0.0  ;;  %v4318_v8 = vsel %vm650_vm3, %v716_v24, %v717_v15  ;;  %v4323_v38 = vsel %vm315_vm15, %v4218_v42, %v2489_v51  ;;  %v711_v48 = vrot.slane %v4314_v23, 1 }
  0x77   : > { %6018 = vst [vmem:[#allocation47_spill] sm:$0xff] %v4318_v8  ;;  %v476_v19 = vmul.f32 1.442695, %v377_v58  ;;  %v4327_v33 = vsel %vm650_vm3, %v717_v15, %v719_v21  ;;  %v4332_v18 = vsel %vm316_vm0, %v4227_v22, %v2490_v20  ;;  %v712_v34 = vrot.slane %v4323_v38, 1 }
  0x78   : > { %6019 = vst [vmem:[#allocation48_spill] sm:$0xff] %v4327_v33  ;;  %v478_v24 = vmul.f32 1.442695, %v378_v50  ;;  %v4337_v11 = vpack.i.bf16 %v4327_v33, %v4318_v8  ;;  %v714_v42 = vrot.slane %v4332_v18, 1  ;;  %v480_v51 = vmul.f32 1.442695, %v379_v63 }
  0x79   : > { %3443 = vpow2.f32 %v476_v19  ;;  %v4341_v58 = vsel %vm650_vm3, %v711_v48, %v712_v34  ;;  %v752_v21 = vrot.slane %v3732_v43, 2  ;;  %v753_v22 = vrot.slane %v3738_v45, 2 }
  0x7a   : > { %6020 = vst [vmem:[#allocation49_spill] sm:$0xff] %v4337_v11  ;;  %3445 = vpow2.f32 %v478_v24  ;;  %2660 = vrot.lane.b32.xlu1 %v4337_v11, %s3581_s10  ;;  %v4348_v50 = vsel %vm650_vm3, %v712_v34, %v714_v42  ;;  %v734_v20 = vsel %vm731_vm10, %v732_v14, %v733_v39  ;;  %v6024_v63 = vrot.slane %v3805_v12, 2 }
  0x7b   : > { %6021 = vst [vmem:[#allocation50_spill] sm:$0xff] %v4341_v58  ;;  %3447 = vpow2.f32 %v480_v51  ;;  %v4352_v15 = vpack.i.bf16 %v4348_v50, %v4341_v58  ;;  %v4361_v19 = vsel %vm731_vm10, %v752_v21, %v753_v22  ;;  %v6026_v34 = vrot.slane %v3744_v49, 2 }
  0x7c   : > { %6022 = vst [vmem:[#allocation51_spill] sm:$0xff] %v4348_v50  ;;  %2680 = vrot.lane.b32.xlu2 %v4288_v26, %s3582_s11  ;;  %v736_v48 = vsel %vm731_vm10, %v733_v39, %v6024_v63  ;;  %vm323_vm1 = vcmp.gt.f32.partialorder %v4272_v4, 0.0  ;;  %vm324_vm2 = vcmp.gt.f32.partialorder %v4281_v17, 0.0  ;;  %vm325_vm4 = vcmp.gt.f32.partialorder %v4292_v52, 0.0 }
  0x7d   : > { %6023 = vst [vmem:[#allocation52_spill] sm:$0xff] %v4352_v15  ;;  %v4366_v24 = vsel %vm731_vm10, %v753_v22, %v6026_v34  ;;  %2655 = vrot.lane.b32.xlu0 %v4352_v15, %s3581_s10  ;;  %v2674_v51 = vpack.i.bf16 %v736_v48, %v734_v20  ;;  %v747_v12 = vrot.slane %v3901_v29, 2  ;;  %v748_v21 = vrot.slane %v3907_v32, 2 }
  0x7e   : > { %6025 = vst [vmem:[#allocation53_spill] sm:$0xff] %v4361_v19  ;;  %v4376_v49 = vpack.i.bf16 %v4366_v24, %v4361_v19  ;;  %v750_v22 = vrot.slane %v3913_v56, 2  ;;  %v767_v20 = vrot.slane %v3990_v61, 2  ;;  %v768_v48 = vrot.slane %v3998_v6, 2 }
  0x7f   : > { %6027 = vst [vmem:[#allocation54_spill] sm:$0xff] %v4366_v24  ;;  %v3444_v42 = vpop.eup %3443  ;;  %v770_v58 = vrot.slane %v4008_v57, 2  ;;  %v785_v19 = vrot.slane %v4158_v41, 2  ;;  %v4662_v33 = vpack.i.bf16 %v4299_v27, %v4286_v13  ;;  %vm1478_vm7 = vcmask 261120  }
  0x80   : > { %v3446_v14 = vpop.eup %3445  ;;  %v2497_v39 = vadd.f32 -1.0, %v3444_v42  ;;  %vm1511_vm8 = vcmask 523264   ;;  %vm1544_vm11 = vcmask 785408   ;;  %vm2083_vm0 = vcmask 130048  }
  0x81   : > { %v3448_v63 = vpop.eup %3447  ;;  %v2498_v34 = vadd.f32 -1.0, %v3446_v14  ;;  %6061 = vst [vmem:[#allocation88_spill] sm:$0xff] %v4662_v33 }
  0x82   : > { %v2499_v50 = vadd.f32 -1.0, %v3448_v63  ;;  %v4386_v42 = vsel %vm323_vm1, %v4272_v4, %v2497_v39  ;;  %2675 = vrot.lane.b32.xlu1 %v2674_v51, %s3582_s11  ;;  %v4404_v4 = vsel %vm731_vm10, %v747_v12, %v748_v21  ;;  %v4407_v51 = vsel %vm731_vm10, %v748_v21, %v750_v22 }
  0x83   : > { %6028 = vst [vmem:[#allocation55_spill] sm:$0xff] %v4386_v42  ;;  %v4392_v56 = vsel %vm324_vm2, %v4281_v17, %v2498_v34  ;;  %v726_v14 = vrot.slane %v4386_v42, 1  ;;  %v4411_v39 = vsel %vm731_vm10, %v767_v20, %v768_v48  ;;  %v4414_v63 = vsel %vm731_vm10, %v768_v48, %v770_v58 }
  0x84   : > { %6029 = vst [vmem:[#allocation56_spill] sm:$0xff] %v4392_v56  ;;  %v4398_v24 = vsel %vm325_vm4, %v4292_v52, %v2499_v50  ;;  %v727_v57 = vrot.slane %v4392_v56, 1  ;;  %2695 = vrot.lane.b32.xlu2 %v4376_v49, %s3582_s11  ;;  %v745_v52 = vrot.slane %v3772_v0, 2  ;;  %v742_v34 = vrot.slane %v3751_v55, 2 }
  0x85   : > { %6030 = vst [vmem:[#allocation57_spill] sm:$0xff] %v4404_v4  ;;  %v729_v17 = vrot.slane %v4398_v24, 1  ;;  %v4426_v21 = vpack.i.bf16 %v4407_v51, %v4404_v4  ;;  %v743_v22 = vrot.slane %v3763_v59, 2  ;;  %v762_v20 = vrot.slane %v4075_v54, 2 }
  0x86   : > { %6031 = vst [vmem:[#allocation58_spill] sm:$0xff] %v4407_v51  ;;  %v4418_v50 = vsel %vm650_vm3, %v726_v14, %v727_v57  ;;  %v4436_v0 = vpack.i.bf16 %v4414_v63, %v4411_v39  ;;  %v763_v48 = vrot.slane %v4082_v10, 2  ;;  %v765_v14 = vrot.slane %v4089_v40, 2 }
  0x87   : > { %6032 = vst [vmem:[#allocation59_spill] sm:$0xff] %v4411_v39  ;;  %v4422_v12 = vsel %vm650_vm3, %v727_v57, %v729_v17  ;;  %v782_v57 = vrot.slane %v4140_v37, 2  ;;  %v783_v17 = vrot.slane %v4149_v3, 2  ;;  %v4448_v51 = vsel %vm731_vm10, %v742_v34, %v743_v22 }
  0x88   : > { %6033 = vst [vmem:[#allocation60_spill] sm:$0xff] %v4414_v63  ;;  %v4432_v58 = vpack.i.bf16 %v4422_v12, %v4418_v50  ;;  %v4451_v63 = vsel %vm731_vm10, %v743_v22, %v745_v52  ;;  %v4456_v40 = vsel %vm731_vm10, %v762_v20, %v763_v48  ;;  %v4459_v41 = vsel %vm731_vm10, %v763_v48, %v765_v14 }
  0x89   : > { %6034 = vst [vmem:[#allocation61_spill] sm:$0xff] %v4418_v50  ;;  %v4462_v39 = vsel %vm731_vm10, %v782_v57, %v783_v17  ;;  %v4465_v4 = vsel %vm731_vm10, %v783_v17, %v785_v19  ;;  %v4469_v34 = vpack.i.bf16 %v4451_v63, %v4448_v51  ;;  %v4473_v52 = vpack.i.bf16 %v4459_v41, %v4456_v40 }
  0x8a   : > { %6035 = vst [vmem:[#allocation62_spill] sm:$0xff] %v4422_v12  ;;  %2670 = vrot.lane.b32.xlu0 %v4432_v58, %s3581_s10  ;;  %2690 = vrot.lane.b32.xlu1 %v4426_v21, %s3582_s11  ;;  %v757_v22 = vrot.slane %v3822_v28, 2  ;;  %v758_v20 = vrot.slane %v3831_v31, 2  ;;  %v760_v48 = vrot.slane %v3839_v35, 2  ;;  %v4480_v14 = vpack.i.bf16 %v4465_v4, %v4462_v39 }
  0x8b   : > { %6036 = vst [vmem:[#allocation63_spill] sm:$0xff] %v4432_v58  ;;  %v777_v19 = vrot.slane %v4172_v1, 2  ;;  %v778_v57 = vrot.slane %v4182_v53, 2  ;;  %v780_v17 = vrot.slane %v4198_v25, 2  ;;  %v4638_v50 = vpack.i.bf16 %v4082_v10, %v4075_v54 }
  0x8c   : > { %6037 = vst [vmem:[#allocation64_spill] sm:$0xff] %v4448_v51  ;;  %2710 = vrot.lane.b32.xlu2 %v4436_v0, %s3582_s11  ;;  %v4493_v35 = vsel %vm731_vm10, %v757_v22, %v758_v20  ;;  %v4642_v12 = vpack.i.bf16 %v4149_v3, %v4140_v37 }
  0x8d   : > { %6038 = vst [vmem:[#allocation65_spill] sm:$0xff] %v4451_v63  ;;  %v797_v63 = vrot.slane %v4286_v13, 2  ;;  %v4501_v25 = vsel %vm731_vm10, %v777_v19, %v778_v57  ;;  %v773_v19 = vrot.slane %v3972_v36, 2 }
  0x8e   : > { %6039 = vst [vmem:[#allocation66_spill] sm:$0xff] %v4456_v40  ;;  %v800_v40 = vrot.slane %v4306_v5, 2  ;;  %v4504_v5 = vsel %vm731_vm10, %v778_v57, %v780_v17  ;;  %v775_v57 = vrot.slane %v3981_v47, 2  ;;  %v795_v17 = vrot.slane %v4332_v18, 2 }
  0x8f   : > { %6040 = vst [vmem:[#allocation67_spill] sm:$0xff] %v4459_v41  ;;  %v798_v41 = vrot.slane %v4299_v27, 2 }
  0x90   : > { %6041 = vst [vmem:[#allocation68_spill] sm:$0xff] %v4462_v39  ;;  %v4538_v47 = vsel %vm731_vm10, %v773_v19, %v775_v57  ;;  %v788_v57 = vrot.slane %v4123_v60, 2 }
  0x91   : > { %6042 = vst [vmem:[#allocation69_spill] sm:$0xff] %v4465_v4  ;;  %v4496_v4 = vsel %vm731_vm10, %v758_v20, %v760_v48  ;;  %v4507_v39 = vsel %vm731_vm10, %v797_v63, %v798_v41  ;;  %v4510_v51 = vsel %vm731_vm10, %v798_v41, %v800_v40  ;;  %v4518_v20 = vpack.i.bf16 %v4504_v5, %v4501_v25 }
  0x92   : > { %2685 = vrot.lane.b32.xlu0 %v4469_v34, %s3582_s11  ;;  %2705 = vrot.lane.b32.xlu1 %v4473_v52, %s3582_s11  ;;  %6043 = vst [vmem:[#allocation70_spill] sm:$0xff] %v4493_v35  ;;  %v4514_v22 = vpack.i.bf16 %v4496_v4, %v4493_v35  ;;  %v772_v48 = vrot.slane %v3963_v30, 2  ;;  %v4525_v63 = vpack.i.bf16 %v4510_v51, %v4507_v39  ;;  %v792_v40 = vrot.slane %v4314_v23, 2 }
  0x93   : > { %6044 = vst [vmem:[#allocation71_spill] sm:$0xff] %v4496_v4  ;;  %v793_v41 = vrot.slane %v4323_v38, 2  ;;  %v790_v4 = vrot.slane %v4132_v2, 2 }
  0x94   : > { %2725 = vrot.lane.b32.xlu2 %v4480_v14, %s3582_s11  ;;  %6045 = vst [vmem:[#allocation72_spill] sm:$0xff] %v4501_v25 }
  0x95   : > { %6046 = vst [vmem:[#allocation73_spill] sm:$0xff] %v4504_v5  ;;  %v4535_v5 = vsel %vm731_vm10, %v772_v48, %v773_v19  ;;  %v4543_v25 = vsel %vm731_vm10, %v792_v40, %v793_v41  ;;  %v4546_v18 = vsel %vm731_vm10, %v793_v41, %v795_v17  ;;  %v787_v19 = vrot.slane %v4115_v16, 2 }
  0x96   : > { %6047 = vst [vmem:[#allocation74_spill] sm:$0xff] %v4507_v39  ;;  %v4554_v48 = vpack.i.bf16 %v4546_v18, %v4543_v25  ;;  %v2754_v40 = vpack.i.bf16 %v3947_v9, %v3934_v62  ;;  %v807_v41 = vrot.slane %v4386_v42, 2  ;;  %v808_v17 = vrot.slane %v4392_v56, 2 }
  0x97   : > { %6048 = vst [vmem:[#allocation75_spill] sm:$0xff] %v4510_v51  ;;  %v4550_v51 = vpack.i.bf16 %v4538_v47, %v4535_v5  ;;  %v4572_v2 = vsel %vm731_vm10, %v788_v57, %v790_v4 }
  0x98   : > { %6049 = vst [vmem:[#allocation76_spill] sm:$0xff] %v4535_v5  ;;  %v4569_v5 = vsel %vm731_vm10, %v787_v19, %v788_v57  ;;  %v4576_v39 = vsel %vm731_vm10, %v807_v41, %v808_v17  ;;  %v4585_v19 = vpop.permute.xlu2 %2615  ;;  %v802_v57 = vrot.slane %v4239_v7, 2  ;;  %v805_v41 = vrot.slane %v4253_v44, 2  ;;  %v272_v44 = vld [vmem:[%s3670_s9 + $0x180] sm:$0xff] }
  0x99   : > { %6050 = vst [vmem:[#allocation77_spill] sm:$0xff] %v4538_v47  ;;  %v810_v47 = vrot.slane %v4398_v24, 2  ;;  %v4583_v35 = vpack.i.bf16 %v4572_v2, %v4569_v5  ;;  %vm326_vm5 = vcmp.gt.f32.partialorder %v272_v44, 0.0 }
  0x9a   : > { %2700 = vrot.lane.b32.xlu0 %v4514_v22, %s3582_s11  ;;  %2720 = vrot.lane.b32.xlu1 %v4518_v20, %s3582_s11  ;;  %6051 = vst [vmem:[#allocation78_spill] sm:$0xff] %v4543_v25  ;;  %v4618_v25 = vpack.i.bf16 %v3907_v32, %v3901_v29 }
  0x9b   : > { %6052 = vst [vmem:[#allocation79_spill] sm:$0xff] %v4546_v18  ;;  %v4579_v24 = vsel %vm731_vm10, %v808_v17, %v810_v47  ;;  %v4596_v47 = vpack.i.bf16 %v3738_v45, %v3732_v43 }
  0x9c   : > { %2740 = vrot.lane.b32.xlu2 %v4525_v63, %s3582_s11  ;;  %6053 = vst [vmem:[#allocation80_spill] sm:$0xff] %v4569_v5  ;;  %v4589_v4 = vpack.i.bf16 %v4579_v24, %v4576_v39  ;;  %v4634_v5 = vpack.i.bf16 %v3763_v59, %v3751_v55 }
  0x9d   : > { %6054 = vst [vmem:[#allocation81_spill] sm:$0xff] %v4572_v2  ;;  %v380_v2 = vmin.f32 %v272_v44, 0.0 }
  0x9e   : > { %6055 = vst [vmem:[#allocation82_spill] sm:$0xff] %v4576_v39  ;;  %v273_v39 = vld [vmem:[%s3670_s9 + $0x188] sm:$0xff] }
  0x9f   : > { %6056 = vst [vmem:[#allocation83_spill] sm:$0xff] %v4579_v24  ;;  %vm327_vm6 = vcmp.gt.f32.partialorder %v273_v39, 0.0 }
  0xa0   : > { %6060 = vst [vmem:[#allocation87_spill] sm:$0xff] %v4642_v12 }
  0xa2   : > { %2715 = vrot.lane.b32.xlu0 %v4550_v51, %s3582_s11  ;;  %2735 = vrot.lane.b32.xlu1 %v4554_v48, %s3582_s11 }
  0xa4   : > { %2755 = vrot.lane.b32.xlu2 %v2754_v40, %s3583_s12  ;;  %v803_v40 = vrot.slane %v4246_v46, 2 }
  0xa5   : > { %v4672_v55 = vpop.permute.xlu1 %2605 }
  0xa6   : > { %v4603_v17 = vsel %vm731_vm10, %v802_v57, %v803_v40  ;;  %v4606_v24 = vsel %vm731_vm10, %v803_v40, %v805_v41  ;;  %v4622_v57 = vpack.i.bf16 %v3998_v6, %v3990_v61  ;;  %v4624_v40 = vpop.permute.xlu2 %2620  ;;  %v381_v41 = vmin.f32 %v273_v39, 0.0  ;;  %6062 = vst [vmem:[#allocation89_spill] sm:$0xff] %v4672_v55 }
  0xa7   : > { %6057 = vst [vmem:[#allocation84_spill] sm:$0xff] %v4603_v17  ;;  %v4614_v18 = vpack.i.bf16 %v4606_v24, %v4603_v17 }
  0xa8   : > { %6058 = vst [vmem:[#allocation85_spill] sm:$0xff] %v4606_v24  ;;  %v482_v24 = vmul.f32 1.442695, %v380_v2  ;;  %v484_v17 = vmul.f32 1.442695, %v381_v41  ;;  %v4686_v27 = vpop.permute.xlu0 %2595 }
  0xa9   : > { %6059 = vst [vmem:[#allocation86_spill] sm:$0xff] %v4622_v57 }
  0xaa   : > { %2730 = vrot.lane.b32.xlu0 %v4583_v35, %s3582_s11  ;;  %2750 = vrot.lane.b32.xlu1 %v4589_v4, %s3582_s11  ;;  %3449 = vpow2.f32 %v482_v24  ;;  %v4654_v24 = vpack.i.bf16 %v3831_v31, %v3822_v28 }
  0xab   : > { %3451 = vpow2.f32 %v484_v17  ;;  %v4658_v17 = vpack.i.bf16 %v4182_v53, %v4172_v1 }
  0xac   : > { %2770 = vrot.lane.b32.xlu2 %v4596_v47, %s3583_s12 }
  0xae   : > { %v4646_v2 = vpop.permute.xlu2 %2635 }
  0xb0   : > { %v3450_v41 = vpop.eup %3449 }
  0xb1   : > { %v3452_v8 = vpop.eup %3451  ;;  %v2500_v58 = vadd.f32 -1.0, %v3450_v41  ;;  %v4684_v41 = vpack.i.bf16 %v4323_v38, %v4314_v23 }
  0xb2   : > { %2745 = vrot.lane.b32.xlu0 %v4614_v18, %s3582_s11  ;;  %2765 = vrot.lane.b32.xlu1 %v4618_v25, %s3583_s12  ;;  %v2501_v15 = vadd.f32 -1.0, %v3452_v8  ;;  %v4680_v8 = vpack.i.bf16 %v3972_v36, %v3963_v30 }
  0xb3   : > { %v4674_v59 = vsel %vm326_vm5, %v272_v44, %v2500_v58  ;;  %v4706_v58 = vpack.i.bf16 %v4392_v56, %v4386_v42 }
  0xb4   : > { %2785 = vrot.lane.b32.xlu2 %v4622_v57, %s3583_s12  ;;  %v4676_v13 = vsel %vm327_vm6, %v273_v39, %v2501_v15  ;;  %v4700_v15 = vpack.i.bf16 %v4123_v60, %v4115_v16 }
  0xb5   : > { %6066 = vst [vmem:[#allocation93_spill] sm:$0xff] %v4706_v58 }
  0xb6   : > { %6064 = vst [vmem:[#allocation91_spill] sm:$0xff] %v4700_v15 }
  0xb7   : > { %v4708_v44 = vpop.permute.xlu1 %2610 }
  0xba   : > { %2760 = vrot.lane.b32.xlu0 %v4634_v5, %s3583_s12  ;;  %2780 = vrot.lane.b32.xlu1 %v4638_v50, %s3583_s12 }
  0xbc   : > { %2800 = vrot.lane.b32.xlu2 %v4642_v12, %s3583_s12 }
  0xbd   : > { %v4670_v11 = vpop.permute.xlu2 %2650  ;;  %v2601_v12 = vpop.permute.xlu0 %2600 }
  0xbe   : > { %v2603_v57 = vunpack.i.h.bf16 %v2601_v12  ;;  %v2602_v55 = vunpack.i.l.bf16 %v2601_v12 }
  0xc0   : > { %v1482_v42 = vsel %vm1478_vm7, %v3947_v9, %v2603_v57  ;;  %v1481_v56 = vsel %vm1478_vm7, %v3934_v62, %v2602_v55  ;;  %v2618_v55 = vunpack.i.h.bf16 %v4585_v19  ;;  %v2617_v62 = vunpack.i.l.bf16 %v4585_v19  ;;  %v274_v19 = vld [vmem:[%s3670_s9 + $0x190] sm:$0x3] }
  0xc1   : > { %vm328_vm9 = vcmp.gt.f32.partialorder %v274_v19, 0.0 }
  0xc2   : > { %2775 = vrot.lane.b32.xlu0 %v4654_v24, %s3583_s12  ;;  %2795 = vrot.lane.b32.xlu1 %v4658_v17, %s3583_s12 }
  0xc3   : > { %v2631_v16 = vpop.permute.xlu1 %2630 }
  0xc4   : > { %2815 = vrot.lane.b32.xlu2 %v4662_v33, %s3583_s12  ;;  %v4690_v33 = vpack.i.bf16 %v4676_v13, %v4674_v59 }
  0xc6   : > { %6063 = vst [vmem:[#allocation90_spill] sm:$0xff] %v4690_v33 }
  0xca   : > { %2790 = vrot.lane.b32.xlu0 %v4680_v8, %s3583_s12  ;;  %2810 = vrot.lane.b32.xlu1 %v4684_v41, %s3583_s12 }
  0xcc   : > { %2830 = vrot.lane.b32.xlu2 %v4690_v33, %s3583_s12  ;;  %v4718_v33 = vpack.i.bf16 %v4246_v46, %v4239_v7 }
  0xce   : > { %v4702_v39 = vpop.permute.xlu2 %2665 }
  0xcf   : > { %6065 = vst [vmem:[#allocation92_spill] sm:$0xff] %v4702_v39  ;;  %v4738_v9 = vpop.permute.xlu0 %2625 }
  0xd2   : > { %2805 = vrot.lane.b32.xlu0 %v4700_v15, %s3583_s12  ;;  %2825 = vrot.lane.b32.xlu1 %v4706_v58, %s3583_s12 }
  0xd4   : > { %2845 = vrot.lane.b32.xlu2 %v4426_v21, %s3581_s10 }
  0xd6   : > { %v2681_v15 = vpop.permute.xlu2 %2680 }
  0xd7   : > { %v2683_v39 = vunpack.i.h.bf16 %v2681_v15  ;;  %v2682_v12 = vunpack.i.l.bf16 %v2681_v15  ;;  %v1488_v15 = vsel %vm1478_vm7, %v3738_v45, %v2618_v55  ;;  %v382_v45 = vmin.f32 %v274_v19, 0.0 }
  0xd9   : > { %v4725_v58 = vsel %vm1511_vm8, %v1481_v56, %v2682_v12  ;;  %v4728_v21 = vsel %vm1511_vm8, %v1482_v42, %v2683_v39  ;;  %v1487_v39 = vsel %vm1478_vm7, %v3732_v43, %v2617_v62 }
  0xda   : > { %6067 = vst [vmem:[#allocation94_spill] sm:$0xff] %v4728_v21  ;;  %2820 = vrot.lane.b32.xlu0 %v4718_v33, %s3583_s12  ;;  %2840 = vrot.lane.b32.xlu1 %v4469_v34, %s3581_s10  ;;  %v2632_v21 = vunpack.i.l.bf16 %v2631_v16 }
  0xdc   : > { %2860 = vrot.lane.b32.xlu2 %v4473_v52, %s3581_s10  ;;  %v2646_v52 = vpop.permute.xlu1 %2645 }
  0xde   : > { %v2696_v56 = vpop.permute.xlu2 %2695 }
  0xdf   : > { %v2698_v57 = vunpack.i.h.bf16 %v2696_v56  ;;  %v2697_v42 = vunpack.i.l.bf16 %v2696_v56  ;;  %v2633_v56 = vunpack.i.h.bf16 %v2631_v16 }
  0xe1   : > { %v4745_v34 = vsel %vm1511_vm8, %v1488_v15, %v2698_v57  ;;  %v4748_v12 = vsel %vm1511_vm8, %v1487_v39, %v2697_v42  ;;  %v1494_v57 = vsel %vm1478_vm7, %v3998_v6, %v2633_v56  ;;  %v4761_v42 = vpop.permute.xlu0 %2640  ;;  %v2648_v15 = vunpack.i.h.bf16 %v2646_v52 }
  0xe2   : > { %2835 = vrot.lane.b32.xlu0 %v4288_v26, %s3581_s10  ;;  %2855 = vrot.lane.b32.xlu1 %v4514_v22, %s3581_s10  ;;  %v1493_v26 = vsel %vm1478_vm7, %v3990_v61, %v2632_v21  ;;  %v2647_v6 = vunpack.i.l.bf16 %v2646_v52 }
  0xe4   : > { %2875 = vrot.lane.b32.xlu2 %v4518_v20, %s3581_s10  ;;  %v486_v20 = vmul.f32 1.442695, %v382_v45 }
  0xe6   : > { %v2711_v43 = vpop.permute.xlu2 %2710  ;;  %3453 = vpow2.f32 %v486_v20 }
  0xe7   : > { %v2713_v55 = vunpack.i.h.bf16 %v2711_v43  ;;  %v2712_v62 = vunpack.i.l.bf16 %v2711_v43  ;;  %v1500_v43 = vsel %vm1478_vm7, %v4149_v3, %v2648_v15 }
  0xe9   : > { %v4764_v22 = vsel %vm1511_vm8, %v1494_v57, %v2713_v55  ;;  %v4767_v16 = vsel %vm1511_vm8, %v1493_v26, %v2712_v62  ;;  %v2598_v55 = vunpack.i.h.bf16 %v4686_v27  ;;  %v2613_v57 = vunpack.i.h.bf16 %v4708_v44 }
  0xea   : > { %2850 = vrot.lane.b32.xlu0 %v4376_v49, %s3581_s10  ;;  %2870 = vrot.lane.b32.xlu1 %v4550_v51, %s3581_s10  ;;  %v1499_v49 = vsel %vm1478_vm7, %v4140_v37, %v2647_v6  ;;  %v2612_v26 = vunpack.i.l.bf16 %v4708_v44 }
  0xeb   : > { %v1486_v15 = vsel %vm1478_vm7, %v3907_v32, %v2613_v57 }
  0xec   : > { %2890 = vrot.lane.b32.xlu2 %v4554_v48, %s3581_s10  ;;  %v4775_v61 = vpop.permute.xlu1 %2660  ;;  %v3454_v52 = vpop.eup %3453  ;;  %v1485_v44 = vsel %vm1478_vm7, %v3901_v29, %v2612_v26  ;;  %v2628_v26 = vunpack.i.h.bf16 %v4738_v9 }
  0xed   : > { %v2502_v62 = vadd.f32 -1.0, %v3454_v52 }
  0xee   : > { %v2726_v21 = vpop.permute.xlu2 %2725 }
  0xef   : > { %v2728_v39 = vunpack.i.h.bf16 %v2726_v21  ;;  %v2727_v56 = vunpack.i.l.bf16 %v2726_v21  ;;  %v4789_v48 = vpop.permute.xlu0 %2655 }
  0xf1   : > { %v4782_v45 = vsel %vm1511_vm8, %v1500_v43, %v2728_v39  ;;  %v4785_v51 = vsel %vm1511_vm8, %v1499_v49, %v2727_v56  ;;  %v852_v39 = vrot.slane %v4674_v59, 2 }
  0xf2   : > { %2865 = vrot.lane.b32.xlu0 %v4436_v0, %s3581_s10  ;;  %2885 = vrot.lane.b32.xlu1 %v4583_v35, %s3581_s10  ;;  %v2597_v0 = vunpack.i.l.bf16 %v4686_v27  ;;  %v6068_v35 = vld [vmem:[#allocation12_spill] sm:$0xff] }
  0xf3   : > { %v1480_v20 = vsel %vm1478_vm7, %v6068_v35, %v2598_v55 }
  0xf4   : > { %2905 = vrot.lane.b32.xlu2 %v4589_v4, %s3581_s10  ;;  %v2676_v3 = vpop.permute.xlu1 %2675  ;;  %v4807_v4 = vsel %vm328_vm9, %v274_v19, %v2502_v62  ;;  %v6069_v19 = vld [vmem:[#allocation11_spill] sm:$0xff] }
  0xf5   : > { %v2678_v6 = vunpack.i.h.bf16 %v2676_v3  ;;  %v2677_v21 = vunpack.i.l.bf16 %v2676_v3  ;;  %v1479_v56 = vsel %vm1478_vm7, %v6069_v19, %v2597_v0  ;;  %v855_v49 = vrot.slane %v4807_v4, 2 }
  0xf6   : > { %v4795_v37 = vpop.permute.xlu2 %2740 }
  0xf7   : > { %v1513_v55 = vsel %vm1511_vm8, %v1480_v20, %v2678_v6  ;;  %v1512_v57 = vsel %vm1511_vm8, %v1479_v56, %v2677_v21  ;;  %v2622_v6 = vunpack.i.l.bf16 %v4624_v40 }
  0xfa   : > { %2880 = vrot.lane.b32.xlu0 %v4480_v14, %s3581_s10  ;;  %2900 = vrot.lane.b32.xlu1 %v4614_v18, %s3581_s10  ;;  %v853_v18 = vrot.slane %v4676_v13, 2 }
  0xfc   : > { %v4813_v27 = vpop.permute.xlu0 %2670  ;;  %2920 = vrot.lane.b32.xlu2 %v4618_v25, %s3582_s11  ;;  %v2691_v14 = vpop.permute.xlu1 %2690  ;;  %v4839_v20 = vsel %vm731_vm10, %v852_v39, %v853_v18 }
  0xfd   : > { %v2693_v43 = vunpack.i.h.bf16 %v2691_v14  ;;  %v2692_v32 = vunpack.i.l.bf16 %v2691_v14  ;;  %v2627_v14 = vunpack.i.l.bf16 %v4738_v9  ;;  %6070 = vst [vmem:[#allocation12_spill] sm:$0xff] %v4839_v20  ;;  %v2623_v9 = vunpack.i.h.bf16 %v4624_v40 }
  0xfe   : > { %v2756_v29 = vpop.permute.xlu2 %2755  ;;  %v2642_v40 = vunpack.i.l.bf16 %v4761_v42 }
  0xff   : > { %v2758_v52 = vunpack.i.h.bf16 %v2756_v29  ;;  %v2757_v3 = vunpack.i.l.bf16 %v2756_v29  ;;  %v1519_v25 = vsel %vm1511_vm8, %v1486_v15, %v2693_v43  ;;  %v1518_v62 = vsel %vm1511_vm8, %v1485_v44, %v2692_v32  ;;  %v4861_v29 = vld [vmem:[%s3670_s9 + $0x198] sm:$0xff] }
 0x100   : > { %v4842_v15 = vsel %vm731_vm10, %v853_v18, %v855_v49  ;;  %v1491_v21 = vsel %vm1478_vm7, %v4075_v54, %v2627_v14  ;;  %vm329_vm12 = vcmp.gt.f32.partialorder %v4861_v29, 0.0 }
 0x101   : > { %v4828_v0 = vsel %vm1544_vm11, %v1512_v57, %v2757_v3  ;;  %v4831_v35 = vsel %vm1544_vm11, %v1513_v55, %v2758_v52  ;;  %6071 = vst [vmem:[#allocation11_spill] sm:$0xff] %v4842_v15  ;;  %v2909_v39 = vpack.i.bf16 %v4842_v15, %v4839_v20  ;;  %v4871_v3 = vld [vmem:[%s3670_s9 + $0x1a0] sm:$0xff]  ;;  %v1490_v55 = vsel %vm1478_vm7, %v3831_v31, %v2623_v9  ;;  %v6118_v15 = vld [vmem:[#allocation24_spill] sm:$0xff] }
 0x102   : > { %2895 = vrot.lane.b32.xlu0 %v4525_v63, %s3581_s10  ;;  %2915 = vrot.lane.b32.xlu1 %v4634_v5, %s3582_s11  ;;  %v1492_v63 = vsel %vm1478_vm7, %v4082_v10, %v2628_v26  ;;  %v2638_v57 = vunpack.i.h.bf16 %v4646_v2  ;;  %v2637_v26 = vunpack.i.l.bf16 %v4646_v2  ;;  %v383_v31 = vmin.f32 %v4861_v29, 0.0 }
 0x103   : > { %vm330_vm13 = vcmp.gt.f32.partialorder %v4871_v3, 0.0 }
 0x104   : > { %v4844_v44 = vpop.permute.xlu0 %2685  ;;  %2935 = vrot.lane.b32.xlu2 %v4638_v50, %s3582_s11  ;;  %v2706_v5 = vpop.permute.xlu1 %2705  ;;  %v2643_v50 = vunpack.i.h.bf16 %v4761_v42  ;;  %v1489_v42 = vsel %vm1478_vm7, %v3822_v28, %v2622_v6  ;;  %v2658_v28 = vunpack.i.h.bf16 %v4789_v48 }
 0x105   : > { %v2708_v18 = vunpack.i.h.bf16 %v2706_v5  ;;  %v2707_v19 = vunpack.i.l.bf16 %v2706_v5 }
 0x106   : > { %v2771_v56 = vpop.permute.xlu2 %2770 }
 0x107   : > { %v2773_v43 = vunpack.i.h.bf16 %v2771_v56  ;;  %v2772_v32 = vunpack.i.l.bf16 %v2771_v56  ;;  %v1524_v49 = vsel %vm1511_vm8, %v1491_v21, %v2707_v19  ;;  %v1525_v10 = vsel %vm1511_vm8, %v1492_v63, %v2708_v18 }
 0x108   : > { %v384_v63 = vmin.f32 %v4871_v3, 0.0 }
 0x109   : > { %v4864_v54 = vsel %vm1544_vm11, %v1518_v62, %v2772_v32  ;;  %v4867_v52 = vsel %vm1544_vm11, %v1519_v25, %v2773_v43  ;;  %v1498_v25 = vsel %vm1478_vm7, %v4182_v53, %v2643_v50  ;;  %v1497_v62 = vsel %vm1478_vm7, %v4172_v1, %v2642_v40 }
 0x10a   : > { %2910 = vrot.lane.b32.xlu0 %v2909_v39, %s3581_s10  ;;  %2930 = vrot.lane.b32.xlu1 %v4654_v24, %s3582_s11  ;;  %v2657_v24 = vunpack.i.l.bf16 %v4789_v48  ;;  %v488_v50 = vmul.f32 1.442695, %v383_v31  ;;  %v490_v43 = vmul.f32 1.442695, %v384_v63  ;;  %v1496_v40 = vsel %vm1478_vm7, %v3972_v36, %v2638_v57 }
 0x10c   : > { %v2701_v14 = vpop.permute.xlu0 %2700  ;;  %2950 = vrot.lane.b32.xlu2 %v4658_v17, %s3582_s11  ;;  %v2721_v2 = vpop.permute.xlu1 %2720  ;;  %3455 = vpow2.f32 %v488_v50 }
 0x10d   : > { %v2703_v9 = vunpack.i.h.bf16 %v2701_v14  ;;  %v2702_v6 = vunpack.i.l.bf16 %v2701_v14  ;;  %v2723_v5 = vunpack.i.h.bf16 %v2721_v2  ;;  %v2722_v53 = vunpack.i.l.bf16 %v2721_v2 }
 0x10e   : > { %v2786_v21 = vpop.permute.xlu2 %2785  ;;  %3457 = vpow2.f32 %v490_v43 }
 0x10f   : > { %v4892_v1 = vsel %vm1511_vm8, %v1490_v55, %v2703_v9  ;;  %v4895_v39 = vsel %vm1511_vm8, %v1489_v42, %v2702_v6  ;;  %v2788_v17 = vunpack.i.h.bf16 %v2786_v21  ;;  %v2787_v18 = vunpack.i.l.bf16 %v2786_v21 }
 0x110   : > { %v1530_v19 = vsel %vm1511_vm8, %v1497_v62, %v2722_v53  ;;  %v1531_v56 = vsel %vm1511_vm8, %v1498_v25, %v2723_v5  ;;  %v1495_v55 = vsel %vm1478_vm7, %v3963_v30, %v2637_v26  ;;  %v2653_v42 = vunpack.i.h.bf16 %v4670_v11  ;;  %v6075_v53 = vld [vmem:[#allocation86_spill] sm:$0xff] }
 0x111   : > { %v4900_v32 = vsel %vm1544_vm11, %v1524_v49, %v2787_v18  ;;  %v4905_v48 = vsel %vm1544_vm11, %v1525_v10, %v2788_v17  ;;  %v2652_v49 = vunpack.i.l.bf16 %v4670_v11  ;;  %v1504_v25 = vsel %vm1478_vm7, %v4323_v38, %v2658_v28  ;;  %v6076_v17 = vld [vmem:[#allocation32_spill] sm:$0xff] }
 0x112   : > { %6072 = vst [vmem:[#allocation95_spill] sm:$0xff] %v4900_v32  ;;  %2925 = vrot.lane.b32.xlu0 %v4596_v47, %s3582_s11  ;;  %2945 = vrot.lane.b32.xlu1 %v4680_v8, %s3582_s11  ;;  %v1503_v47 = vsel %vm1478_vm7, %v4314_v23, %v2657_v24  ;;  %v2673_v26 = vunpack.i.h.bf16 %v4813_v27  ;;  %v3456_v63 = vpop.eup %3455  ;;  %v6074_v24 = vld [vmem:[#allocation89_spill] sm:$0xff] }
 0x113   : > { %6073 = vst [vmem:[#allocation96_spill] sm:$0xff] %v4905_v48  ;;  %v2608_v5 = vunpack.i.h.bf16 %v6074_v24  ;;  %v1501_v18 = vsel %vm1478_vm7, %v6076_v17, %v2652_v49  ;;  %v2607_v50 = vunpack.i.l.bf16 %v6074_v24 }
 0x114   : > { %v2716_v10 = vpop.permute.xlu0 %2715  ;;  %2965 = vrot.lane.b32.xlu2 %v4684_v41, %s3582_s11  ;;  %v2736_v57 = vpop.permute.xlu1 %2735  ;;  %v2672_v41 = vunpack.i.l.bf16 %v4813_v27  ;;  %v1502_v27 = vsel %vm1478_vm7, %v4123_v60, %v2653_v42  ;;  %v6081_v60 = vld [vmem:[#allocation93_spill] sm:$0xff] }
 0x115   : > { %v2718_v36 = vunpack.i.h.bf16 %v2716_v10  ;;  %v2717_v30 = vunpack.i.l.bf16 %v2716_v10  ;;  %v2738_v8 = vunpack.i.h.bf16 %v2736_v57  ;;  %v2737_v62 = vunpack.i.l.bf16 %v2736_v57  ;;  %v3458_v21 = vpop.eup %3457 }
 0x116   : > { %v2801_v11 = vpop.permute.xlu2 %2800 }
 0x117   : > { %v4923_v14 = vsel %vm1511_vm8, %v1496_v40, %v2718_v36  ;;  %v2803_v38 = vunpack.i.h.bf16 %v2801_v11  ;;  %v2802_v31 = vunpack.i.l.bf16 %v2801_v11  ;;  %v4926_v23 = vsel %vm1511_vm8, %v1495_v55, %v2717_v30  ;;  %v6079_v55 = vld [vmem:[#allocation56_spill] sm:$0xff] }
 0x118   : > { %v1536_v28 = vsel %vm1511_vm8, %v1503_v47, %v2737_v62  ;;  %v1537_v9 = vsel %vm1511_vm8, %v1504_v25, %v2738_v8  ;;  %v1510_v25 = vsel %vm1478_vm7, %v6079_v55, %v2673_v26  ;;  %v6080_v47 = vld [vmem:[#allocation55_spill] sm:$0xff]  ;;  %v2503_v11 = vadd.f32 -1.0, %v3456_v63 }
 0x119   : > { %v4932_v6 = vsel %vm1544_vm11, %v1530_v19, %v2802_v31  ;;  %v4935_v2 = vsel %vm1544_vm11, %v1531_v56, %v2803_v38  ;;  %v6077_v19 = vld [vmem:[#allocation92_spill] sm:$0xff]  ;;  %v6078_v56 = vld [vmem:[#allocation91_spill] sm:$0xff]  ;;  %v1509_v10 = vsel %vm1478_vm7, %v6080_v47, %v2672_v41  ;;  %v2504_v38 = vadd.f32 -1.0, %v3458_v21 }
 0x11a   : > { %2940 = vrot.lane.b32.xlu0 %v6075_v53, %s3582_s11  ;;  %v2668_v43 = vunpack.i.h.bf16 %v6077_v19  ;;  %2960 = vrot.lane.b32.xlu1 %v6078_v56, %s3582_s11  ;;  %v2667_v40 = vunpack.i.l.bf16 %v6077_v19  ;;  %v2688_v19 = vunpack.i.h.bf16 %v4844_v44  ;;  %v2687_v63 = vunpack.i.l.bf16 %v4844_v44 }
 0x11b   : > { %v4978_v56 = vsel %vm329_vm12, %v4861_v29, %v2503_v11  ;;  %v4981_v55 = vsel %vm330_vm13, %v4871_v3, %v2504_v38  ;;  %v6087_v29 = vld [vmem:[#allocation14_spill] sm:$0xff] }
 0x11c   : > { %v2731_v36 = vpop.permute.xlu0 %2730  ;;  %2980 = vrot.lane.b32.xlu2 %v6081_v60, %s3582_s11  ;;  %v2751_v30 = vpop.permute.xlu1 %2750  ;;  %6083 = vst [vmem:[#allocation89_spill] sm:$0xff] %v4978_v56  ;;  %v1508_v47 = vsel %vm1478_vm7, %v4246_v46, %v2668_v43  ;;  %v277_v43 = vld [vmem:[%s3670_s9 + $0x1a8] sm:$0x3] }
 0x11d   : > { %v2733_v42 = vunpack.i.h.bf16 %v2731_v36  ;;  %v2732_v49 = vunpack.i.l.bf16 %v2731_v36  ;;  %v2753_v57 = vunpack.i.h.bf16 %v2751_v30  ;;  %v2752_v8 = vunpack.i.l.bf16 %v2751_v30  ;;  %6084 = vst [vmem:[#allocation86_spill] sm:$0xff] %v4981_v55 }
 0x11e   : > { %v2816_v62 = vpop.permute.xlu2 %2815  ;;  %vm331_vm14 = vcmp.gt.f32.partialorder %v277_v43, 0.0 }
 0x11f   : > { %v4956_v31 = vsel %vm1511_vm8, %v1502_v27, %v2733_v42  ;;  %v4959_v26 = vsel %vm1511_vm8, %v1501_v18, %v2732_v49  ;;  %v2818_v24 = vunpack.i.h.bf16 %v2816_v62  ;;  %v2817_v41 = vunpack.i.l.bf16 %v2816_v62  ;;  %v6082_v18 = vld [vmem:[#allocation87_spill] sm:$0xff] }
 0x120   : > { %v1542_v53 = vsel %vm1511_vm8, %v1509_v10, %v2752_v8  ;;  %v1543_v17 = vsel %vm1511_vm8, %v1510_v25, %v2753_v57  ;;  %v6085_v25 = vld [vmem:[#allocation7_spill] sm:$0xff]  ;;  %v1507_v10 = vsel %vm1478_vm7, %v4239_v7, %v2667_v40  ;;  %v385_v62 = vmin.f32 %v277_v43, 0.0 }
 0x121   : > { %v4968_v21 = vsel %vm1544_vm11, %v1536_v28, %v2817_v41  ;;  %v4971_v27 = vsel %vm1544_vm11, %v1537_v9, %v2818_v24  ;;  %v1484_v44 = vsel %vm1478_vm7, %v6085_v25, %v2608_v5  ;;  %v6086_v28 = vld [vmem:[#allocation5_spill] sm:$0xff] }
 0x122   : > { %2955 = vrot.lane.b32.xlu0 %v6082_v18, %s3582_s11  ;;  %2975 = vrot.lane.b32.xlu1 %v4718_v33, %s3582_s11  ;;  %v1483_v9 = vsel %vm1478_vm7, %v6086_v28, %v2607_v50  ;;  %v1517_v3 = vsel %vm1511_vm8, %v1484_v44, %v2688_v19  ;;  %v2989_v50 = vpack.i.bf16 %v4981_v55, %v4978_v56  ;;  %v6090_v19 = vld [vmem:[#allocation88_spill] sm:$0xff]  ;;  %v6091_v25 = vld [vmem:[#allocation17_spill] sm:$0xff] }
 0x123   : > { %v1516_v36 = vsel %vm1511_vm8, %v1483_v9, %v2687_v63  ;;  %v492_v63 = vmul.f32 1.442695, %v385_v62 }
 0x124   : > { %v2746_v33 = vpop.permute.xlu0 %2745  ;;  %2995 = vrot.lane.b32.xlu2 %v6087_v29, %s3583_s12  ;;  %v2766_v5 = vpop.permute.xlu1 %2765 }
 0x125   : > { %v2748_v60 = vunpack.i.h.bf16 %v2746_v33  ;;  %v2747_v42 = vunpack.i.l.bf16 %v2746_v33  ;;  %v2768_v49 = vunpack.i.h.bf16 %v2766_v5  ;;  %v2767_v30 = vunpack.i.l.bf16 %v2766_v5  ;;  %v6092_v33 = vld [vmem:[#allocation94_spill] sm:$0xff]  ;;  %v6095_v5 = vld [vmem:[#allocation9_spill] sm:$0xff] }
 0x126   : > { %v2831_v46 = vpop.permute.xlu2 %2830  ;;  %3459 = vpow2.f32 %v492_v63 }
 0x127   : > { %v4999_v7 = vsel %vm1511_vm8, %v1508_v47, %v2748_v60  ;;  %v5002_v40 = vsel %vm1511_vm8, %v1507_v10, %v2747_v42  ;;  %v2833_v57 = vunpack.i.h.bf16 %v2831_v46  ;;  %v2832_v8 = vunpack.i.l.bf16 %v2831_v46 }
 0x128   : > { %v5005_v11 = vsel %vm1544_vm11, %v1516_v36, %v2767_v30  ;;  %v5008_v38 = vsel %vm1544_vm11, %v1517_v3, %v2768_v49  ;;  %v6096_v30 = vld [vmem:[#allocation25_spill] sm:$0xff]  ;;  %v6116_v3 = vld [vmem:[#allocation16_spill] sm:$0xff] }
 0x129   : > { %v5011_v24 = vsel %vm1544_vm11, %v1542_v53, %v2832_v8  ;;  %v5014_v41 = vsel %vm1544_vm11, %v1543_v17, %v2833_v57 }
 0x12a   : > { %6088 = vst [vmem:[#allocation32_spill] sm:$0xff] %v5011_v24  ;;  %2970 = vrot.lane.b32.xlu0 %v6090_v19, %s3582_s11  ;;  %2990 = vrot.lane.b32.xlu1 %v2989_v50, %s3582_s11 }
 0x12b   : > { %6089 = vst [vmem:[#allocation92_spill] sm:$0xff] %v5014_v41 }
 0x12c   : > { %v2761_v18 = vpop.permute.xlu0 %2760  ;;  %3010 = vrot.lane.b32.xlu2 %v6091_v25, %s3583_s12  ;;  %v2781_v9 = vpop.permute.xlu1 %2780  ;;  %v6117_v25 = vld [vmem:[#allocation15_spill] sm:$0xff] }
 0x12d   : > { %v2763_v44 = vunpack.i.h.bf16 %v2761_v18  ;;  %v2762_v28 = vunpack.i.l.bf16 %v2761_v18  ;;  %v2783_v47 = vunpack.i.h.bf16 %v2781_v9  ;;  %v2782_v10 = vunpack.i.l.bf16 %v2781_v9  ;;  %v3460_v50 = vpop.eup %3459  ;;  %v6097_v18 = vld [vmem:[#allocation20_spill] sm:$0xff] }
 0x12e   : > { %v5021_v53 = vpop.permute.xlu2 %2845  ;;  %v6098_v9 = vld [vmem:[#allocation28_spill] sm:$0xff] }
 0x12f   : > { %v5025_v17 = vsel %vm1544_vm11, %v4725_v58, %v2762_v28  ;;  %v5029_v29 = vsel %vm1544_vm11, %v6092_v33, %v2763_v44  ;;  %v5037_v60 = vsel %vm1544_vm11, %v4895_v39, %v2782_v10  ;;  %v5041_v42 = vsel %vm1544_vm11, %v4892_v1, %v2783_v47  ;;  %v6094_v58 = vld [vmem:[#allocation90_spill] sm:$0xff] }
 0x130   : > { %6093 = vst [vmem:[#allocation91_spill] sm:$0xff] %v5041_v42  ;;  %v2505_v1 = vadd.f32 -1.0, %v3460_v50 }
 0x132   : > { %2985 = vrot.lane.b32.xlu0 %v6094_v58, %s3582_s11  ;;  %3005 = vrot.lane.b32.xlu1 %v6095_v5, %s3583_s12  ;;  %v5079_v58 = vsel %vm331_vm14, %v277_v43, %v2505_v1  ;;  %v861_v5 = vrot.slane %v4981_v55, 1  ;;  %s215_s11 = sand.u32 1, %s3571_s19  }
 0x133   : > { %6100 = vst [vmem:[#allocation56_spill] sm:$0xff] %v5079_v58  ;;  %s2369_s25 = scalar_lea.sflag [#allocation3], %s215_s11 }
 0x134   : > { %v2776_v49 = vpop.permute.xlu0 %2775  ;;  %3025 = vrot.lane.b32.xlu2 %v6096_v30, %s3583_s12  ;;  %v2796_v46 = vpop.permute.xlu1 %2795 }
 0x135   : > { %v2777_v57 = vunpack.i.l.bf16 %v2776_v49  ;;  %v2798_v8 = vunpack.i.h.bf16 %v2796_v46  ;;  %v2797_v39 = vunpack.i.l.bf16 %v2796_v46  ;;  %v2778_v19 = vunpack.i.h.bf16 %v2776_v49 }
 0x136   : > { %v5049_v62 = vpop.permute.xlu2 %2860  ;;  %v860_v49 = vrot.slane %v4978_v56, 1 }
 0x137   : > { %v5053_v63 = vsel %vm1544_vm11, %v4926_v23, %v2797_v39  ;;  %v5061_v44 = vsel %vm1544_vm11, %v4923_v14, %v2798_v8  ;;  %v5065_v28 = vsel %vm1544_vm11, %v4748_v12, %v2777_v57  ;;  %v5075_v10 = vsel %vm1544_vm11, %v4745_v34, %v2778_v19  ;;  %v6099_v14 = vld [vmem:[#allocation35_spill] sm:$0xff] }
 0x138   : > { %v863_v39 = vrot.slane %v5079_v58, 1 }
 0x13a   : > { %3000 = vrot.lane.b32.xlu0 %v6097_v18, %s3583_s12  ;;  %3020 = vrot.lane.b32.xlu1 %v6098_v9, %s3583_s12 }
 0x13c   : > { %v2791_v33 = vpop.permute.xlu0 %2790  ;;  %3040 = vrot.lane.b32.xlu2 %v6099_v14, %s3583_s12  ;;  %v2811_v46 = vpop.permute.xlu1 %2810  ;;  %v6103_v14 = vld [vmem:[#allocation31_spill] sm:$0xff] }
 0x13d   : > { %v2793_v30 = vunpack.i.h.bf16 %v2791_v33  ;;  %v2792_v50 = vunpack.i.l.bf16 %v2791_v33  ;;  %v2813_v57 = vunpack.i.h.bf16 %v2811_v46  ;;  %v2812_v8 = vunpack.i.l.bf16 %v2811_v46 }
 0x13e   : > { %v5085_v34 = vpop.permute.xlu2 %2875  ;;  %v864_v46 = vsel %vm650_vm3, %v861_v5, %v863_v39 }
 0x13f   : > { %v5090_v43 = vsel %vm1544_vm11, %v4767_v16, %v2792_v50  ;;  %v5094_v19 = vsel %vm1544_vm11, %v4764_v22, %v2793_v30  ;;  %v5098_v1 = vsel %vm1544_vm11, %v4959_v26, %v2812_v8  ;;  %v5102_v18 = vsel %vm1544_vm11, %v4956_v31, %v2813_v57  ;;  %v6104_v26 = vld [vmem:[#allocation38_spill] sm:$0xff]  ;;  %v6105_v30 = vld [vmem:[#allocation44_spill] sm:$0xff] }
 0x140   : > { %6101 = vst [vmem:[#allocation55_spill] sm:$0xff] %v5090_v43  ;;  %v862_v50 = vsel %vm650_vm3, %v860_v49, %v861_v5  ;;  %v816_v22 = vrot.slane %v4676_v13, 1  ;;  %v818_v16 = vrot.slane %v4807_v4, 1  ;;  %v2662_v4 = vunpack.i.l.bf16 %v4775_v61  ;;  %v6122_v43 = vld [vmem:[#allocation42_spill] sm:$0xff] }
 0x141   : > { %6102 = vst [vmem:[#allocation93_spill] sm:$0xff] %v5094_v19 }
 0x142   : > { %3015 = vrot.lane.b32.xlu0 %v6103_v14, %s3583_s12  ;;  %3035 = vrot.lane.b32.xlu1 %v6104_v26, %s3583_s12  ;;  %v815_v14 = vrot.slane %v4674_v59, 1  ;;  %v3069_v26 = vpack.i.bf16 %v864_v46, %v862_v50  ;;  %v2742_v50 = vunpack.i.l.bf16 %v4795_v37  ;;  %v6110_v46 = vld [vmem:[#allocation46_spill] sm:$0xff] }
 0x144   : > { %v2806_v31 = vpop.permute.xlu0 %2805  ;;  %3055 = vrot.lane.b32.xlu2 %v6105_v30, %s3583_s12  ;;  %v2826_v33 = vpop.permute.xlu1 %2825 }
 0x145   : > { %v2808_v57 = vunpack.i.h.bf16 %v2806_v31  ;;  %v2807_v8 = vunpack.i.l.bf16 %v2806_v31  ;;  %v2828_v9 = vunpack.i.h.bf16 %v2826_v33  ;;  %v2827_v12 = vunpack.i.l.bf16 %v2826_v33 }
 0x146   : > { %v5120_v47 = vpop.permute.xlu2 %2890  ;;  %v2743_v31 = vunpack.i.h.bf16 %v4795_v37 }
 0x147   : > { %v5127_v30 = vsel %vm1544_vm11, %v4785_v51, %v2807_v8  ;;  %v5131_v5 = vsel %vm1544_vm11, %v4782_v45, %v2808_v57  ;;  %v5139_v59 = vsel %vm1544_vm11, %v5002_v40, %v2827_v12  ;;  %v5143_v13 = vsel %vm1544_vm11, %v4999_v7, %v2828_v9  ;;  %v6108_v40 = vld [vmem:[#allocation41_spill] sm:$0xff] }
 0x148   : > { %6106 = vst [vmem:[#allocation87_spill] sm:$0xff] %v5139_v59  ;;  %v2663_v51 = vunpack.i.h.bf16 %v4775_v61  ;;  %v6109_v7 = vld [vmem:[#allocation49_spill] sm:$0xff]  ;;  %v5159_v61 = vsel %vm650_vm3, %v815_v14, %v816_v22  ;;  %v5162_v9 = vsel %vm650_vm3, %v816_v22, %v818_v16 }
 0x149   : > { %6107 = vst [vmem:[#allocation7_spill] sm:$0xff] %v5143_v13  ;;  %v6111_v8 = vld [vmem:[#allocation45_spill] sm:$0xff]  ;;  %v3064_v16 = vpack.i.bf16 %v5162_v9, %v5159_v61 }
 0x14a   : > { %3030 = vrot.lane.b32.xlu0 %v6108_v40, %s3583_s12  ;;  %3050 = vrot.lane.b32.xlu1 %v6109_v7, %s3583_s12  ;;  %v1506_v57 = vsel %vm1478_vm7, %v6110_v46, %v2663_v51  ;;  %v1505_v37 = vsel %vm1478_vm7, %v6111_v8, %v2662_v4  ;;  %v6114_v8 = vld [vmem:[#allocation13_spill] sm:$0xff] }
 0x14b   : > { %v1539_v7 = vsel %vm1511_vm8, %v1506_v57, %v2743_v31  ;;  %v6113_v31 = vld [vmem:[#allocation52_spill] sm:$0xff] }
 0x14c   : > { %v2821_v12 = vpop.permute.xlu0 %2820  ;;  %3070 = vrot.lane.b32.xlu2 %v3069_v26, %s3583_s12  ;;  %v5168_v45 = vpop.permute.xlu1 %2840  ;;  %v1538_v26 = vsel %vm1511_vm8, %v1505_v37, %v2742_v50 }
 0x14d   : > { %v2823_v33 = vunpack.i.h.bf16 %v2821_v12  ;;  %v2822_v40 = vunpack.i.l.bf16 %v2821_v12  ;;  %v2843_v50 = vunpack.i.h.bf16 %v5168_v45 }
 0x14e   : > { %v5172_v39 = vpop.permute.xlu2 %2905 }
 0x14f   : > { %v5177_v22 = vsel %vm1544_vm11, %v1538_v26, %v2822_v40  ;;  %v5180_v14 = vsel %vm1544_vm11, %v1539_v7, %v2823_v33  ;;  %v1580_v37 = vsel %vm1478_vm7, %v6114_v8, %v2843_v50  ;;  %v6115_v7 = vld [vmem:[#allocation63_spill] sm:$0xff] }
 0x150   : > { %6112 = vst [vmem:[#allocation5_spill] sm:$0xff] %v5180_v14 }
 0x152   : > { %3045 = vrot.lane.b32.xlu0 %v6113_v31, %s3583_s12  ;;  %3065 = vrot.lane.b32.xlu1 %v3064_v16, %s3583_s12 }
 0x154   : > { %v5190_v12 = vpop.permute.xlu0 %2835  ;;  %v2856_v46 = vpop.permute.xlu1 %2855 }
 0x155   : > { %v2858_v26 = vunpack.i.h.bf16 %v2856_v46  ;;  %v2857_v16 = vunpack.i.l.bf16 %v2856_v46 }
 0x156   : > { %v5192_v57 = vpop.permute.xlu2 %2920 }
 0x157   : > { %v2923_v33 = vunpack.i.h.bf16 %v5192_v57  ;;  %v1586_v23 = vsel %vm1478_vm7, %v6116_v3, %v2858_v26  ;;  %v1585_v58 = vsel %vm1478_vm7, %v6117_v25, %v2857_v16  ;;  %v6119_v26 = vld [vmem:[#allocation23_spill] sm:$0xff]  ;;  %v2838_v16 = vunpack.i.h.bf16 %v5190_v12 }
 0x159   : > { %v5198_v40 = vsel %vm1511_vm8, %v1580_v37, %v2923_v33 }
 0x15a   : > { %3060 = vrot.lane.b32.xlu0 %v6115_v7, %s3583_s12  ;;  %s2450_s12 = sshll.u32 %s215_s11, 6 }
 0x15b   : > { %s5820_s13 = scalar_lea.vmem [#allocation2], %s2450_s12 }
 0x15c   : > { %v2851_v31 = vpop.permute.xlu0 %2850  ;;  %v2871_v4 = vpop.permute.xlu1 %2870  ;;  %s2381_s17 = sshll.u32 %s5820_s13, 4  ;;  %s2382_s17 = int_to_ptr.vmem [resolvable:$true] %s2381_s17 }
 0x15d   : > { %v2873_v8 = vunpack.i.h.bf16 %v2871_v4  ;;  %v2872_v37 = vunpack.i.l.bf16 %v2871_v4  ;;  %v2853_v32 = vunpack.i.h.bf16 %v2851_v31  ;;  %v2852_v59 = vunpack.i.l.bf16 %v2851_v31 }
 0x15e   : > { %v2936_v51 = vpop.permute.xlu2 %2935 }
 0x15f   : > { %v2938_v49 = vunpack.i.h.bf16 %v2936_v51  ;;  %v2937_v36 = vunpack.i.l.bf16 %v2936_v51  ;;  %v1592_v3 = vsel %vm1478_vm7, %v6118_v15, %v2873_v8  ;;  %v1591_v25 = vsel %vm1478_vm7, %v6119_v26, %v2872_v37 }
 0x161   : > { %v5207_v50 = vsel %vm1511_vm8, %v1585_v58, %v2937_v36  ;;  %v5210_v33 = vsel %vm1511_vm8, %v1586_v23, %v2938_v49 }
 0x164   : > { %v2866_v46 = vpop.permute.xlu0 %2865  ;;  %v5212_v7 = vpop.permute.xlu1 %2885 }
 0x166   : > { %v2951_v56 = vpop.permute.xlu2 %2950 }
 0x167   : > { %v2953_v55 = vunpack.i.h.bf16 %v2951_v56  ;;  %v2952_v51 = vunpack.i.l.bf16 %v2951_v56 }
 0x169   : > { %v5219_v36 = vsel %vm1511_vm8, %v1591_v25, %v2952_v51  ;;  %v5222_v23 = vsel %vm1511_vm8, %v1592_v3, %v2953_v55  ;;  %v6120_v51 = vld [vmem:[#allocation22_spill] sm:$0xff]  ;;  %v6121_v25 = vld [vmem:[#allocation43_spill] sm:$0xff] }
 0x16a   : > { %v1578_v55 = vsel %vm1478_vm7, %v6120_v51, %v2838_v16 }
 0x16c   : > { %v5224_v58 = vpop.permute.xlu0 %2880  ;;  %v2901_v49 = vpop.permute.xlu1 %2900 }
 0x16d   : > { %v2903_v56 = vunpack.i.h.bf16 %v2901_v49  ;;  %v2902_v20 = vunpack.i.l.bf16 %v2901_v49 }
 0x16e   : > { %v5226_v4 = vpop.permute.xlu2 %2965 }
 0x16f   : > { %v1604_v41 = vsel %vm1478_vm7, %v6121_v25, %v2903_v56  ;;  %v1603_v24 = vsel %vm1478_vm7, %v6122_v43, %v2902_v20 }
 0x174   : > { %v5229_v19 = vpop.permute.xlu0 %2895  ;;  %v5231_v15 = vpop.permute.xlu1 %2915 }
 0x175   : > { %v2918_v8 = vunpack.i.h.bf16 %v5231_v15 }
 0x176   : > { %v2981_v37 = vpop.permute.xlu2 %2980 }
 0x177   : > { %v2983_v3 = vunpack.i.h.bf16 %v2981_v37  ;;  %v2982_v26 = vunpack.i.l.bf16 %v2981_v37  ;;  %v5241_v49 = vsel %vm1511_vm8, %v1578_v55, %v2918_v8  ;;  %v6125_v37 = vpack.i.bf16 %v5053_v63, %v4828_v0  ;;  %v6126_v8 = vld [vmem:[#allocation8_spill] sm:$0xff]  ;;  %v6127_v55 = vld [vmem:[#allocation6_spill] sm:$0xff] }
 0x178   : > { %v2848_v0 = vunpack.i.h.bf16 %v5021_v53  ;;  %v2868_v63 = vunpack.i.h.bf16 %v2866_v46 }
 0x179   : > { %v5244_v48 = vsel %vm1511_vm8, %v1603_v24, %v2982_v26  ;;  %v5247_v13 = vsel %vm1511_vm8, %v1604_v41, %v2983_v3  ;;  %v1584_v24 = vsel %vm1478_vm7, %v6126_v8, %v2853_v32  ;;  %v1583_v41 = vsel %vm1478_vm7, %v6127_v55, %v2852_v59  ;;  %v6129_v59 = vld [vmem:[#allocation19_spill] sm:$0xff] }
 0x17a   : > { %6123 = vst [vmem:[#allocation14_spill] sm:$0xff] %v5244_v48  ;;  %v2867_v26 = vunpack.i.l.bf16 %v2866_v46  ;;  %v6131_v46 = vld [vmem:[#allocation26_spill] sm:$0xff] }
 0x17b   : > { %6124 = vst [vmem:[#allocation88_spill] sm:$0xff] %v5247_v13 }
 0x17c   : > { %v5249_v16 = vpop.permute.xlu0 %2910  ;;  %3075 = vxpose.xlu0.b32.start [1/16] %v6125_v37, 128  ;;  %v2931_v56 = vpop.permute.xlu1 %2930  ;;  %v6128_v37 = vpack.i.bf16 %v5061_v44, %v4831_v35  ;;  %v1589_v42 = vsel %vm1478_vm7, %v6131_v46, %v2867_v26  ;;  %v6133_v26 = vld [vmem:[#allocation30_spill] sm:$0xff] }
 0x17d   : > { %v2933_v51 = vunpack.i.h.bf16 %v2931_v56  ;;  %v2932_v20 = vunpack.i.l.bf16 %v2931_v56 }
 0x17e   : > { %v5254_v43 = vpop.permute.xlu2 %2995 }
 0x17f   : > { %v5261_v3 = vsel %vm1511_vm8, %v1583_v41, %v2932_v20  ;;  %v5264_v31 = vsel %vm1511_vm8, %v1584_v24, %v2933_v51  ;;  %v1582_v20 = vsel %vm1478_vm7, %v6129_v59, %v2848_v0  ;;  %v6130_v24 = vld [vmem:[#allocation27_spill] sm:$0xff]  ;;  %v2862_v0 = vunpack.i.l.bf16 %v5049_v62 }
 0x180   : > { %v1590_v41 = vsel %vm1478_vm7, %v6130_v24, %v2868_v63  ;;  %v6132_v59 = vpack.i.bf16 %v4932_v6, %v5025_v17 }
 0x184   : > { %v5267_v25 = vpop.permute.xlu0 %2925  ;;  %3077 = vxpose.xlu0.b32.cont [2/16] %v6128_v37, 128  ;;  %v2946_v56 = vpop.permute.xlu1 %2945  ;;  %v2863_v37 = vunpack.i.h.bf16 %v5049_v62 }
 0x185   : > { %v2928_v32 = vunpack.i.h.bf16 %v5267_v25  ;;  %v2948_v8 = vunpack.i.h.bf16 %v2946_v56  ;;  %v2947_v55 = vunpack.i.l.bf16 %v2946_v56 }
 0x186   : > { %v5275_v51 = vpop.permute.xlu2 %3010 }
 0x187   : > { %v5282_v14 = vsel %vm1511_vm8, %v1582_v20, %v2928_v32  ;;  %v1621_v35 = vsel %vm1511_vm8, %v1589_v42, %v2947_v55  ;;  %v1622_v44 = vsel %vm1511_vm8, %v1590_v41, %v2948_v8  ;;  %v1588_v32 = vsel %vm1478_vm7, %v6133_v26, %v2863_v37  ;;  %v6134_v20 = vld [vmem:[#allocation29_spill] sm:$0xff] }
 0x188   : > { %v1587_v42 = vsel %vm1478_vm7, %v6134_v20, %v2862_v0  ;;  %v2898_v37 = vunpack.i.h.bf16 %v5229_v19  ;;  %v6137_v20 = vld [vmem:[#allocation47_spill] sm:$0xff] }
 0x18c   : > { %v2941_v56 = vpop.permute.xlu0 %2940  ;;  %3079 = vxpose.xlu0.b32.cont [3/16] %v6132_v59, 128  ;;  %v5291_v13 = vpop.permute.xlu1 %2960  ;;  %v6135_v59 = vpack.i.bf16 %v4935_v2, %v5029_v29  ;;  %v2912_v2 = vunpack.i.l.bf16 %v5249_v16 }
 0x18d   : > { %v2943_v63 = vunpack.i.h.bf16 %v2941_v56  ;;  %v2942_v24 = vunpack.i.l.bf16 %v2941_v56  ;;  %v2897_v56 = vunpack.i.l.bf16 %v5229_v19 }
 0x18e   : > { %v3026_v8 = vpop.permute.xlu2 %3025 }
 0x18f   : > { %v5298_v55 = vsel %vm1511_vm8, %v1588_v32, %v2943_v63  ;;  %v5301_v62 = vsel %vm1511_vm8, %v1587_v42, %v2942_v24  ;;  %v3028_v41 = vunpack.i.h.bf16 %v3026_v8  ;;  %v3027_v6 = vunpack.i.l.bf16 %v3026_v8  ;;  %v6136_v32 = vld [vmem:[#allocation48_spill] sm:$0xff] }
 0x190   : > { %v2913_v8 = vunpack.i.h.bf16 %v5249_v16 }
 0x191   : > { %v5304_v17 = vsel %vm1544_vm11, %v1621_v35, %v3027_v6  ;;  %v5307_v46 = vsel %vm1544_vm11, %v1622_v44, %v3028_v41  ;;  %v1602_v35 = vsel %vm1478_vm7, %v6136_v32, %v2898_v37  ;;  %v1601_v44 = vsel %vm1478_vm7, %v6137_v20, %v2897_v56 }
 0x192   : > { %v6138_v41 = vpack.i.bf16 %v5127_v30, %v5005_v11  ;;  %v1608_v56 = vsel %vm1478_vm7, %v5162_v9, %v2913_v8  ;;  %v2907_v11 = vunpack.i.l.bf16 %v5172_v39 }
 0x194   : > { %v5311_v0 = vpop.permute.xlu0 %2955  ;;  %3081 = vxpose.xlu0.b32.cont [4/16] %v6135_v59, 128  ;;  %v2976_v63 = vpop.permute.xlu1 %2975 }
 0x195   : > { %v2978_v24 = vunpack.i.h.bf16 %v2976_v63  ;;  %v2977_v26 = vunpack.i.l.bf16 %v2976_v63  ;;  %v1607_v63 = vsel %vm1478_vm7, %v5159_v61, %v2912_v2  ;;  %v6140_v61 = vld [vmem:[#allocation62_spill] sm:$0xff]  ;;  %v6141_v2 = vld [vmem:[#allocation61_spill] sm:$0xff] }
 0x196   : > { %v3041_v30 = vpop.permute.xlu2 %3040 }
 0x197   : > { %v5321_v42 = vsel %vm1511_vm8, %v1601_v44, %v2977_v26  ;;  %v5324_v19 = vsel %vm1511_vm8, %v1602_v35, %v2978_v24  ;;  %v2908_v26 = vunpack.i.h.bf16 %v5172_v39  ;;  %v6139_v35 = vpack.i.bf16 %v5131_v5, %v5008_v38 }
 0x198   : > { %v2922_v38 = vunpack.i.l.bf16 %v5192_v57  ;;  %v2883_v5 = vunpack.i.h.bf16 %v5224_v58 }
 0x199   : > { %v1606_v8 = vsel %vm1478_vm7, %v6140_v61, %v2908_v26  ;;  %v2878_v26 = vunpack.i.h.bf16 %v5085_v34  ;;  %v6143_v61 = vld [vmem:[#allocation37_spill] sm:$0xff] }
 0x19c   : > { %v5328_v29 = vpop.permute.xlu0 %2970  ;;  %3083 = vxpose.xlu0.b32.cont [5/16] %v6138_v41, 128  ;;  %v2991_v6 = vpop.permute.xlu1 %2990  ;;  %v1605_v41 = vsel %vm1478_vm7, %v6141_v2, %v2907_v11  ;;  %v6142_v11 = vld [vmem:[#allocation10_spill] sm:$0xff]  ;;  %v6145_v2 = vld [vmem:[#allocation36_spill] sm:$0xff] }
 0x19d   : > { %v2993_v37 = vunpack.i.h.bf16 %v2991_v6  ;;  %v2992_v59 = vunpack.i.l.bf16 %v2991_v6  ;;  %v2842_v6 = vunpack.i.l.bf16 %v5168_v45 }
 0x19f   : > { %v5338_v24 = vsel %vm1511_vm8, %v1607_v63, %v2992_v59  ;;  %v5341_v16 = vsel %vm1511_vm8, %v1608_v56, %v2993_v37  ;;  %v2882_v59 = vunpack.i.l.bf16 %v5224_v58  ;;  %v2963_v56 = vunpack.i.h.bf16 %v5291_v13 }
 0x1a0   : > { %v2962_v63 = vunpack.i.l.bf16 %v5291_v13  ;;  %v1579_v45 = vsel %vm1478_vm7, %v6142_v11, %v2842_v6  ;;  %v1596_v58 = vsel %vm1478_vm7, %v6143_v61, %v2883_v5  ;;  %v6144_v13 = vpack.i.bf16 %v5098_v1, %v4864_v54 }
 0x1a1   : > { %v1611_v57 = vsel %vm1511_vm8, %v1579_v45, %v2922_v38  ;;  %v2917_v6 = vunpack.i.l.bf16 %v5231_v15  ;;  %v1628_v38 = vsel %vm1511_vm8, %v1596_v58, %v2963_v56  ;;  %v3056_v45 = vpop.permute.xlu2 %3055  ;;  %v2957_v58 = vunpack.i.l.bf16 %v5311_v0 }
 0x1a4   : > { %v2986_v32 = vpop.permute.xlu0 %2985  ;;  %3085 = vxpose.xlu0.b32.cont [6/16] %v6139_v35, 128  ;;  %v5348_v44 = vpop.permute.xlu1 %3005  ;;  %v3042_v35 = vunpack.i.l.bf16 %v3041_v30 }
 0x1a5   : > { %v2988_v9 = vunpack.i.h.bf16 %v2986_v32  ;;  %v2987_v20 = vunpack.i.l.bf16 %v2986_v32  ;;  %v3043_v32 = vunpack.i.h.bf16 %v3041_v30 }
 0x1a7   : > { %v5356_v39 = vsel %vm1511_vm8, %v1606_v8, %v2988_v9  ;;  %v5359_v37 = vsel %vm1511_vm8, %v1605_v41, %v2987_v20  ;;  %v2877_v9 = vunpack.i.l.bf16 %v5085_v34  ;;  %v2837_v20 = vunpack.i.l.bf16 %v5190_v12 }
 0x1a8   : > { %v1595_v41 = vsel %vm1478_vm7, %v6145_v2, %v2882_v59  ;;  %v5393_v15 = vsel %vm1544_vm11, %v1628_v38, %v3043_v32  ;;  %v2958_v32 = vunpack.i.h.bf16 %v5311_v0  ;;  %v6147_v2 = vld [vmem:[#allocation21_spill] sm:$0xff] }
 0x1a9   : > { %v1627_v12 = vsel %vm1511_vm8, %v1595_v41, %v2962_v63  ;;  %v1577_v41 = vsel %vm1478_vm7, %v6147_v2, %v2837_v20 }
 0x1aa   : > { %v5386_v54 = vsel %vm1544_vm11, %v1627_v12, %v3042_v35  ;;  %v6149_v12 = vpack.i.bf16 %v5102_v18, %v4867_v52  ;;  %v1609_v0 = vsel %vm1511_vm8, %v1577_v41, %v2917_v6 }
 0x1ac   : > { %v3001_v8 = vpop.permute.xlu0 %3000  ;;  %3087 = vxpose.xlu0.b32.cont [7/16] %v6144_v13, 128  ;;  %v3021_v34 = vpop.permute.xlu1 %3020 }
 0x1ad   : > { %v3003_v30 = vunpack.i.h.bf16 %v3001_v8  ;;  %v3002_v11 = vunpack.i.l.bf16 %v3001_v8  ;;  %v3023_v48 = vunpack.i.h.bf16 %v3021_v34  ;;  %v3022_v5 = vunpack.i.l.bf16 %v3021_v34  ;;  %v6146_v8 = vld [vmem:[#allocation40_spill] sm:$0xff] }
 0x1ae   : > { %v1594_v13 = vsel %vm1478_vm7, %v6146_v8, %v2878_v26  ;;  %v2892_v34 = vunpack.i.l.bf16 %v5120_v47 }
 0x1af   : > { %v5383_v61 = vsel %vm1544_vm11, %v1611_v57, %v3002_v11  ;;  %v5390_v1 = vsel %vm1544_vm11, %v5198_v40, %v3003_v30  ;;  %v5401_v63 = vsel %vm1544_vm11, %v5301_v62, %v3022_v5  ;;  %v5405_v35 = vsel %vm1544_vm11, %v5298_v55, %v3023_v48  ;;  %v6148_v11 = vld [vmem:[#allocation39_spill] sm:$0xff] }
 0x1b0   : > { %v3190_v59 = vpack.i.bf16 %v5383_v61, %v5386_v54  ;;  %v3192_v56 = vpack.i.bf16 %v5390_v1, %v5393_v15  ;;  %v2998_v40 = vunpack.i.h.bf16 %v5254_v43  ;;  %v2997_v57 = vunpack.i.l.bf16 %v5254_v43  ;;  %v6160_v61 = vld [vmem:[#allocation5_spill] sm:$0xff]  ;;  %v6161_v54 = vld [vmem:[#allocation91_spill] sm:$0xff] }
 0x1b1   : > { %v3058_v62 = vunpack.i.h.bf16 %v3056_v45  ;;  %v3057_v30 = vunpack.i.l.bf16 %v3056_v45  ;;  %v1593_v48 = vsel %vm1478_vm7, %v6148_v11, %v2877_v9  ;;  %v2893_v55 = vunpack.i.h.bf16 %v5120_v47  ;;  %v6171_v1 = vld [vmem:[#allocation65_spill] sm:$0xff] }
 0x1b2   : > { %v1641_v20 = vsel %vm1544_vm11, %v1609_v0, %v2997_v57  ;;  %v1642_v45 = vsel %vm1544_vm11, %v5241_v49, %v2998_v40  ;;  %v1626_v9 = vsel %vm1511_vm8, %v1594_v13, %v2958_v32  ;;  %v1625_v47 = vsel %vm1511_vm8, %v1593_v48, %v2957_v58  ;;  %v3071_v40 = vpop.permute.xlu2 %3070  ;;  %v6151_v0 = vld [vmem:[#allocation50_spill] sm:$0xff]  ;;  %v6172_v15 = vld [vmem:[#allocation69_spill] sm:$0xff] }
 0x1b3   : > { %v5434_v18 = vsel %vm1544_vm11, %v5321_v42, %v3057_v30  ;;  %v5442_v49 = vsel %vm1544_vm11, %v5324_v19, %v3058_v62  ;;  %v3013_v58 = vunpack.i.h.bf16 %v5275_v51  ;;  %v2973_v19 = vunpack.i.h.bf16 %v5328_v29 }
 0x1b4   : > { %v3016_v43 = vpop.permute.xlu0 %3015  ;;  %3089 = vxpose.xlu0.b32.cont [8/16] %v6149_v12, 128  ;;  %v3036_v5 = vpop.permute.xlu1 %3035  ;;  %v2972_v62 = vunpack.i.l.bf16 %v5328_v29  ;;  %v3073_v30 = vunpack.i.h.bf16 %v3071_v40  ;;  %v3072_v11 = vunpack.i.l.bf16 %v3071_v40  ;;  %v2847_v48 = vunpack.i.l.bf16 %v5021_v53 }
 0x1b5   : > { %v3018_v26 = vunpack.i.h.bf16 %v3016_v43  ;;  %v3017_v38 = vunpack.i.l.bf16 %v3016_v43  ;;  %v3038_v8 = vunpack.i.h.bf16 %v3036_v5  ;;  %v3037_v2 = vunpack.i.l.bf16 %v3036_v5  ;;  %v6150_v43 = vld [vmem:[#allocation51_spill] sm:$0xff] }
 0x1b6   : > { %v1600_v12 = vsel %vm1478_vm7, %v6150_v43, %v2893_v55  ;;  %v6152_v5 = vpack.i.bf16 %v4968_v21, %v5065_v28  ;;  %v5469_v53 = vsel %vm1544_vm11, %v5264_v31, %v3013_v58  ;;  %v5479_v28 = vsel %vm1544_vm11, %v5338_v24, %v3072_v11  ;;  %v6154_v11 = vld [vmem:[#allocation33_spill] sm:$0xff] }
 0x1b7   : > { %v5430_v52 = vsel %vm1544_vm11, %v5207_v50, %v3017_v38  ;;  %v5438_v6 = vsel %vm1544_vm11, %v5210_v33, %v3018_v26  ;;  %v1657_v57 = vsel %vm1544_vm11, %v1625_v47, %v3037_v2  ;;  %v1658_v32 = vsel %vm1544_vm11, %v1626_v9, %v3038_v8 }
 0x1b8   : > { %v3202_v50 = vpack.i.bf16 %v5430_v52, %v5434_v18  ;;  %v3204_v42 = vpack.i.bf16 %v5438_v6, %v5442_v49  ;;  %v3012_v33 = vunpack.i.l.bf16 %v5275_v51  ;;  %v3186_v13 = vpack.i.bf16 %v1641_v20, %v1657_v57  ;;  %v6187_v52 = vld [vmem:[#allocation70_spill] sm:$0xff]  ;;  %v6190_v6 = vld [vmem:[#allocation75_spill] sm:$0xff] }
 0x1b9   : > { %v3188_v41 = vpack.i.bf16 %v1642_v45, %v1658_v32  ;;  %v1599_v26 = vsel %vm1478_vm7, %v6151_v0, %v2892_v34  ;;  %v2887_v38 = vunpack.i.l.bf16 %v5212_v7  ;;  %v1632_v55 = vsel %vm1511_vm8, %v1600_v12, %v2973_v19  ;;  %v6156_v0 = vld [vmem:[#allocation34_spill] sm:$0xff] }
 0x1ba   : > { %3187 = vxpose.xlu1.b32.start [1/16] %v3186_v13, 128  ;;  %v5465_v9 = vsel %vm1544_vm11, %v5261_v3, %v3012_v33  ;;  %v1631_v34 = vsel %vm1511_vm8, %v1599_v26, %v2972_v62  ;;  %v5487_v31 = vsel %vm1544_vm11, %v5341_v16, %v3073_v30  ;;  %v2888_v24 = vunpack.i.h.bf16 %v5212_v7  ;;  %v6153_v62 = vld [vmem:[#allocation18_spill] sm:$0xff] }
 0x1bb   : > { %v2967_v32 = vunpack.i.l.bf16 %v5226_v4  ;;  %v2968_v16 = vunpack.i.h.bf16 %v5226_v4  ;;  %v2927_v33 = vunpack.i.l.bf16 %v5267_v25  ;;  %v3008_v13 = vunpack.i.h.bf16 %v5348_v44  ;;  %v6188_v18 = vld [vmem:[#allocation74_spill] sm:$0xff] }
 0x1bc   : > { %v3031_v51 = vpop.permute.xlu0 %3030  ;;  %3091 = vxpose.xlu0.b32.cont [9/16] %v6152_v5, 128  ;;  %v3051_v45 = vpop.permute.xlu1 %3050  ;;  %v3007_v19 = vunpack.i.l.bf16 %v5348_v44  ;;  %v1581_v30 = vsel %vm1478_vm7, %v6153_v62, %v2847_v48  ;;  %v1597_v7 = vsel %vm1478_vm7, %v6154_v11, %v2887_v38  ;;  %v6155_v12 = vpack.i.bf16 %v4971_v27, %v5075_v10  ;;  %v6169_v62 = vld [vmem:[#allocation96_spill] sm:$0xff]  ;;  %v6174_v11 = vld [vmem:[#allocation55_spill] sm:$0xff] }
 0x1bd   : > { %v3033_v20 = vunpack.i.h.bf16 %v3031_v51  ;;  %v3032_v29 = vunpack.i.l.bf16 %v3031_v51  ;;  %v3053_v8 = vunpack.i.h.bf16 %v3051_v45  ;;  %v3052_v2 = vunpack.i.l.bf16 %v3051_v45 }
 0x1be   : > { %v1598_v4 = vsel %vm1478_vm7, %v6156_v0, %v2888_v24  ;;  %v1629_v25 = vsel %vm1511_vm8, %v1597_v7, %v2967_v32  ;;  %v1613_v48 = vsel %vm1511_vm8, %v1581_v30, %v2927_v33  ;;  %v1646_v27 = vsel %vm1544_vm11, %v5282_v14, %v3008_v13  ;;  %v6158_v24 = vld [vmem:[#allocation14_spill] sm:$0xff]  ;;  %v6159_v32 = vld [vmem:[#allocation88_spill] sm:$0xff] }
 0x1bf   : > { %v5475_v21 = vsel %vm1544_vm11, %v5219_v36, %v3032_v29  ;;  %v5483_v3 = vsel %vm1544_vm11, %v5222_v23, %v3033_v20  ;;  %v1663_v47 = vsel %vm1544_vm11, %v1631_v34, %v3052_v2  ;;  %v1664_v40 = vsel %vm1544_vm11, %v1632_v55, %v3053_v8  ;;  %v6166_v33 = vld [vmem:[#allocation64_spill] sm:$0xff] }
 0x1c0   : > { %v3214_v36 = vpack.i.bf16 %v5475_v21, %v5479_v28  ;;  %v3216_v57 = vpack.i.bf16 %v5483_v3, %v5487_v31  ;;  %v3198_v23 = vpack.i.bf16 %v5465_v9, %v1663_v47  ;;  %v3200_v58 = vpack.i.bf16 %v5469_v53, %v1664_v40  ;;  %v6167_v13 = vld [vmem:[#allocation68_spill] sm:$0xff] }
 0x1c1   : > { %v1645_v38 = vsel %vm1544_vm11, %v1613_v48, %v3007_v19  ;;  %v6157_v14 = vpack.i.bf16 %v5177_v22, %v5037_v60  ;;  %v6162_v60 = vpack.i.bf16 %v6160_v61, %v6161_v54  ;;  %v6163_v22 = vld [vmem:[#allocation87_spill] sm:$0xff]  ;;  %v3298_v19 = vpack.i.bf16 %v6167_v13, %v6166_v33  ;;  %v6173_v30 = vld [vmem:[#allocation32_spill] sm:$0xff] }
 0x1c2   : > { %3189 = vxpose.xlu1.b32.cont [2/16] %v3188_v41, 128  ;;  %v1630_v41 = vsel %vm1511_vm8, %v1598_v4, %v2968_v16  ;;  %v6175_v7 = vpack.i.bf16 %v6173_v30, %v6174_v11  ;;  %v6178_v4 = vld [vmem:[#allocation92_spill] sm:$0xff] }
 0x1c3   : > { %3299 = vxpose.xlu2.b32.start [1/16] (narrow) %v3298_v19, 32  ;;  %v6199_v31 = vld [vmem:[#allocation76_spill] sm:$0xff] }
 0x1c4   : > { %v3046_v43 = vpop.permute.xlu0 %3045  ;;  %3093 = vxpose.xlu0.b32.cont [10/16] %v6155_v12, 128  ;;  %v3066_v44 = vpop.permute.xlu1 %3065  ;;  %v6177_v12 = vld [vmem:[#allocation80_spill] sm:$0xff] }
 0x1c5   : > { %v3048_v26 = vunpack.i.h.bf16 %v3046_v43  ;;  %v3047_v51 = vunpack.i.l.bf16 %v3046_v43  ;;  %v3068_v5 = vunpack.i.h.bf16 %v3066_v44  ;;  %v3067_v20 = vunpack.i.l.bf16 %v3066_v44  ;;  %v6176_v43 = vld [vmem:[#allocation57_spill] sm:$0xff] }
 0x1c6   : > { %v3302_v0 = vpack.i.bf16 %v6177_v12, %v6176_v43  ;;  %v6205_v43 = vld [vmem:[#allocation72_spill] sm:$0xff] }
 0x1c7   : > { %v1661_v29 = vsel %vm1544_vm11, %v1629_v25, %v3047_v51  ;;  %v1662_v10 = vsel %vm1544_vm11, %v1630_v41, %v3048_v26  ;;  %v1669_v53 = vsel %vm1544_vm11, %v5359_v37, %v3067_v20  ;;  %v1670_v55 = vsel %vm1544_vm11, %v5356_v39, %v3068_v5  ;;  %v6179_v25 = vld [vmem:[#allocation93_spill] sm:$0xff]  ;;  %v6184_v41 = vld [vmem:[#allocation78_spill] sm:$0xff]  ;;  %v6186_v20 = vld [vmem:[#allocation79_spill] sm:$0xff] }
 0x1c8   : > { %v3194_v45 = vpack.i.bf16 %v1645_v38, %v1661_v29  ;;  %v3196_v9 = vpack.i.bf16 %v1646_v27, %v1662_v10  ;;  %v3210_v34 = vpack.i.bf16 %v5304_v17, %v1669_v53  ;;  %v3212_v8 = vpack.i.bf16 %v5307_v46, %v1670_v55  ;;  %v6182_v51 = vld [vmem:[#allocation81_spill] sm:$0xff]  ;;  %v6185_v5 = vld [vmem:[#allocation54_spill] sm:$0xff]  ;;  %v6189_v27 = vld [vmem:[#allocation71_spill] sm:$0xff] }
 0x1c9   : > { %v6180_v26 = vpack.i.bf16 %v6178_v4, %v6179_v25  ;;  %v3308_v38 = vpack.i.bf16 %v6186_v20, %v6185_v5  ;;  %v3312_v49 = vpack.i.bf16 %v6190_v6, %v6189_v27  ;;  %v6191_v10 = vld [vmem:[#allocation66_spill] sm:$0xff]  ;;  %v6193_v55 = vld [vmem:[#allocation67_spill] sm:$0xff]  ;;  %v6206_v25 = vld [vmem:[#allocation56_spill] sm:$0xff] }
 0x1ca   : > { %3191 = vxpose.xlu1.b32.cont [3/16] %v3190_v59, 128  ;;  %v6164_v59 = vld [vmem:[#allocation95_spill] sm:$0xff] }
 0x1cb   : > { %v6165_v16 = vpack.i.bf16 %v6163_v22, %v6164_v59  ;;  %v6201_v22 = vld [vmem:[#allocation77_spill] sm:$0xff]  ;;  %v6202_v59 = vld [vmem:[#allocation11_spill] sm:$0xff] }
 0x1cc   : > { %v3061_v2 = vpop.permute.xlu0 %3060  ;;  %3095 = vxpose.xlu0.b32.cont [11/16] %v6157_v14, 128  ;;  %v6195_v14 = vld [vmem:[#allocation59_spill] sm:$0xff] }
 0x1cd   : > { %v3063_v47 = vunpack.i.h.bf16 %v3061_v2  ;;  %v3062_v40 = vunpack.i.l.bf16 %v3061_v2  ;;  %v6194_v2 = vld [vmem:[#allocation85_spill] sm:$0xff] }
 0x1cf   : > { %v1667_v37 = vsel %vm1544_vm11, %v6158_v24, %v3062_v40  ;;  %v1668_v39 = vsel %vm1544_vm11, %v6159_v32, %v3063_v47  ;;  %v6196_v47 = vld [vmem:[#allocation82_spill] sm:$0xff]  ;;  %v6198_v32 = vld [vmem:[#allocation83_spill] sm:$0xff] }
 0x1d0   : > { %v3206_v17 = vpack.i.bf16 %v5401_v63, %v1667_v37  ;;  %v3208_v46 = vpack.i.bf16 %v5405_v35, %v1668_v39  ;;  %v6168_v63 = vld [vmem:[#allocation7_spill] sm:$0xff]  ;;  %v3318_v40 = vpack.i.bf16 %v6196_v47, %v6195_v14  ;;  %v6197_v37 = vld [vmem:[#allocation60_spill] sm:$0xff] }
 0x1d1   : > { %v6170_v35 = vpack.i.bf16 %v6168_v63, %v6169_v62  ;;  %v3320_v21 = vpack.i.bf16 %v6198_v32, %v6197_v37  ;;  %v6203_v62 = vld [vmem:[#allocation86_spill] sm:$0xff] }
 0x1d2   : > { %3193 = vxpose.xlu1.b32.cont [4/16] %v3192_v56, 128  ;;  %v3300_v56 = vpack.i.bf16 %v6172_v15, %v6171_v1  ;;  %v6204_v1 = vld [vmem:[#allocation89_spill] sm:$0xff] }
 0x1d3   : > { %v865_v15 = vrot.slane %v6204_v1, 2 }
 0x1d4   : > { %3097 = vxpose.xlu0.b32.cont [12/16] %v6162_v60, 128  ;;  %3301 = vxpose.xlu2.b32.cont [2/16] (narrow) %v3300_v56, 32 }
 0x1da   : > { %3195 = vxpose.xlu1.b32.cont [5/16] %v3194_v45, 128  ;;  %v6192_v45 = vld [vmem:[#allocation84_spill] sm:$0xff] }
 0x1dc   : > { %3099 = vxpose.xlu0.b32.cont [13/16] %v6165_v16, 128  ;;  %3303 = vxpose.xlu2.b32.cont [3/16] (narrow) %v3302_v0, 32  ;;  %v3324_v16 = vpack.i.bf16 %v6202_v59, %v6201_v22 }
 0x1e2   : > { %3197 = vxpose.xlu1.b32.cont [6/16] %v3196_v9, 128  ;;  %v3314_v9 = vpack.i.bf16 %v6192_v45, %v6191_v10 }
 0x1e4   : > { %3101 = vxpose.xlu0.b32.cont [14/16] %v6170_v35, 128  ;;  %v866_v35 = vrot.slane %v6203_v62, 2 }
 0x1ea   : > { %3199 = vxpose.xlu1.b32.cont [7/16] %v3198_v23, 128  ;;  %v6181_v23 = vld [vmem:[#allocation58_spill] sm:$0xff] }
 0x1eb   : > { %v3304_v44 = vpack.i.bf16 %v6182_v51, %v6181_v23 }
 0x1ec   : > { %3103 = vxpose.xlu0.b32.cont [15/16] %v6175_v7, 128  ;;  %v867_v7 = vsel %vm731_vm10, %v865_v15, %v866_v35 }
 0x1ed   : > { %3305 = vxpose.xlu2.b32.cont [4/16] (narrow) %v3304_v44, 32  ;;  %v3326_v12 = vpack.i.bf16 %v867_v7, %v6205_v43 }
 0x1f2   : > { %3201 = vxpose.xlu1.b32.cont [8/16] %v3200_v58, 128  ;;  %v6183_v58 = vld [vmem:[#allocation53_spill] sm:$0xff] }
 0x1f3   : > { %v3306_v48 = vpack.i.bf16 %v6184_v41, %v6183_v58  ;;  %v6207_v41 = vld [vmem:[#allocation73_spill] sm:$0xff] }
 0x1f4   : > { %3105 = vxpose.xlu0.b32.end [16/16] %v6180_v26, 128  ;;  %v868_v26 = vrot.slane %v6206_v25, 2 }
 0x1f5   : > { %3307 = vxpose.xlu2.b32.cont [5/16] (narrow) %v3306_v48, 32 }
 0x1f6   : > { %v869_v23 = vsel %vm731_vm10, %v866_v35, %v868_v26 }
 0x1f7   : > { %v3328_v48 = vpack.i.bf16 %v869_v23, %v6207_v41 }
 0x1fa   : > { %3203 = vxpose.xlu1.b32.cont [9/16] %v3202_v50, 128  ;;  %v3310_v50 = vpack.i.bf16 %v6188_v18, %v6187_v52 }
 0x1fd   : > { %3309 = vxpose.xlu2.b32.cont [6/16] (narrow) %v3308_v38, 32 }
 0x202   : > { %3205 = vxpose.xlu1.b32.cont [10/16] %v3204_v42, 128 }
 0x205   : > { %3311 = vxpose.xlu2.b32.cont [7/16] (narrow) %v3310_v50, 32 }
 0x20a   : > { %3207 = vxpose.xlu1.b32.cont [11/16] %v3206_v17, 128 }
 0x20d   : > { %3313 = vxpose.xlu2.b32.cont [8/16] (narrow) %v3312_v49, 32 }
 0x212   : > { %3209 = vxpose.xlu1.b32.cont [12/16] %v3208_v46, 128 }
 0x215   : > { %3315 = vxpose.xlu2.b32.cont [9/16] (narrow) %v3314_v9, 32 }
 0x21a   : > { %3211 = vxpose.xlu1.b32.cont [13/16] %v3210_v34, 128  ;;  %v3316_v34 = vpack.i.bf16 %v6194_v2, %v6193_v55 }
 0x21d   : > { %3317 = vxpose.xlu2.b32.cont [10/16] (narrow) %v3316_v34, 32 }
 0x220   : > { %v3106_v29 = vpop.trf.xlu0 }
 0x221   : > { %v3110_v17 = vunpack.i.h.bf16 %v3106_v29 }
 0x222   : > { %3213 = vxpose.xlu1.b32.cont [14/16] %v3212_v8, 128 }
 0x225   : > { %3319 = vxpose.xlu2.b32.cont [11/16] (narrow) %v3318_v40, 32 }
 0x228   : > { %v3111_v42 = vpop.trf.xlu0 }
 0x229   : > { %v3112_v28 = vunpack.i.l.bf16 %v3111_v42  ;;  %v3115_v39 = vunpack.i.h.bf16 %v3111_v42 }
 0x22a   : > { %3215 = vxpose.xlu1.b32.cont [15/16] %v3214_v36, 128  ;;  %v3107_v36 = vunpack.i.l.bf16 %v3106_v29 }
 0x22b   : > { %v5594_v61 = vpack.c.bf16 %v3115_v39, %v3110_v17 }
 0x22c   : > { %v5592_v46 = vpack.c.bf16 %v3112_v28, %v3107_v36 }
 0x22d   : > { %3321 = vxpose.xlu2.b32.cont [12/16] (narrow) %v3320_v21, 32 }
 0x230   : > { %v3116_v53 = vpop.trf.xlu0 }
 0x231   : > { %v3117_v13 = vunpack.i.l.bf16 %v3116_v53  ;;  %v3120_v63 = vunpack.i.h.bf16 %v3116_v53 }
 0x232   : > { %3217 = vxpose.xlu1.b32.end [16/16] %v3216_v57, 128  ;;  %v6200_v57 = vld [vmem:[#allocation12_spill] sm:$0xff] }
 0x233   : > { %v3322_v54 = vpack.i.bf16 %v6200_v57, %v6199_v31 }
 0x235   : > { %3323 = vxpose.xlu2.b32.cont [13/16] (narrow) %v3322_v54, 32 }
 0x238   : > { %v3121_v8 = vpop.trf.xlu0 }
 0x239   : > { %v3122_v33 = vunpack.i.l.bf16 %v3121_v8  ;;  %v3125_v19 = vunpack.i.h.bf16 %v3121_v8 }
 0x23b   : > { %v5602_v56 = vpack.c.bf16 %v3122_v33, %v3117_v13  ;;  %v5604_v30 = vpack.c.bf16 %v3125_v19, %v3120_v63 }
 0x23d   : > { %3325 = vxpose.xlu2.b32.cont [14/16] (narrow) %v3324_v16, 32 }
 0x240   : > { %v3126_v24 = vpop.trf.xlu0 }
 0x241   : > { %v3127_v44 = vunpack.i.l.bf16 %v3126_v24  ;;  %v3130_v5 = vunpack.i.h.bf16 %v3126_v24 }
 0x245   : > { %3327 = vxpose.xlu2.b32.cont [15/16] (narrow) %v3326_v12, 32 }
 0x248   : > { %v3131_v3 = vpop.trf.xlu0 }
 0x249   : > { %v3132_v51 = vunpack.i.l.bf16 %v3131_v3  ;;  %v3135_v58 = vunpack.i.h.bf16 %v3131_v3 }
 0x24b   : > { %v5613_v20 = vpack.c.bf16 %v3132_v51, %v3127_v44  ;;  %v5615_v38 = vpack.c.bf16 %v3135_v58, %v3130_v5 }
 0x24d   : > { %3329 = vxpose.xlu2.b32.end [16/16] (narrow) %v3328_v48, 32 }
 0x250   : > { %v3136_v60 = vpop.trf.xlu0 }
 0x251   : > { %v3137_v53 = vunpack.i.l.bf16 %v3136_v60  ;;  %v3140_v2 = vunpack.i.h.bf16 %v3136_v60 }
 0x258   : > { %v3141_v11 = vpop.trf.xlu0 }
 0x259   : > { %v3142_v9 = vunpack.i.l.bf16 %v3141_v11  ;;  %v3145_v55 = vunpack.i.h.bf16 %v3141_v11 }
 0x25b   : > { %v5625_v34 = vpack.c.bf16 %v3142_v9, %v3137_v53  ;;  %v5627_v8 = vpack.c.bf16 %v3145_v55, %v3140_v2 }
 0x25e   : > { %v3218_v0 = vpop.trf.xlu1 }
 0x25f   : > { %v3222_v18 = vunpack.i.h.bf16 %v3218_v0  ;;  %v3219_v50 = vunpack.i.l.bf16 %v3218_v0 }
 0x260   : > { %v5608_v4 = vpop.trf.xlu0 }
 0x266   : > { %v3223_v52 = vpop.trf.xlu1 }
 0x267   : > { %v3227_v27 = vunpack.i.h.bf16 %v3223_v52  ;;  %v3224_v6 = vunpack.i.l.bf16 %v3223_v52 }
 0x268   : > { %v5617_v29 = vpop.trf.xlu0 }
 0x269   : > { %v5619_v49 = vpack.c.bf16 %v3227_v27, %v3222_v18  ;;  %v5621_v42 = vpack.c.bf16 %v3224_v6, %v3219_v50 }
 0x26e   : > { %v3228_v10 = vpop.trf.xlu1  ;;  %v5633_v3 = vpop.trf.xlu2 }
 0x26f   : > { %v3232_v47 = vunpack.i.h.bf16 %v3228_v10  ;;  %v3229_v40 = vunpack.i.l.bf16 %v3228_v10 }
 0x270   : > { %v5623_v45 = vpop.trf.xlu0 }
 0x271   : > { %v3157_v52 = vunpack.i.l.bf16 %v5623_v45  ;;  %v3160_v27 = vunpack.i.h.bf16 %v5623_v45  ;;  %v3147_v45 = vunpack.i.l.bf16 %v5608_v4 }
 0x276   : > { %v3233_v14 = vpop.trf.xlu1  ;;  %v5639_v13 = vpop.trf.xlu2 }
 0x277   : > { %v3237_v37 = vunpack.i.h.bf16 %v3233_v14  ;;  %v3234_v32 = vunpack.i.l.bf16 %v3233_v14 }
 0x278   : > { %v3161_v24 = vpop.trf.xlu0 }
 0x279   : > { %v5629_v21 = vpack.c.bf16 %v3237_v37, %v3232_v47  ;;  %v5631_v28 = vpack.c.bf16 %v3234_v32, %v3229_v40  ;;  %v3162_v5 = vunpack.i.l.bf16 %v3161_v24  ;;  %v3165_v18 = vunpack.i.h.bf16 %v3161_v24 }
 0x27a   : > { %v3152_v40 = vunpack.i.l.bf16 %v5617_v29  ;;  %v3336_v24 = vunpack.i.l.bf16 %v5639_v13  ;;  %v3331_v37 = vunpack.i.l.bf16 %v5633_v3  ;;  %v3155_v32 = vunpack.i.h.bf16 %v5617_v29 }
 0x27b   : > { %v1875_v2 = vpack.c.bf16 %v3162_v5, %v3157_v52  ;;  %v1876_v14 = vpack.c.bf16 %v3165_v18, %v3160_v27  ;;  %v2049_v52 = vld [vmem:[%s5868_s4] sm:$0xff] }
 0x27e   : > { %v3238_v36 = vpop.trf.xlu1  ;;  %v3340_v43 = vpop.trf.xlu2 }
 0x27f   : > { %v3242_v54 = vunpack.i.h.bf16 %v3238_v36  ;;  %v3239_v22 = vunpack.i.l.bf16 %v3238_v36  ;;  %v3341_v55 = vunpack.i.l.bf16 %v3340_v43  ;;  %v3150_v36 = vunpack.i.h.bf16 %v5608_v4 }
 0x280   : > { %v3166_v39 = vpop.trf.xlu0  ;;  %v3344_v29 = vunpack.i.h.bf16 %v3340_v43 }
 0x281   : > { %v3167_v63 = vunpack.i.l.bf16 %v3166_v39  ;;  %v3170_v62 = vunpack.i.h.bf16 %v3166_v39 }
 0x286   : > { %v3243_v17 = vpop.trf.xlu1  ;;  %v3345_v53 = vpop.trf.xlu2 }
 0x287   : > { %v3247_v57 = vunpack.i.h.bf16 %v3243_v17  ;;  %v3244_v60 = vunpack.i.l.bf16 %v3243_v17  ;;  %v3346_v47 = vunpack.i.l.bf16 %v3345_v53  ;;  %v1897_v17 = vpack.c.bf16 %v3336_v24, %v3331_v37 }
 0x288   : > { %v3171_v31 = vpop.trf.xlu0  ;;  %v3349_v4 = vunpack.i.h.bf16 %v3345_v53 }
 0x289   : > { %v5635_v59 = vpack.c.bf16 %v3247_v57, %v3242_v54  ;;  %v5637_v16 = vpack.c.bf16 %v3244_v60, %v3239_v22  ;;  %v3172_v11 = vunpack.i.l.bf16 %v3171_v31  ;;  %v3175_v7 = vunpack.i.h.bf16 %v3171_v31 }
 0x28a   : > { %v1899_v39 = vpack.c.bf16 %v3346_v47, %v3341_v55  ;;  %v1873_v31 = vpack.c.bf16 %v3152_v40, %v3147_v45  ;;  %v1874_v57 = vpack.c.bf16 %v3155_v32, %v3150_v36  ;;  %v1900_v22 = vpack.c.bf16 %v3349_v4, %v3344_v29  ;;  %v2051_v47 = vld [vmem:[%s5868_s4 + $0x10] sm:$0xff]  ;;  %v2050_v32 = vld [vmem:[%s5868_s4 + $0x8] sm:$0xff]  ;;  %v3474_v4 = vld [vmem:[%s3670_s9 + $0x40] sm:$0x3] }
 0x28b   : > { %v1877_v48 = vpack.c.bf16 %v3172_v11, %v3167_v63  ;;  %v1878_v50 = vpack.c.bf16 %v3175_v7, %v3170_v62  ;;  %v2510_v36 = vld [vmem:[%s5865_s1 + $0xc] sm:$0xf0]  ;;  %v2184_v29 = vrot.slane %v3474_v4, 1 }
 0x28c   : > { %1969 = vmatpush.bf16.msra.mxu2 %v1899_v39  ;;  %v3471_v39 = vld [vmem:[%s3670_s9 + $0x28] sm:$0x3] }
 0x28e   : > { %v3248_v33 = vpop.trf.xlu1 }
 0x28f   : > { %v3252_v26 = vunpack.i.h.bf16 %v3248_v33  ;;  %v3249_v23 = vunpack.i.l.bf16 %v3248_v33  ;;  %v3339_v33 = vunpack.i.h.bf16 %v5639_v13 }
 0x290   : > { %v3176_v19 = vpop.trf.xlu0  ;;  %1970 = vmatpush.bf16.msra.mxu2 %v1897_v17  ;;  %v2179_v17 = vrot.slane %v3471_v39, 1 }
 0x291   : > { %v3177_v35 = vunpack.i.l.bf16 %v3176_v19  ;;  %v3180_v1 = vunpack.i.h.bf16 %v3176_v19  ;;  %v3334_v19 = vunpack.i.h.bf16 %v5633_v3 }
 0x296   : > { %v3253_v15 = vpop.trf.xlu1 }
 0x297   : > { %v3257_v58 = vunpack.i.h.bf16 %v3253_v15  ;;  %v3254_v41 = vunpack.i.l.bf16 %v3253_v15 }
 0x298   : > { %v3181_v12 = vpop.trf.xlu0 }
 0x299   : > { %v3182_v0 = vunpack.i.l.bf16 %v3181_v12  ;;  %v3185_v25 = vunpack.i.h.bf16 %v3181_v12  ;;  %v5643_v6 = vpack.c.bf16 %v3257_v58, %v3252_v26  ;;  %v5645_v10 = vpack.c.bf16 %v3254_v41, %v3249_v23  ;;  %v1906_v26 = vld [vmem:[%s5866_s2 + $0x8] sm:$0xff] }
 0x29b   : > { %v1879_v51 = vpack.c.bf16 %v3182_v0, %v3177_v35  ;;  %v1880_v44 = vpack.c.bf16 %v3185_v25, %v3180_v1  ;;  %v1905_v25 = vld [vmem:[%s5866_s2] sm:$0xff] }
 0x29d   : > { %1935 = vmatpush.bf16.msra.mxu0 %v1879_v51  ;;  %1977 = vmatpush.bf16.msra.mxu3 %v1880_v44  ;;  %v3584_v44 = vmov 0  }
 0x29e   : > { %v5647_v9 = vpop.trf.xlu1  ;;  %3350 = vset.pattern.permute.xlu0 %v3584_v44  ;;  %3352 = vset.pattern.permute.xlu1 %v3584_v44 }
 0x29f   : > { %1909 = vperm.xlu0 %3350, %v1905_v25   ;;  %2055 = vperm.xlu1 %3352, %v2049_v52   ;;  %v3262_v40 = vunpack.i.h.bf16 %v5647_v9  ;;  %v3259_v24 = vunpack.i.l.bf16 %v5647_v9  ;;  %v2541_v9 = vld [vmem:[%s5865_s1 + $0x4] sm:$0xf] }
 0x2a1   : > { %1936 = vmatpush.bf16.msra.mxu0 %v1877_v48  ;;  %1978 = vmatpush.bf16.msra.mxu3 %v1878_v50 }
 0x2a5   : > { %1937 = vmatpush.bf16.msra.mxu0 %v1875_v2  ;;  %1979 = vmatpush.bf16.msra.mxu3 %v1876_v14  ;;  %v2052_v14 = vld [vmem:[%s5868_s4 + $0x18] sm:$0xff] }
 0x2a6   : > { %v5655_v54 = vpop.trf.xlu1 }
 0x2a7   : > { %v3267_v55 = vunpack.i.h.bf16 %v5655_v54  ;;  %v3264_v2 = vunpack.i.l.bf16 %v5655_v54  ;;  %2070 = vperm.xlu0 %3350, %v2052_v14   ;;  %2060 = vperm.xlu1 %3352, %v2050_v32  }
 0x2a9   : > { %1938 = vmatpush.bf16.msra.mxu0 %v1873_v31  ;;  %1980 = vmatpush.bf16.msra.mxu3 %v1874_v57  ;;  %v1889_v37 = vpack.c.bf16 %v3267_v55, %v3262_v40  ;;  %v1890_v45 = vpack.c.bf16 %v3264_v2, %v3259_v24  ;;  %v3473_v57 = vld [vmem:[%s3670_s9 + $0x38] sm:$0xff] }
 0x2aa   : > { %v2182_v54 = vrot.slane %v3473_v57, 1 }
 0x2ad   : > { %1939 = vmatpush.bf16.msra.mxu0 %v5625_v34  ;;  %1981 = vmatpush.bf16.msra.mxu3 %v5627_v8 }
 0x2ae   : > { %v3268_v60 = vpop.trf.xlu1 }
 0x2af   : > { %3351 = vset.pattern.permute.xlu2 %v3584_v44  ;;  %v3272_v18 = vunpack.i.h.bf16 %v3268_v60  ;;  %v3269_v50 = vunpack.i.l.bf16 %v3268_v60 }
 0x2b1   : > { %1940 = vmatpush.bf16.msra.mxu0 %v5613_v20  ;;  %1982 = vmatpush.bf16.msra.mxu3 %v5615_v38  ;;  %v1898_v20 = vpack.c.bf16 %v3339_v33, %v3334_v19  ;;  %v2185_v33 = vsel %vm650_vm3, %v2182_v54, %v2184_v29 }
 0x2b5   : > { %1941 = vmatpush.bf16.msra.mxu0 %v5602_v56  ;;  %1983 = vmatpush.bf16.msra.mxu3 %v5604_v30  ;;  %v2516_v56 = vld [vmem:[%s5865_s1 + $0x8] sm:$0xf]  ;;  %v2543_v30 = vld [vmem:[%s5865_s1 + $0x10] sm:$0xf0] }
 0x2b6   : > { %v3273_v63 = vpop.trf.xlu1  ;;  %v2517_v34 = vor.u32 %v2543_v30, %v2516_v56  ;;  %1914 = vperm.xlu2 %3351, %v1906_v26   ;;  %v3477_v30 = vld [vmem:[%s3670_s9 + $0xd8] sm:$0xff] }
 0x2b7   : > { %v3277_v48 = vunpack.i.h.bf16 %v3273_v63  ;;  %v3274_v5 = vunpack.i.l.bf16 %v3273_v63  ;;  %v3475_v63 = vld [vmem:[%s3670_s9 + $0x48] sm:$0xff] }
 0x2b8   : > { %2518 = vmatmul.msk.bf16.vlgmr.msra.gmra.mxu2 %vm1478_vm7, %v2517_v34 }
 0x2b9   : > { %1942 = vmatpush.bf16.msra.mxu0 %v5592_v46  ;;  %1984 = vmatpush.bf16.msra.mxu3 %v5594_v61  ;;  %v2508_v46 = vld [vmem:[%s5865_s1] sm:$0xf]  ;;  %v2542_v61 = vld [vmem:[%s5865_s1 + $0x8] sm:$0xf0]  ;;  %v1891_v27 = vpack.c.bf16 %v3277_v48, %v3272_v18  ;;  %v1892_v53 = vpack.c.bf16 %v3274_v5, %v3269_v50  ;;  %v3482_v48 = vld [vmem:[%s3670_s9 + $0xf8] sm:$0xff] }
 0x2ba   : > { %v2509_v3 = vor.u32 %v2542_v61, %v2508_v46  ;;  %v2222_v5 = vrot.slane %v3482_v48, 1  ;;  %v3483_v50 = vld [vmem:[%s3670_s9 + $0x60] sm:$0xff] }
 0x2bc   : > { %1943 = vmatmul.bf16.vlgmr.msra.gmra.mxu0 %v2509_v3  ;;  %1985 = vmatmul.bf16.vlgmr.msra.gmra.mxu3 %v2509_v3 }
 0x2bd   : > { %2011 = vmatpush.bf16.msrb.mxu0 %v1900_v22 }
 0x2be   : > { %v3278_v38 = vpop.trf.xlu1  ;;  %2065 = vperm.xlu2 %3351, %v2051_v47  }
 0x2bf   : > { %v3282_v23 = vunpack.i.h.bf16 %v3278_v38  ;;  %v3279_v51 = vunpack.i.l.bf16 %v3278_v38  ;;  %v3476_v38 = vld [vmem:[%s3670_s9 + $0x50] sm:$0xff] }
 0x2c0   : > { %v2187_v56 = vrot.slane %v3476_v38, 1  ;;  %v3488_v38 = vld [vmem:[%s3670_s9 + $0x110] sm:$0xff] }
 0x2c1   : > { %2012 = vmatpush.bf16.msrb.mxu0 %v1898_v20  ;;  %v2186_v20 = vrot.slane %v3475_v63, 1  ;;  %v3487_v63 = vld [vmem:[%s3670_s9 + $0x108] sm:$0xff] }
 0x2c3   : > { %v2188_v61 = vsel %vm650_vm3, %v2186_v20, %v2187_v56  ;;  %v2226_v20 = vrot.slane %v3487_v63, 1  ;;  %v3505_v63 = vld [vmem:[%s3670_s9 + $0x150] sm:$0xff] }
 0x2c6   : > { %v3283_v8 = vpop.trf.xlu1 }
 0x2c7   : > { %v3287_v12 = vunpack.i.h.bf16 %v3283_v8  ;;  %v3284_v0 = vunpack.i.l.bf16 %v3283_v8  ;;  %v3478_v8 = vld [vmem:[%s3670_s9 + $0xe0] sm:$0xff] }
 0x2c8   : > { %v2217_v46 = vrot.slane %v3478_v8, 1 }
 0x2c9   : > { %v1893_v58 = vpack.c.bf16 %v3287_v12, %v3282_v23  ;;  %v1894_v41 = vpack.c.bf16 %v3284_v0, %v3279_v51 }
 0x2cc   : > { %2519 = vmatmul.msk.bf16.vlgmr.msrb.gmra.mxu0 %vm1478_vm7, %v2517_v34  ;;  %v2216_v34 = vrot.slane %v3477_v30, 1 }
 0x2ce   : > { %v3288_v13 = vpop.trf.xlu1  ;;  %v2218_v3 = vsel %vm650_vm3, %v2216_v34, %v2217_v46  ;;  %v3489_v34 = vld [vmem:[%s3670_s9 + $0x78] sm:$0xff] }
 0x2cf   : > { %v3292_v35 = vunpack.i.h.bf16 %v3288_v13  ;;  %v3289_v1 = vunpack.i.l.bf16 %v3288_v13  ;;  %v3479_v13 = vld [vmem:[%s3670_s9 + $0xe8] sm:$0x3]  ;;  %v2196_v8 = vrot.slane %v3489_v34, 1 }
 0x2d6   : > { %v3293_v62 = vpop.trf.xlu1 }
 0x2d7   : > { %v3297_v15 = vunpack.i.h.bf16 %v3293_v62  ;;  %v3294_v11 = vunpack.i.l.bf16 %v3293_v62  ;;  %v2219_v62 = vrot.slane %v3479_v13, 1 }
 0x2d9   : > { %v1895_v7 = vpack.c.bf16 %v3297_v15, %v3292_v35  ;;  %v1896_v43 = vpack.c.bf16 %v3294_v11, %v3289_v1  ;;  %v3480_v15 = vld [vmem:[%s3670_s9 + $0x58] sm:$0x3]  ;;  %v2220_v12 = vsel %vm650_vm3, %v2217_v46, %v2219_v62  ;;  %v3490_v46 = vld [vmem:[%s3670_s9 + $0x80] sm:$0xff] }
 0x2da   : > { %v2189_v11 = vrot.slane %v3480_v15, 1 }
 0x2db   : > { %1949 = vmatpush.bf16.msra.mxu1 %v1895_v7  ;;  %1991 = vmatpush.bf16.msrb.mxu2 %v1896_v43 }
 0x2dc   : > { %v2190_v23 = vsel %vm650_vm3, %v2187_v56, %v2189_v11  ;;  %v2227_v56 = vrot.slane %v3488_v38, 1  ;;  %v3506_v38 = vld [vmem:[%s3670_s9 + $0x158] sm:$0xff] }
 0x2de   : > { %v2228_v62 = vsel %vm650_vm3, %v2226_v20, %v2227_v56  ;;  %v2241_v20 = vrot.slane %v3505_v63, 1 }
 0x2df   : > { %1950 = vmatpush.bf16.msra.mxu1 %v1893_v58  ;;  %1992 = vmatpush.bf16.msrb.mxu2 %v1894_v41  ;;  %v3481_v58 = vld [vmem:[%s3670_s9 + $0xf0] sm:$0xff] }
 0x2e0   : > { %v2221_v41 = vrot.slane %v3481_v58, 1 }
 0x2e2   : > { %v2223_v24 = vsel %vm650_vm3, %v2221_v41, %v2222_v5 }
 0x2e3   : > { %1951 = vmatpush.bf16.msra.mxu1 %v1891_v27  ;;  %1993 = vmatpush.bf16.msrb.mxu2 %v1892_v53  ;;  %v2191_v27 = vrot.slane %v3483_v50, 1  ;;  %v3484_v53 = vld [vmem:[%s3670_s9 + $0x68] sm:$0xff] }
 0x2e4   : > { %2320 = vxpose.xlu2.b32.start [1/16] (narrow) %v2218_v3, 32  ;;  %v2192_v55 = vrot.slane %v3484_v53, 1 }
 0x2e7   : > { %1952 = vmatpush.bf16.msra.mxu1 %v1889_v37  ;;  %1994 = vmatpush.bf16.msrb.mxu2 %v1890_v45 }
 0x2eb   : > { %1953 = vmatpush.bf16.msra.mxu1 %v5643_v6  ;;  %1995 = vmatpush.bf16.msrb.mxu2 %v5645_v10  ;;  %v2513_v6 = vor.u32 %v2541_v9, %v2510_v36  ;;  %v2193_v36 = vsel %vm650_vm3, %v2191_v27, %v2192_v55  ;;  %v3493_v27 = vld [vmem:[%s3670_s9 + $0x120] sm:$0xff] }
 0x2ec   : > { %2321 = vxpose.xlu2.b32.cont [2/16] (narrow) %v2220_v12, 32  ;;  %v3491_v12 = vld [vmem:[%s3670_s9 + $0x118] sm:$0x3]  ;;  %v2231_v53 = vrot.slane %v3493_v27, 1 }
 0x2ef   : > { %1954 = vmatpush.bf16.msra.mxu1 %v5635_v59  ;;  %1996 = vmatpush.bf16.msrb.mxu2 %v5637_v16  ;;  %v3470_v59 = vld [vmem:[%s3670_s9 + $0x20] sm:$0xff] }
 0x2f0   : > { %v2177_v16 = vrot.slane %v3470_v59, 1  ;;  %v3485_v59 = vld [vmem:[%s3670_s9 + $0x100] sm:$0x3] }
 0x2f2   : > { %v2180_v31 = vsel %vm650_vm3, %v2177_v16, %v2179_v17  ;;  %v3486_v17 = vld [vmem:[%s3670_s9 + $0x70] sm:$0x3] }
 0x2f3   : > { %1955 = vmatpush.bf16.msra.mxu1 %v5629_v21  ;;  %1997 = vmatpush.bf16.msrb.mxu2 %v5631_v28  ;;  %v3469_v21 = vld [vmem:[%s3670_s9 + $0x18] sm:$0xff] }
 0x2f4   : > { %v2176_v28 = vrot.slane %v3469_v21, 1  ;;  %2322 = vxpose.xlu2.b32.cont [3/16] (narrow) %v2223_v24, 32 }
 0x2f6   : > { %v2178_v10 = vsel %vm650_vm3, %v2176_v28, %v2177_v16  ;;  %v2224_v16 = vrot.slane %v3485_v59, 1  ;;  %v3499_v59 = vld [vmem:[%s3670_s9 + $0x138] sm:$0xff] }
 0x2f7   : > { %1956 = vmatpush.bf16.msra.mxu1 %v5619_v49  ;;  %1998 = vmatpush.bf16.msrb.mxu2 %v5621_v42  ;;  %v3472_v49 = vld [vmem:[%s3670_s9 + $0x30] sm:$0xff] }
 0x2f8   : > { %2288 = vxpose.xlu1.b32.start [1/16] (narrow) %v2178_v10, 32  ;;  %v2181_v42 = vrot.slane %v3472_v49, 1 }
 0x2fa   : > { %1957 = vmatmul.bf16.vlgmr.msra.gmra.mxu1 %v2513_v6  ;;  %1999 = vmatmul.bf16.vlgmr.msrb.gmra.mxu2 %v2513_v6  ;;  %v2183_v60 = vsel %vm650_vm3, %v2181_v42, %v2182_v54 }
 0x300   : > { %2289 = vxpose.xlu1.b32.cont [2/16] (narrow) %v2180_v31, 32  ;;  %v2194_v31 = vrot.slane %v3486_v17, 1  ;;  %v3501_v17 = vld [vmem:[%s3670_s9 + $0xa8] sm:$0xff] }
 0x308   : > { %2290 = vxpose.xlu1.b32.cont [3/16] (narrow) %v2183_v60, 32  ;;  %v2225_v60 = vsel %vm650_vm3, %v2222_v5, %v2224_v16  ;;  %v2236_v16 = vrot.slane %v3499_v59, 1 }
 0x309   : > { %2323 = vxpose.xlu2.b32.cont [4/16] (narrow) %v2225_v60, 32  ;;  %v3503_v60 = vld [vmem:[%s3670_s9 + $0x148] sm:$0x3] }
 0x310   : > { %2291 = vxpose.xlu1.b32.cont [4/16] (narrow) %v2185_v33, 32  ;;  %v1915_v52 = vpop.permute.xlu2 %1914 }
 0x311   : > { %v1910_v35 = vpop.permute.xlu0 %1909  ;;  %2324 = vxpose.xlu2.b32.cont [5/16] (narrow) %v2228_v62, 32  ;;  %v2056_v27 = vpop.permute.xlu1 %2055 }
 0x318   : > { %2292 = vxpose.xlu1.b32.cont [5/16] (narrow) %v2188_v61, 32  ;;  %v2197_v61 = vrot.slane %v3490_v46, 1 }
 0x31a   : > { %v2198_v15 = vsel %vm650_vm3, %v2196_v8, %v2197_v61  ;;  %v3508_v8 = vld [vmem:[%s3670_s9 + $0xc8] sm:$0xff] }
 0x31b   : > { %v2212_v46 = vrot.slane %v3508_v8, 1 }
 0x320   : > { %2293 = vxpose.xlu1.b32.cont [6/16] (narrow) %v2190_v23, 32 }
 0x328   : > { %2294 = vxpose.xlu1.b32.cont [7/16] (narrow) %v2193_v36, 32  ;;  %v3498_v36 = vld [vmem:[%s3670_s9 + $0xa0] sm:$0x3] }
 0x339   : > { %v1944_v22 = vpop.f32.mrf.mxu0 }
 0x33a   : > { %v1945_v43 = vadd.f32 %v1944_v22, %v1910_v35  ;;  %v2195_v22 = vsel %vm650_vm3, %v2192_v55, %v2194_v31  ;;  %v3494_v55 = vld [vmem:[%s3670_s9 + $0x128] sm:$0xff]  ;;  %v2206_v31 = vrot.slane %v3501_v17, 1 }
 0x33b   : > { %v1972_v19 = vpop.f32.mrf.mxu2  ;;  %2295 = vxpose.xlu1.b32.cont [8/16] (narrow) %v2195_v22, 32 }
 0x33f   : > { %v1986_v0 = vpop.f32.mrf.mxu3 }
 0x340   : > { %v1987_v51 = vadd.f32 %v1986_v0, %v1910_v35  ;;  %v2229_v0 = vrot.slane %v3491_v12, 1  ;;  %v3512_v12 = vld [vmem:[%s3670_s9 + $0x170] sm:$0xff] }
 0x341   : > { %v1946_v1 = vpop.f32.mrf.mxu0 }
 0x342   : > { %v1947_v47 = vadd.f32 %v1946_v1, %v1915_v52  ;;  %v2230_v48 = vsel %vm650_vm3, %v2227_v56, %v2229_v0  ;;  %v2242_v56 = vrot.slane %v3506_v38, 1  ;;  %v2247_v0 = vrot.slane %v3512_v12, 1 }
 0x343   : > { %v1974_v7 = vpop.f32.mrf.mxu2  ;;  %2296 = vxpose.xlu1.b32.cont [9/16] (narrow) %v2198_v15, 32  ;;  %2325 = vxpose.xlu2.b32.cont [6/16] (narrow) %v2230_v48, 32 }
 0x347   : > { %v1988_v6 = vpop.f32.mrf.mxu3 }
 0x348   : > { %v1989_v10 = vadd.f32 %v1988_v6, %v1915_v52  ;;  %v2204_v6 = vrot.slane %v3498_v36, 1 }
 0x349   : > { %v2014_v2 = vpop.f32.mrf.mxu0 }
 0x351   : > { %v2016_v4 = vpop.f32.mrf.mxu0 }
 0x377   : > { %v1958_v25 = vpop.f32.mrf.mxu1 }
 0x378   : > { %v1959_v26 = vadd.f32 %v1958_v25, %v1945_v43  ;;  %v2544_v25 = vld [vmem:[%s5867_s3] sm:$0xff] }
 0x37a   : > { %v5737_v44 = vadd.f32 %v1972_v19, %v1959_v26  ;;  %v2545_v26 = vld [vmem:[%s5867_s3 + $0x8] sm:$0xff] }
 0x37c   : > { %v2023_v18 = vmin.f32 %v5737_v44, 0.0  ;;  %vm2019_vm10 = vcmp.gt.f32.partialorder %v5737_v44, 0.0 }
 0x37d   : > { %v2000_v14 = vpop.f32.mrf.mxu2 }
 0x37e   : > { %v2001_v40 = vadd.f32 %v2000_v14, %v1987_v51  ;;  %v2027_v45 = vmul.f32 1.442695, %v2023_v18  ;;  %v3495_v14 = vld [vmem:[%s3670_s9 + $0x90] sm:$0xff] }
 0x37f   : > { %v1960_v37 = vpop.f32.mrf.mxu1 }
 0x380   : > { %v5745_v32 = vadd.f32 %v2014_v2, %v2001_v40  ;;  %v1961_v9 = vadd.f32 %v1960_v37, %v1947_v47  ;;  %3461 = vpow2.f32 %v2027_v45  ;;  %v2232_v2 = vrot.slane %v3494_v55, 1  ;;  %v3496_v40 = vld [vmem:[%s3670_s9 + $0x98] sm:$0xff] }
 0x381   : > { %v2201_v47 = vrot.slane %v3495_v14, 1  ;;  %v2202_v24 = vrot.slane %v3496_v40, 1  ;;  %v2066_v14 = vpop.permute.xlu2 %2065 }
 0x382   : > { %v2024_v21 = vmin.f32 %v5745_v32, 0.0  ;;  %v1975_v28 = vadd.f32 %v1974_v7, %v1961_v9  ;;  %vm2020_vm1 = vcmp.gt.f32.partialorder %v5745_v32, 0.0  ;;  %v2233_v37 = vsel %vm650_vm3, %v2231_v53, %v2232_v2  ;;  %v2061_v53 = vpop.permute.xlu1 %2060 }
 0x383   : > { %v2203_v45 = vsel %vm650_vm3, %v2201_v47, %v2202_v24  ;;  %2326 = vxpose.xlu2.b32.cont [7/16] (narrow) %v2233_v37, 32 }
 0x384   : > { %v2025_v39 = vmin.f32 %v1975_v28, 0.0  ;;  %v2029_v42 = vmul.f32 1.442695, %v2024_v21  ;;  %vm2021_vm15 = vcmp.gt.f32.partialorder %v1975_v28, 0.0 }
 0x385   : > { %v2002_v49 = vpop.f32.mrf.mxu2 }
 0x386   : > { %v2031_v57 = vmul.f32 1.442695, %v2025_v39  ;;  %v2003_v54 = vadd.f32 %v2002_v49, %v1989_v10  ;;  %v3462_v33 = vpop.eup %3461  ;;  %v3500_v10 = vld [vmem:[%s3670_s9 + $0x140] sm:$0xff]  ;;  %v3502_v49 = vld [vmem:[%s3670_s9 + $0xb0] sm:$0xff] }
 0x387   : > { %v2520_v3 = vadd.f32 -1.0, %v3462_v33  ;;  %v2237_v39 = vrot.slane %v3500_v10, 1 }
 0x388   : > { %3463 = vpow2.f32 %v2031_v57  ;;  %v2017_v29 = vadd.f32 %v2016_v4, %v2003_v54  ;;  %v2239_v4 = vrot.slane %v3503_v60, 1 }
 0x389   : > { %3465 = vpow2.f32 %v2029_v42  ;;  %v2039_v11 = vsel %vm2019_vm10, %v5737_v44, %v2520_v3  ;;  %v3492_v44 = vld [vmem:[%s3670_s9 + $0x88] sm:$0x3]  ;;  %v2207_v42 = vrot.slane %v3502_v49, 1  ;;  %v2238_v57 = vsel %vm650_vm3, %v2236_v16, %v2237_v39  ;;  %v2071_v16 = vpop.permute.xlu0 %2070 }
 0x38a   : > { %v2026_v19 = vmin.f32 %v2017_v29, 0.0  ;;  %v2199_v58 = vrot.slane %v3492_v44, 1  ;;  %vm2022_vm2 = vcmp.gt.f32.partialorder %v2017_v29, 0.0  ;;  %v2240_v33 = vsel %vm650_vm3, %v2237_v39, %v2239_v4  ;;  %v3514_v44 = vld [vmem:[%s3670_s9 + $0x180] sm:$0xff] }
 0x38b   : > { %v2208_v54 = vsel %vm650_vm3, %v2206_v31, %v2207_v42 }
 0x38c   : > { %v2033_v30 = vmul.f32 1.442695, %v2026_v19  ;;  %v2200_v50 = vsel %vm650_vm3, %v2197_v61, %v2199_v58  ;;  %v2243_v61 = vsel %vm650_vm3, %v2241_v20, %v2242_v56  ;;  %v2251_v58 = vrot.slane %v3514_v44, 1 }
 0x38d   : > { %2297 = vxpose.xlu1.b32.cont [10/16] (narrow) %v2200_v50, 32 }
 0x38e   : > { %v3464_v13 = vpop.eup %3463  ;;  %3467 = vpow2.f32 %v2033_v30  ;;  %v3507_v30 = vld [vmem:[%s3670_s9 + $0xc0] sm:$0xff] }
 0x38f   : > { %v2522_v35 = vadd.f32 -1.0, %v3464_v13  ;;  %v3466_v1 = vpop.eup %3465  ;;  %v2211_v34 = vrot.slane %v3507_v30, 1  ;;  %v3509_v13 = vld [vmem:[%s3670_s9 + $0x160] sm:$0x3] }
 0x390   : > { %v2521_v23 = vadd.f32 -1.0, %v3466_v1  ;;  %v2244_v62 = vrot.slane %v3509_v13, 1 }
 0x391   : > { %v2041_v7 = vsel %vm2021_vm15, %v1975_v28, %v2522_v35  ;;  %v2205_v28 = vsel %vm650_vm3, %v2202_v24, %v2204_v6  ;;  %v2213_v3 = vsel %vm650_vm3, %v2211_v34, %v2212_v46  ;;  %v3510_v35 = vld [vmem:[%s3670_s9 + $0xd0] sm:$0x3] }
 0x392   : > { %v2047_v43 = vpack.c.bf16 %v2041_v7, %v2039_v11  ;;  %v2040_v5 = vsel %vm2020_vm1, %v5745_v32, %v2521_v23  ;;  %v3497_v32 = vld [vmem:[%s3670_s9 + $0x130] sm:$0x3]  ;;  %v2214_v1 = vrot.slane %v3510_v35, 1  ;;  %v2245_v15 = vsel %vm650_vm3, %v2242_v56, %v2244_v62  ;;  %v3511_v7 = vld [vmem:[%s3670_s9 + $0x168] sm:$0xff] }
 0x393   : > { %v2234_v9 = vrot.slane %v3497_v32, 1 }
 0x394   : > { %v3468_v51 = vpop.eup %3467  ;;  %2097 = vmatpush.bf16.msrb.mxu1 %v2047_v43  ;;  %2547 = vmatpush.bf16.msra.mxu2 %v2047_v43  ;;  %v2215_v11 = vsel %vm650_vm3, %v2212_v46, %v2214_v1  ;;  %v2246_v43 = vrot.slane %v3511_v7, 1 }
 0x395   : > { %v2523_v41 = vadd.f32 -1.0, %v3468_v51  ;;  %2298 = vxpose.xlu1.b32.cont [11/16] (narrow) %v2203_v45, 32  ;;  %v2235_v21 = vsel %vm650_vm3, %v2232_v2, %v2234_v9 }
 0x396   : > { %2327 = vxpose.xlu2.b32.cont [8/16] (narrow) %v2235_v21, 32 }
 0x397   : > { %2532 = vmatmul.msk.bf16.vlgmr.msrb.gmra.mxu1 %vm2083_vm0, %v2544_v25  ;;  %2533 = vmatmul.msk.bf16.vlgmr.msra.gmra.mxu2 %vm2083_vm0, %v2545_v26  ;;  %v2042_v52 = vsel %vm2022_vm2, %v2017_v29, %v2523_v41  ;;  %v3504_v29 = vld [vmem:[%s3670_s9 + $0xb8] sm:$0x3]  ;;  %v3515_v41 = vld [vmem:[%s3670_s9 + $0x188] sm:$0xff] }
 0x398   : > { %v2048_v18 = vpack.c.bf16 %v2042_v52, %v2040_v5  ;;  %v2209_v22 = vrot.slane %v3504_v29, 1  ;;  %v2252_v48 = vrot.slane %v3515_v41, 1  ;;  %v3516_v52 = vld [vmem:[%s3670_s9 + $0x190] sm:$0x3] }
 0x39a   : > { %2116 = vmatpush.bf16.msrb.mxu3 %v2048_v18  ;;  %v2210_v19 = vsel %vm650_vm3, %v2207_v42, %v2209_v22  ;;  %v2253_v5 = vsel %vm650_vm3, %v2251_v58, %v2252_v48  ;;  %v2254_v18 = vrot.slane %v3516_v52, 1 }
 0x39c   : > { %v2255_v50 = vsel %vm650_vm3, %v2252_v48, %v2254_v18 }
 0x39d   : > { %2534 = vmatmul.msk.bf16.vlgmr.msrb.gmra.mxu3 %vm2083_vm0, %v2544_v25  ;;  %2299 = vxpose.xlu1.b32.cont [12/16] (narrow) %v2205_v28, 32  ;;  %v2248_v25 = vsel %vm650_vm3, %v2246_v43, %v2247_v0 }
 0x39e   : > { %2328 = vxpose.xlu2.b32.cont [9/16] (narrow) %v2238_v57, 32 }
 0x3a5   : > { %2300 = vxpose.xlu1.b32.cont [13/16] (narrow) %v2208_v54, 32 }
 0x3a6   : > { %2329 = vxpose.xlu2.b32.cont [10/16] (narrow) %v2240_v33, 32 }
 0x3ad   : > { %2535 = vmatmul.msk.bf16.gmra.mxu3 %vm2083_vm0, %v2545_v26  ;;  %2301 = vxpose.xlu1.b32.cont [14/16] (narrow) %v2210_v19, 32  ;;  %v3513_v26 = vld [vmem:[%s3670_s9 + $0x178] sm:$0x3]  ;;  %s2546_s9 = sshll.u32 %s3638_s22, 6 }
 0x3ae   : > { %2330 = vxpose.xlu2.b32.cont [11/16] (narrow) %v2243_v61, 32  ;;  %v2249_v23 = vrot.slane %v3513_v26, 1  ;;  %s2380_s16 = scalar_lea.hbm %s5869_s5, %s2546_s9 }
 0x3af   : > { %s2383_s23 = sshll.u32 %s2380_s16, 4  ;;  %s2384_s23 = int_to_ptr.hbm [resolvable:$true] %s2383_s23 }
 0x3b0   : > { %v2250_v51 = vsel %vm650_vm3, %v2247_v0, %v2249_v23  ;;  %s3531_s26 = sshra.s32 %s2384_s23, 4  ;;  %s3532_s26 = int_to_ptr.hbm [resolvable:$true] %s3531_s26 }
 0x3b1   : > { %s3533_s22 = scalar_lea.hbm %s3532_s26, 64  ;;  %p3538_p0 = scmp.lt.s32.totalorder %s3532_s26, %s5869_s5 }
 0x3b2   : > { %p3534_p11 = scmp.ne.s32.totalorder %s3532_s26, %s3533_s22  ;;  %p3539_p1 = scmp.lt.s32.totalorder %s3537_s7, %s3533_s22 }
 0x3b4   : > { %p3535_p12 = pnand %p3534_p11, %p3655_p5  ;;  %p3540_p2 = por %p3539_p1, %p3538_p0 }
 0x3b5   : > { %2302 = vxpose.xlu1.b32.cont [15/16] (narrow) %v2213_v3, 32 }
 0x3b6   : > { %2331 = vxpose.xlu2.b32.cont [12/16] (narrow) %v2245_v15, 32  ;;  %p3536_p13 = pneg %p3535_p12 }
 0x3b8   : > { %p3541_p3 = pnand %p3540_p2, %p3536_p13 }
 0x3bd   : > { %2303 = vxpose.xlu1.b32.end [16/16] (narrow) %v2215_v11, 32 }
 0x3be   : > { %2332 = vxpose.xlu2.b32.cont [13/16] (narrow) %v2248_v25, 32 }
 0x3c6   : > { %2333 = vxpose.xlu2.b32.cont [14/16] (narrow) %v2250_v51, 32 }
 0x3ce   : > { %2334 = vxpose.xlu2.b32.cont [15/16] (narrow) %v2253_v5, 32 }
 0x3d6   : > { %2335 = vxpose.xlu2.b32.end [16/16] (narrow) %v2255_v50, 32 }
 0x3e9   : > { %v2304_v55 = vpop.trf.xlu1 }
 0x3f1   : > { %v2305_v2 = vpop.trf.xlu1 }
 0x3f7   : > { %v2336_v32 = vpop.trf.xlu2 }
 0x3f9   : > { %v2306_v37 = vpop.trf.xlu1 }
 0x3ff   : > { %v2337_v42 = vpop.trf.xlu2 }
 0x401   : > { %v2307_v17 = vpop.trf.xlu1 }
 0x407   : > { %v2338_v29 = vpop.trf.xlu2 }
 0x40f   : > { %v2339_v20 = vpop.trf.xlu2 }
 0x414   : > { %v2099_v47 = vpop.f32.mrf.mxu1 }
 0x415   : > { %v2100_v40 = vadd.f32 %v2099_v47, %v2056_v27 }
 0x417   : > { %v2352_v24 = vadd.f32 %v2304_v55, %v2100_v40 }
 0x419   : > { %2360 = vst [vmem:[%s5820_s13] sm:$0xff] %v2352_v24 }
 0x41a   : > { %v2104_v45 = vpop.f32.mrf.mxu2 }
 0x41b   : > { %v2105_v9 = vadd.f32 %v2104_v45, %v2066_v14 }
 0x41c   : > { %v2101_v36 = vpop.f32.mrf.mxu1 }
 0x41d   : > { %v2356_v6 = vadd.f32 %v2306_v37, %v2105_v9  ;;  %v2102_v21 = vadd.f32 %v2101_v36, %v2061_v53 }
 0x41f   : > { %2364 = vst [vmem:[%s5820_s13 + $0x20] sm:$0xff] %v2356_v6  ;;  %v2354_v28 = vadd.f32 %v2305_v2, %v2102_v21 }
 0x420   : > { %v2118_v59 = vpop.f32.mrf.mxu3 }
 0x421   : > { %2362 = vst [vmem:[%s5820_s13 + $0x10] sm:$0xff] %v2354_v28  ;;  %v2119_v10 = vadd.f32 %v2118_v59, %v2056_v27 }
 0x422   : > { %v2106_v39 = vpop.f32.mrf.mxu2 }
 0x423   : > { %v2353_v31 = vadd.f32 %v2336_v32, %v2119_v10  ;;  %v2107_v49 = vadd.f32 %v2106_v39, %v2071_v16 }
 0x425   : > { %2361 = vst [vmem:[%s5820_s13 + $0x8] sm:$0xff] %v2353_v31  ;;  %v2358_v57 = vadd.f32 %v2307_v17, %v2107_v49 }
 0x427   : > { %2366 = vst [vmem:[%s5820_s13 + $0x30] sm:$0xff] %v2358_v57 }
 0x428   : > { %v2120_v54 = vpop.f32.mrf.mxu3 }
 0x429   : > { %v2121_v60 = vadd.f32 %v2120_v54, %v2061_v53 }
 0x42b   : > { %v2355_v4 = vadd.f32 %v2337_v42, %v2121_v60 }
 0x42d   : > { %2363 = vst [vmem:[%s5820_s13 + $0x18] sm:$0xff] %v2355_v4 }
 0x430   : > { %v2123_v22 = vpop.f32.mrf.mxu3 }
 0x431   : > { %v2124_v33 = vadd.f32 %v2123_v22, %v2066_v14 }
 0x433   : > { %v2357_v19 = vadd.f32 %v2338_v29, %v2124_v33 }
 0x435   : > { %2365 = vst [vmem:[%s5820_s13 + $0x28] sm:$0xff] %v2357_v19 }
 0x438   : > { %v2125_v63 = vpop.f32.mrf.mxu3 }
 0x439   : > { %v2126_v38 = vadd.f32 %v2125_v63, %v2071_v16 }
 0x43b   : > { %v2359_v56 = vadd.f32 %v2339_v20, %v2126_v38 }
 0x43d   : > { %2367 = vst [vmem:[%s5820_s13 + $0x38] sm:$0xff] %v2359_v56 }
 0x43e   : > { %3544 = shalt.err (!%p3541_p3)
}
 0x43f   : > { %s3585_s11 = smov 256   ;;  %s3586_s12 = smov 16  }
 0x440   : > { %2549 = dma.vmem_to_hbm [thread:$0]  (%p3655_p5), %s2382_s17, 1024, %s2384_s23, %s2369_s25, %s3585_s11, %s3585_s11, %s3586_s12  }
 0x441 PF: > { %p2555_p4 = scmp.ge.s32.totalorder %s3579_s21, 2  ;;  %s2398_s13 = sand.u32 1, %s3567_s18  }
 0x442   : > { %s2399_s9 = scalar_lea.sflag [#allocation3], %s2398_s13 }
 0x443   : > { %p2552_p7 = pnand %p2555_p4, %p3659_p6 }
 0x445   : > { %p2553_p8 = pneg %p2552_p7 }
 0x447   : > { %3562 = dma.done.wait (%p2553_p8), %s2399_s9, 1024  }
 0x448   : > { %3564 = vsyncadd (%p2553_p8), %s2399_s9, 4294966272  ;;  %p15_p9 = scmp.ge.s32.totalorder %s3642_s24, 4   ;;  %s6208_s18 = smov %s3571_s19 }
 0x449   : > { %s6209_s19 = smov %s3575_s20  ;;  %s6210_s20 = smov %s3653_s27 }
 0x44a   : > { %s6211_s21 = smov %s3642_s24  ;;  %17 = sbr.rel (!%p15_p9) target bundleno = 3 (0x3), region = 75 }
 0x44f   :  { %2405 = vsyncpa [#allocation3], 1 }
 0x450   :  { %2407 = vsyncpa [#allocation3 + $0x1], 1 }

</bundles_post_ra>
